<compile_context>
chip_gen: v6e
topology: v6e:2x2x1
jax: 0.10.0
libtpu: 0.0.40
codegen_flags: <defaults>
</compile_context>

<pallas_src>
import functools

import jax
import jax.numpy as jnp
from jax.experimental import pallas as pl
from jax.experimental.pallas import tpu as pltpu


# ----------------------------------------------------------------------------
# Fused kernel: one (batch, row-block) grid step.
# ----------------------------------------------------------------------------
def _fused_channel_mix_kernel(slab_ref, taps_ref, wkr_ref, wv_ref, o_ref, *,
                              RB, W, C, SUB, Hd_pad, CO):
    # slab_ref: (1, RB+4, W+4, C)  zero-padded input slab (halo included)
    # taps_ref: (25, C)            reparameterized depthwise-5x5 taps (ky*5+kx)
    # wkr_ref : (C, Hd_pad + C)    [ key | receptance ] merged weight
    # wv_ref  : (Hd_pad, C)        value weight, zero rows for Hd..Hd_pad
    # o_ref   : (1, RB*W, CO)      lane-dense output block (CO = C padded to 128)
    taps = taps_ref[...]                                   # (25, C)

    # ---- depthwise 5x5, SUB rows at a time (bounded live vregs, no spills) ----
    parts = []
    for s0 in range(0, RB, SUB):
        sub = min(SUB, RB - s0)
        acc = jnp.zeros((sub, W, C), jnp.float32)
        for ky in range(5):
            for kx in range(5):
                win = slab_ref[0, s0 + ky:s0 + ky + sub, kx:kx + W, :]
                # multiply in compute dtype (bf16 VPU on v6e/v7x), accumulate f32
                acc = acc + win * taps[ky * 5 + kx][None, None, :]
        parts.append(acc.reshape(sub * W, C))
    xin = parts[0] if len(parts) == 1 else jnp.concatenate(parts, axis=0)
    xin = xin.astype(wkr_ref.dtype)                        # (RB*W, C)

    # ---- one MXU launch for key + receptance, then value --------------------
    kr = jnp.dot(xin, wkr_ref[...], preferred_element_type=jnp.float32)
    k = jnp.square(jnp.maximum(kr[:, :Hd_pad], 0.0))       # relu(key)^2, f32
    r = jax.nn.sigmoid(kr[:, Hd_pad:])                     # (RB*W, C), f32
    kv = jnp.dot(k.astype(wv_ref.dtype), wv_ref[...],
                 preferred_element_type=jnp.float32)       # (RB*W, C)

    res = (r * kv).astype(o_ref.dtype)
    if CO != C:  # pad channels so the store / HBM writeback is lane-dense
        res = jnp.concatenate(
            [res, jnp.zeros((res.shape[0], CO - C), o_ref.dtype)], axis=-1)
    o_ref[0] = res


# ----------------------------------------------------------------------------
# Parameter setup / glue
# ----------------------------------------------------------------------------
def make_omni_shift_taps(w1, w3, w5, alpha):
    """Reparam: identity + 1x1 + 3x3 + 5x5 depthwise kernels -> (25, C) taps.
    w1: (C,1,1,1), w3: (C,1,3,3), w5: (C,1,5,5), alpha: (4,)."""
    p1 = jnp.pad(w1, ((0, 0), (0, 0), (2, 2), (2, 2)))
    p3 = jnp.pad(w3, ((0, 0), (0, 0), (1, 1), (1, 1)))
    ident = jnp.pad(jnp.ones_like(w1), ((0, 0), (0, 0), (2, 2), (2, 2)))
    comb = alpha[0] * ident + alpha[1] * p1 + alpha[2] * p3 + alpha[3] * w5
    return comb[:, 0].transpose(1, 2, 0).reshape(25, -1)   # (ky*5+kx, C)


def channel_mix_forward(x_btc, resolution, params, *,
                        compute_dtype=jnp.float32,
                        target_block_tokens=256,        # M per MXU launch
                        vmem_limit_bytes=64 * 1024 * 1024):
    """x_btc: (B, T, C) with T = H*W; matches ChannelMix.forward (eval path).

    compute_dtype=jnp.bfloat16 enables the bf16 MXU + bf16 VPU tap path
    (recommended on v6e/v7x); accumulation stays f32.
    v5e/v6e (128 MiB VMEM): target_block_tokens / vmem_limit_bytes can be raised
    (e.g. 512 tokens, ~100 MiB).  v7x (64 MiB): defaults already use ~1 MiB/step.
    """
    H, W = resolution
    B, T, C = x_btc.shape
    assert T == H * W, "sequence length must equal H*W"
    wk, wv, wr = params["wk"], params["wv"], params["wr"]
    Hd = wk.shape[1]

    # Row-block size: >=target_block_tokens tokens per step, 8-aligned token count.
    RB = max(1, -(-target_block_tokens // W))
    while (RB * W) % 8:
        RB += 1
    nrb = -(-H // RB)
    H_pad = nrb * RB
    T_pad = H_pad * W
    SUB = max(1, min(RB, max(1, 128 // W)))                 # conv register sub-block

    CO = ((C + 127) // 128) * 128                           # lane-dense output width
    Hd_pad = ((Hd + 127) // 128) * 128                      # lane-aligned k/r split

    # Merged [key | receptance] RHS (zero columns Hd..Hd_pad keep slices aligned
    # and contribute nothing through the zero rows of wv_pad).
    w_kr = jnp.zeros((C, Hd_pad + C), compute_dtype)
    w_kr = w_kr.at[:, :Hd].set(wk.astype(compute_dtype))
    w_kr = w_kr.at[:, Hd_pad:].set(wr.astype(compute_dtype))
    wv_pad = jnp.zeros((Hd_pad, C), compute_dtype).at[:Hd].set(wv.astype(compute_dtype))

    # Zero-pad spatially (5x5 halo + bottom rows up to a full row block) and
    # gather overlapping (RB+4)-row slabs so every grid step is independent and
    # its halo arrives via the same pipelined BlockSpec DMA as the payload.
    x_nhwc = x_btc.reshape(B, H, W, C).astype(compute_dtype)
    xp = jnp.pad(x_nhwc, ((0, 0), (2, 2 + H_pad - H), (2, 2), (0, 0)))
    row_idx = jnp.arange(nrb)[:, None] * RB + jnp.arange(RB + 4)[None, :]
    slabs = xp[:, row_idx].reshape(B * nrb, RB + 4, W + 4, C)

    kernel = functools.partial(_fused_channel_mix_kernel, RB=RB, W=W, C=C,
                               SUB=SUB, Hd_pad=Hd_pad, CO=CO)
    out_pad = pl.pallas_call(
        kernel,
        out_shape=jax.ShapeDtypeStruct((B, T_pad, CO), x_btc.dtype),
        grid=(B, nrb),
        in_specs=[
            pl.BlockSpec((1, RB + 4, W + 4, C),
                         lambda b, r: (b * nrb + r, 0, 0, 0)),
            pl.BlockSpec((25, C), lambda b, r: (0, 0)),              # taps (resident)
            pl.BlockSpec((C, Hd_pad + C), lambda b, r: (0, 0)),      # w_kr (resident)
            pl.BlockSpec((Hd_pad, C), lambda b, r: (0, 0)),          # wv   (resident)
        ],
        out_specs=pl.BlockSpec((1, RB * W, CO), lambda b, r: (b, r, 0)),
        compiler_params=pltpu.CompilerParams(
            # both axes independent (halo per block) -> megacore/2-TC sharding
            dimension_semantics=("parallel", "parallel"),
            vmem_limit_bytes=vmem_limit_bytes,
        ),
    )(slabs, params["omni_taps"].astype(compute_dtype), w_kr, wv_pad)

    if T_pad != T or CO != C:
        out_pad = out_pad[:, :T, :C]
    return out_pad


# ----------------------------------------------------------------------------
# Pure-JAX reference (correctness check)
# ----------------------------------------------------------------------------
def _reference(x_btc, resolution, params):
    H, W = resolution
    B, T, C = x_btc.shape
    x = x_btc.reshape(B, H, W, C)
    xp = jnp.pad(x, ((0, 0), (2, 2), (2, 2), (0, 0)))
    taps = params["omni_taps"]
    acc = jnp.zeros_like(x)
    for ky in range(5):
        for kx in range(5):
            acc = acc + xp[:, ky:ky + H, kx:kx + W, :] * taps[ky * 5 + kx][None, None, None, :]
    xf = acc.reshape(B * T, C)
    k = jnp.square(jnp.maximum(xf @ params["wk"], 0.0))
    kv = k @ params["wv"]
    r = jax.nn.sigmoid(xf @ params["wr"])
    return (r * kv).reshape(B, T, C)


if __name__ == "__main__":
    B, H, W = 2, 16, 16
    n_embd = 48
    hidden_rate = 4
    hidden_sz = hidden_rate * n_embd
    T = H * W

    key = jax.random.PRNGKey(0)
    ks = jax.random.split(key, 8)

    # OmniShift parameters (shapes of nn.Conv2d(..., groups=dim, bias=False))
    w1 = jax.random.normal(ks[0], (n_embd, 1, 1, 1), jnp.float32) * 0.1
    w3 = jax.random.normal(ks[1], (n_embd, 1, 3, 3), jnp.float32) * 0.1
    w5 = jax.random.normal(ks[2], (n_embd, 1, 5, 5), jnp.float32) * 0.1
    alpha = jax.random.normal(ks[3], (4,), jnp.float32)

    # Linear weights stored as (in, out) so the kernel computes x @ W.
    wk = jax.random.normal(ks[4], (n_embd, hidden_sz), jnp.float32) * 0.05
    wv = jax.random.normal(ks[5], (hidden_sz, n_embd), jnp.float32) * 0.05
    wr = jax.random.normal(ks[6], (n_embd, n_embd), jnp.float32) * 0.05

    params = {
        "omni_taps": make_omni_shift_taps(w1, w3, w5, alpha),
        "wk": wk,
        "wv": wv,
        "wr": wr,
    }

    x = jax.random.normal(ks[7], (B, T, n_embd), jnp.float32)
    ref = _reference(x, (H, W), params)

    # f32 path: tight check.
    out = jax.block_until_ready(
        channel_mix_forward(x, (H, W), params, compute_dtype=jnp.float32))
    assert out.shape == (B, T, n_embd)
    assert jnp.allclose(out, ref, atol=2e-3, rtol=2e-3), "f32 mismatch vs reference"

    # bf16 MXU + bf16 conv-math path (v6e/v7x fast path): looser tolerance.
    out_bf16 = jax.block_until_ready(
        channel_mix_forward(x, (H, W), params, compute_dtype=jnp.bfloat16))
    assert out_bf16.shape == (B, T, n_embd)
    assert jnp.allclose(out_bf16, ref, atol=5e-2, rtol=5e-2), "bf16 mismatch vs reference"

    print("KERNEL_OK")
</pallas_src>

<mosaic_0001>
module attributes {stable_mosaic.version = 11 : i64} {
  func.func @_fused_channel_mix_kernel(%arg0: i32, %arg1: i32, %arg2: memref<1x20x20x48xf32, #tpu.memory_space<vmem>>, %arg3: memref<25x48xf32, #tpu.memory_space<vmem>>, %arg4: memref<48x304xf32, #tpu.memory_space<vmem>>, %arg5: memref<256x48xf32, #tpu.memory_space<vmem>>, %arg6: memref<1x256x128xf32, #tpu.memory_space<vmem>>) attributes {dimension_semantics = [#tpu.dimension_semantics<parallel>, #tpu.dimension_semantics<parallel>], iteration_bounds = array<i64: 2, 1>, scalar_prefetch = 0 : i64, scratch_operands = 0 : i64, tpu.core_type = #tpu.core_type<tc>, window_params = [{transform_indices = @transform_0, window_bounds = array<i64: 1, 20, 20, 48>}, {pipeline_mode = #tpu.pipeline_mode<synchronous>, transform_indices = @transform_1, window_bounds = array<i64: 25, 48>}, {pipeline_mode = #tpu.pipeline_mode<synchronous>, transform_indices = @transform_2, window_bounds = array<i64: 48, 304>}, {pipeline_mode = #tpu.pipeline_mode<synchronous>, transform_indices = @transform_3, window_bounds = array<i64: 256, 48>}, {transform_indices = @transform_4, window_bounds = array<i64: 1, 256, 128>}]} {
    %c0 = arith.constant 0 : index
    %c0_0 = arith.constant 0 : index
    %0 = vector.load %arg3[%c0, %c0_0] : memref<25x48xf32, #tpu.memory_space<vmem>>, vector<25x48xf32>
    %cst = arith.constant 0.000000e+00 : f32
    %1 = vector.broadcast %cst : f32 to vector<8x16x48xf32>
    %c0_1 = arith.constant 0 : index
    %c0_2 = arith.constant 0 : index
    %c0_3 = arith.constant 0 : index
    %c0_4 = arith.constant 0 : index
    %2 = vector.load %arg2[%c0_1, %c0_2, %c0_3, %c0_4] : memref<1x20x20x48xf32, #tpu.memory_space<vmem>>, vector<1x8x16x48xf32>
    %3 = vector.shape_cast %2 : vector<1x8x16x48xf32> to vector<8x16x48xf32>
    %4 = vector.extract_strided_slice %0 {offsets = [0, 0], sizes = [1, 48], strides = [1, 1]} : vector<25x48xf32> to vector<1x48xf32>
    %5 = vector.shape_cast %4 : vector<1x48xf32> to vector<48xf32>
    %6 = vector.shape_cast %5 : vector<48xf32> to vector<1x1x48xf32>
    %7 = vector.broadcast %6 : vector<1x1x48xf32> to vector<8x16x48xf32>
    %8 = arith.mulf %3, %7 : vector<8x16x48xf32>
    %9 = arith.addf %1, %8 : vector<8x16x48xf32>
    %c0_5 = arith.constant 0 : index
    %c0_6 = arith.constant 0 : index
    %c1 = arith.constant 1 : index
    %c0_7 = arith.constant 0 : index
    %10 = vector.load %arg2[%c0_5, %c0_6, %c1, %c0_7] : memref<1x20x20x48xf32, #tpu.memory_space<vmem>>, vector<1x8x16x48xf32>
    %11 = vector.shape_cast %10 : vector<1x8x16x48xf32> to vector<8x16x48xf32>
    %12 = vector.extract_strided_slice %0 {offsets = [1, 0], sizes = [1, 48], strides = [1, 1]} : vector<25x48xf32> to vector<1x48xf32>
    %13 = vector.shape_cast %12 : vector<1x48xf32> to vector<48xf32>
    %14 = vector.shape_cast %13 : vector<48xf32> to vector<1x1x48xf32>
    %15 = vector.broadcast %14 : vector<1x1x48xf32> to vector<8x16x48xf32>
    %16 = arith.mulf %11, %15 : vector<8x16x48xf32>
    %17 = arith.addf %9, %16 : vector<8x16x48xf32>
    %c0_8 = arith.constant 0 : index
    %c0_9 = arith.constant 0 : index
    %c2 = arith.constant 2 : index
    %c0_10 = arith.constant 0 : index
    %18 = vector.load %arg2[%c0_8, %c0_9, %c2, %c0_10] : memref<1x20x20x48xf32, #tpu.memory_space<vmem>>, vector<1x8x16x48xf32>
    %19 = vector.shape_cast %18 : vector<1x8x16x48xf32> to vector<8x16x48xf32>
    %20 = vector.extract_strided_slice %0 {offsets = [2, 0], sizes = [1, 48], strides = [1, 1]} : vector<25x48xf32> to vector<1x48xf32>
    %21 = vector.shape_cast %20 : vector<1x48xf32> to vector<48xf32>
    %22 = vector.shape_cast %21 : vector<48xf32> to vector<1x1x48xf32>
    %23 = vector.broadcast %22 : vector<1x1x48xf32> to vector<8x16x48xf32>
    %24 = arith.mulf %19, %23 : vector<8x16x48xf32>
    %25 = arith.addf %17, %24 : vector<8x16x48xf32>
    %c0_11 = arith.constant 0 : index
    %c0_12 = arith.constant 0 : index
    %c3 = arith.constant 3 : index
    %c0_13 = arith.constant 0 : index
    %26 = vector.load %arg2[%c0_11, %c0_12, %c3, %c0_13] : memref<1x20x20x48xf32, #tpu.memory_space<vmem>>, vector<1x8x16x48xf32>
    %27 = vector.shape_cast %26 : vector<1x8x16x48xf32> to vector<8x16x48xf32>
    %28 = vector.extract_strided_slice %0 {offsets = [3, 0], sizes = [1, 48], strides = [1, 1]} : vector<25x48xf32> to vector<1x48xf32>
    %29 = vector.shape_cast %28 : vector<1x48xf32> to vector<48xf32>
    %30 = vector.shape_cast %29 : vector<48xf32> to vector<1x1x48xf32>
    %31 = vector.broadcast %30 : vector<1x1x48xf32> to vector<8x16x48xf32>
    %32 = arith.mulf %27, %31 : vector<8x16x48xf32>
    %33 = arith.addf %25, %32 : vector<8x16x48xf32>
    %c0_14 = arith.constant 0 : index
    %c0_15 = arith.constant 0 : index
    %c4 = arith.constant 4 : index
    %c0_16 = arith.constant 0 : index
    %34 = vector.load %arg2[%c0_14, %c0_15, %c4, %c0_16] : memref<1x20x20x48xf32, #tpu.memory_space<vmem>>, vector<1x8x16x48xf32>
    %35 = vector.shape_cast %34 : vector<1x8x16x48xf32> to vector<8x16x48xf32>
    %36 = vector.extract_strided_slice %0 {offsets = [4, 0], sizes = [1, 48], strides = [1, 1]} : vector<25x48xf32> to vector<1x48xf32>
    %37 = vector.shape_cast %36 : vector<1x48xf32> to vector<48xf32>
    %38 = vector.shape_cast %37 : vector<48xf32> to vector<1x1x48xf32>
    %39 = vector.broadcast %38 : vector<1x1x48xf32> to vector<8x16x48xf32>
    %40 = arith.mulf %35, %39 : vector<8x16x48xf32>
    %41 = arith.addf %33, %40 : vector<8x16x48xf32>
    %c0_17 = arith.constant 0 : index
    %c1_18 = arith.constant 1 : index
    %c0_19 = arith.constant 0 : index
    %c0_20 = arith.constant 0 : index
    %42 = vector.load %arg2[%c0_17, %c1_18, %c0_19, %c0_20] : memref<1x20x20x48xf32, #tpu.memory_space<vmem>>, vector<1x8x16x48xf32>
    %43 = vector.shape_cast %42 : vector<1x8x16x48xf32> to vector<8x16x48xf32>
    %44 = vector.extract_strided_slice %0 {offsets = [5, 0], sizes = [1, 48], strides = [1, 1]} : vector<25x48xf32> to vector<1x48xf32>
    %45 = vector.shape_cast %44 : vector<1x48xf32> to vector<48xf32>
    %46 = vector.shape_cast %45 : vector<48xf32> to vector<1x1x48xf32>
    %47 = vector.broadcast %46 : vector<1x1x48xf32> to vector<8x16x48xf32>
    %48 = arith.mulf %43, %47 : vector<8x16x48xf32>
    %49 = arith.addf %41, %48 : vector<8x16x48xf32>
    %c0_21 = arith.constant 0 : index
    %c1_22 = arith.constant 1 : index
    %c1_23 = arith.constant 1 : index
    %c0_24 = arith.constant 0 : index
    %50 = vector.load %arg2[%c0_21, %c1_22, %c1_23, %c0_24] : memref<1x20x20x48xf32, #tpu.memory_space<vmem>>, vector<1x8x16x48xf32>
    %51 = vector.shape_cast %50 : vector<1x8x16x48xf32> to vector<8x16x48xf32>
    %52 = vector.extract_strided_slice %0 {offsets = [6, 0], sizes = [1, 48], strides = [1, 1]} : vector<25x48xf32> to vector<1x48xf32>
    %53 = vector.shape_cast %52 : vector<1x48xf32> to vector<48xf32>
    %54 = vector.shape_cast %53 : vector<48xf32> to vector<1x1x48xf32>
    %55 = vector.broadcast %54 : vector<1x1x48xf32> to vector<8x16x48xf32>
    %56 = arith.mulf %51, %55 : vector<8x16x48xf32>
    %57 = arith.addf %49, %56 : vector<8x16x48xf32>
    %c0_25 = arith.constant 0 : index
    %c1_26 = arith.constant 1 : index
    %c2_27 = arith.constant 2 : index
    %c0_28 = arith.constant 0 : index
    %58 = vector.load %arg2[%c0_25, %c1_26, %c2_27, %c0_28] : memref<1x20x20x48xf32, #tpu.memory_space<vmem>>, vector<1x8x16x48xf32>
    %59 = vector.shape_cast %58 : vector<1x8x16x48xf32> to vector<8x16x48xf32>
    %60 = vector.extract_strided_slice %0 {offsets = [7, 0], sizes = [1, 48], strides = [1, 1]} : vector<25x48xf32> to vector<1x48xf32>
    %61 = vector.shape_cast %60 : vector<1x48xf32> to vector<48xf32>
    %62 = vector.shape_cast %61 : vector<48xf32> to vector<1x1x48xf32>
    %63 = vector.broadcast %62 : vector<1x1x48xf32> to vector<8x16x48xf32>
    %64 = arith.mulf %59, %63 : vector<8x16x48xf32>
    %65 = arith.addf %57, %64 : vector<8x16x48xf32>
    %c0_29 = arith.constant 0 : index
    %c1_30 = arith.constant 1 : index
    %c3_31 = arith.constant 3 : index
    %c0_32 = arith.constant 0 : index
    %66 = vector.load %arg2[%c0_29, %c1_30, %c3_31, %c0_32] : memref<1x20x20x48xf32, #tpu.memory_space<vmem>>, vector<1x8x16x48xf32>
    %67 = vector.shape_cast %66 : vector<1x8x16x48xf32> to vector<8x16x48xf32>
    %68 = vector.extract_strided_slice %0 {offsets = [8, 0], sizes = [1, 48], strides = [1, 1]} : vector<25x48xf32> to vector<1x48xf32>
    %69 = vector.shape_cast %68 : vector<1x48xf32> to vector<48xf32>
    %70 = vector.shape_cast %69 : vector<48xf32> to vector<1x1x48xf32>
    %71 = vector.broadcast %70 : vector<1x1x48xf32> to vector<8x16x48xf32>
    %72 = arith.mulf %67, %71 : vector<8x16x48xf32>
    %73 = arith.addf %65, %72 : vector<8x16x48xf32>
    %c0_33 = arith.constant 0 : index
    %c1_34 = arith.constant 1 : index
    %c4_35 = arith.constant 4 : index
    %c0_36 = arith.constant 0 : index
    %74 = vector.load %arg2[%c0_33, %c1_34, %c4_35, %c0_36] : memref<1x20x20x48xf32, #tpu.memory_space<vmem>>, vector<1x8x16x48xf32>
    %75 = vector.shape_cast %74 : vector<1x8x16x48xf32> to vector<8x16x48xf32>
    %76 = vector.extract_strided_slice %0 {offsets = [9, 0], sizes = [1, 48], strides = [1, 1]} : vector<25x48xf32> to vector<1x48xf32>
    %77 = vector.shape_cast %76 : vector<1x48xf32> to vector<48xf32>
    %78 = vector.shape_cast %77 : vector<48xf32> to vector<1x1x48xf32>
    %79 = vector.broadcast %78 : vector<1x1x48xf32> to vector<8x16x48xf32>
    %80 = arith.mulf %75, %79 : vector<8x16x48xf32>
    %81 = arith.addf %73, %80 : vector<8x16x48xf32>
    %c0_37 = arith.constant 0 : index
    %c2_38 = arith.constant 2 : index
    %c0_39 = arith.constant 0 : index
    %c0_40 = arith.constant 0 : index
    %82 = vector.load %arg2[%c0_37, %c2_38, %c0_39, %c0_40] : memref<1x20x20x48xf32, #tpu.memory_space<vmem>>, vector<1x8x16x48xf32>
    %83 = vector.shape_cast %82 : vector<1x8x16x48xf32> to vector<8x16x48xf32>
    %84 = vector.extract_strided_slice %0 {offsets = [10, 0], sizes = [1, 48], strides = [1, 1]} : vector<25x48xf32> to vector<1x48xf32>
    %85 = vector.shape_cast %84 : vector<1x48xf32> to vector<48xf32>
    %86 = vector.shape_cast %85 : vector<48xf32> to vector<1x1x48xf32>
    %87 = vector.broadcast %86 : vector<1x1x48xf32> to vector<8x16x48xf32>
    %88 = arith.mulf %83, %87 : vector<8x16x48xf32>
    %89 = arith.addf %81, %88 : vector<8x16x48xf32>
    %c0_41 = arith.constant 0 : index
    %c2_42 = arith.constant 2 : index
    %c1_43 = arith.constant 1 : index
    %c0_44 = arith.constant 0 : index
    %90 = vector.load %arg2[%c0_41, %c2_42, %c1_43, %c0_44] : memref<1x20x20x48xf32, #tpu.memory_space<vmem>>, vector<1x8x16x48xf32>
    %91 = vector.shape_cast %90 : vector<1x8x16x48xf32> to vector<8x16x48xf32>
    %92 = vector.extract_strided_slice %0 {offsets = [11, 0], sizes = [1, 48], strides = [1, 1]} : vector<25x48xf32> to vector<1x48xf32>
    %93 = vector.shape_cast %92 : vector<1x48xf32> to vector<48xf32>
    %94 = vector.shape_cast %93 : vector<48xf32> to vector<1x1x48xf32>
    %95 = vector.broadcast %94 : vector<1x1x48xf32> to vector<8x16x48xf32>
    %96 = arith.mulf %91, %95 : vector<8x16x48xf32>
    %97 = arith.addf %89, %96 : vector<8x16x48xf32>
    %c0_45 = arith.constant 0 : index
    %c2_46 = arith.constant 2 : index
    %c2_47 = arith.constant 2 : index
    %c0_48 = arith.constant 0 : index
    %98 = vector.load %arg2[%c0_45, %c2_46, %c2_47, %c0_48] : memref<1x20x20x48xf32, #tpu.memory_space<vmem>>, vector<1x8x16x48xf32>
    %99 = vector.shape_cast %98 : vector<1x8x16x48xf32> to vector<8x16x48xf32>
    %100 = vector.extract_strided_slice %0 {offsets = [12, 0], sizes = [1, 48], strides = [1, 1]} : vector<25x48xf32> to vector<1x48xf32>
    %101 = vector.shape_cast %100 : vector<1x48xf32> to vector<48xf32>
    %102 = vector.shape_cast %101 : vector<48xf32> to vector<1x1x48xf32>
    %103 = vector.broadcast %102 : vector<1x1x48xf32> to vector<8x16x48xf32>
    %104 = arith.mulf %99, %103 : vector<8x16x48xf32>
    %105 = arith.addf %97, %104 : vector<8x16x48xf32>
    %c0_49 = arith.constant 0 : index
    %c2_50 = arith.constant 2 : index
    %c3_51 = arith.constant 3 : index
    %c0_52 = arith.constant 0 : index
    %106 = vector.load %arg2[%c0_49, %c2_50, %c3_51, %c0_52] : memref<1x20x20x48xf32, #tpu.memory_space<vmem>>, vector<1x8x16x48xf32>
    %107 = vector.shape_cast %106 : vector<1x8x16x48xf32> to vector<8x16x48xf32>
    %108 = vector.extract_strided_slice %0 {offsets = [13, 0], sizes = [1, 48], strides = [1, 1]} : vector<25x48xf32> to vector<1x48xf32>
    %109 = vector.shape_cast %108 : vector<1x48xf32> to vector<48xf32>
    %110 = vector.shape_cast %109 : vector<48xf32> to vector<1x1x48xf32>
    %111 = vector.broadcast %110 : vector<1x1x48xf32> to vector<8x16x48xf32>
    %112 = arith.mulf %107, %111 : vector<8x16x48xf32>
    %113 = arith.addf %105, %112 : vector<8x16x48xf32>
    %c0_53 = arith.constant 0 : index
    %c2_54 = arith.constant 2 : index
    %c4_55 = arith.constant 4 : index
    %c0_56 = arith.constant 0 : index
    %114 = vector.load %arg2[%c0_53, %c2_54, %c4_55, %c0_56] : memref<1x20x20x48xf32, #tpu.memory_space<vmem>>, vector<1x8x16x48xf32>
    %115 = vector.shape_cast %114 : vector<1x8x16x48xf32> to vector<8x16x48xf32>
    %116 = vector.extract_strided_slice %0 {offsets = [14, 0], sizes = [1, 48], strides = [1, 1]} : vector<25x48xf32> to vector<1x48xf32>
    %117 = vector.shape_cast %116 : vector<1x48xf32> to vector<48xf32>
    %118 = vector.shape_cast %117 : vector<48xf32> to vector<1x1x48xf32>
    %119 = vector.broadcast %118 : vector<1x1x48xf32> to vector<8x16x48xf32>
    %120 = arith.mulf %115, %119 : vector<8x16x48xf32>
    %121 = arith.addf %113, %120 : vector<8x16x48xf32>
    %c0_57 = arith.constant 0 : index
    %c3_58 = arith.constant 3 : index
    %c0_59 = arith.constant 0 : index
    %c0_60 = arith.constant 0 : index
    %122 = vector.load %arg2[%c0_57, %c3_58, %c0_59, %c0_60] : memref<1x20x20x48xf32, #tpu.memory_space<vmem>>, vector<1x8x16x48xf32>
    %123 = vector.shape_cast %122 : vector<1x8x16x48xf32> to vector<8x16x48xf32>
    %124 = vector.extract_strided_slice %0 {offsets = [15, 0], sizes = [1, 48], strides = [1, 1]} : vector<25x48xf32> to vector<1x48xf32>
    %125 = vector.shape_cast %124 : vector<1x48xf32> to vector<48xf32>
    %126 = vector.shape_cast %125 : vector<48xf32> to vector<1x1x48xf32>
    %127 = vector.broadcast %126 : vector<1x1x48xf32> to vector<8x16x48xf32>
    %128 = arith.mulf %123, %127 : vector<8x16x48xf32>
    %129 = arith.addf %121, %128 : vector<8x16x48xf32>
    %c0_61 = arith.constant 0 : index
    %c3_62 = arith.constant 3 : index
    %c1_63 = arith.constant 1 : index
    %c0_64 = arith.constant 0 : index
    %130 = vector.load %arg2[%c0_61, %c3_62, %c1_63, %c0_64] : memref<1x20x20x48xf32, #tpu.memory_space<vmem>>, vector<1x8x16x48xf32>
    %131 = vector.shape_cast %130 : vector<1x8x16x48xf32> to vector<8x16x48xf32>
    %132 = vector.extract_strided_slice %0 {offsets = [16, 0], sizes = [1, 48], strides = [1, 1]} : vector<25x48xf32> to vector<1x48xf32>
    %133 = vector.shape_cast %132 : vector<1x48xf32> to vector<48xf32>
    %134 = vector.shape_cast %133 : vector<48xf32> to vector<1x1x48xf32>
    %135 = vector.broadcast %134 : vector<1x1x48xf32> to vector<8x16x48xf32>
    %136 = arith.mulf %131, %135 : vector<8x16x48xf32>
    %137 = arith.addf %129, %136 : vector<8x16x48xf32>
    %c0_65 = arith.constant 0 : index
    %c3_66 = arith.constant 3 : index
    %c2_67 = arith.constant 2 : index
    %c0_68 = arith.constant 0 : index
    %138 = vector.load %arg2[%c0_65, %c3_66, %c2_67, %c0_68] : memref<1x20x20x48xf32, #tpu.memory_space<vmem>>, vector<1x8x16x48xf32>
    %139 = vector.shape_cast %138 : vector<1x8x16x48xf32> to vector<8x16x48xf32>
    %140 = vector.extract_strided_slice %0 {offsets = [17, 0], sizes = [1, 48], strides = [1, 1]} : vector<25x48xf32> to vector<1x48xf32>
    %141 = vector.shape_cast %140 : vector<1x48xf32> to vector<48xf32>
    %142 = vector.shape_cast %141 : vector<48xf32> to vector<1x1x48xf32>
    %143 = vector.broadcast %142 : vector<1x1x48xf32> to vector<8x16x48xf32>
    %144 = arith.mulf %139, %143 : vector<8x16x48xf32>
    %145 = arith.addf %137, %144 : vector<8x16x48xf32>
    %c0_69 = arith.constant 0 : index
    %c3_70 = arith.constant 3 : index
    %c3_71 = arith.constant 3 : index
    %c0_72 = arith.constant 0 : index
    %146 = vector.load %arg2[%c0_69, %c3_70, %c3_71, %c0_72] : memref<1x20x20x48xf32, #tpu.memory_space<vmem>>, vector<1x8x16x48xf32>
    %147 = vector.shape_cast %146 : vector<1x8x16x48xf32> to vector<8x16x48xf32>
    %148 = vector.extract_strided_slice %0 {offsets = [18, 0], sizes = [1, 48], strides = [1, 1]} : vector<25x48xf32> to vector<1x48xf32>
    %149 = vector.shape_cast %148 : vector<1x48xf32> to vector<48xf32>
    %150 = vector.shape_cast %149 : vector<48xf32> to vector<1x1x48xf32>
    %151 = vector.broadcast %150 : vector<1x1x48xf32> to vector<8x16x48xf32>
    %152 = arith.mulf %147, %151 : vector<8x16x48xf32>
    %153 = arith.addf %145, %152 : vector<8x16x48xf32>
    %c0_73 = arith.constant 0 : index
    %c3_74 = arith.constant 3 : index
    %c4_75 = arith.constant 4 : index
    %c0_76 = arith.constant 0 : index
    %154 = vector.load %arg2[%c0_73, %c3_74, %c4_75, %c0_76] : memref<1x20x20x48xf32, #tpu.memory_space<vmem>>, vector<1x8x16x48xf32>
    %155 = vector.shape_cast %154 : vector<1x8x16x48xf32> to vector<8x16x48xf32>
    %156 = vector.extract_strided_slice %0 {offsets = [19, 0], sizes = [1, 48], strides = [1, 1]} : vector<25x48xf32> to vector<1x48xf32>
    %157 = vector.shape_cast %156 : vector<1x48xf32> to vector<48xf32>
    %158 = vector.shape_cast %157 : vector<48xf32> to vector<1x1x48xf32>
    %159 = vector.broadcast %158 : vector<1x1x48xf32> to vector<8x16x48xf32>
    %160 = arith.mulf %155, %159 : vector<8x16x48xf32>
    %161 = arith.addf %153, %160 : vector<8x16x48xf32>
    %c0_77 = arith.constant 0 : index
    %c4_78 = arith.constant 4 : index
    %c0_79 = arith.constant 0 : index
    %c0_80 = arith.constant 0 : index
    %162 = vector.load %arg2[%c0_77, %c4_78, %c0_79, %c0_80] : memref<1x20x20x48xf32, #tpu.memory_space<vmem>>, vector<1x8x16x48xf32>
    %163 = vector.shape_cast %162 : vector<1x8x16x48xf32> to vector<8x16x48xf32>
    %164 = vector.extract_strided_slice %0 {offsets = [20, 0], sizes = [1, 48], strides = [1, 1]} : vector<25x48xf32> to vector<1x48xf32>
    %165 = vector.shape_cast %164 : vector<1x48xf32> to vector<48xf32>
    %166 = vector.shape_cast %165 : vector<48xf32> to vector<1x1x48xf32>
    %167 = vector.broadcast %166 : vector<1x1x48xf32> to vector<8x16x48xf32>
    %168 = arith.mulf %163, %167 : vector<8x16x48xf32>
    %169 = arith.addf %161, %168 : vector<8x16x48xf32>
    %c0_81 = arith.constant 0 : index
    %c4_82 = arith.constant 4 : index
    %c1_83 = arith.constant 1 : index
    %c0_84 = arith.constant 0 : index
    %170 = vector.load %arg2[%c0_81, %c4_82, %c1_83, %c0_84] : memref<1x20x20x48xf32, #tpu.memory_space<vmem>>, vector<1x8x16x48xf32>
    %171 = vector.shape_cast %170 : vector<1x8x16x48xf32> to vector<8x16x48xf32>
    %172 = vector.extract_strided_slice %0 {offsets = [21, 0], sizes = [1, 48], strides = [1, 1]} : vector<25x48xf32> to vector<1x48xf32>
    %173 = vector.shape_cast %172 : vector<1x48xf32> to vector<48xf32>
    %174 = vector.shape_cast %173 : vector<48xf32> to vector<1x1x48xf32>
    %175 = vector.broadcast %174 : vector<1x1x48xf32> to vector<8x16x48xf32>
    %176 = arith.mulf %171, %175 : vector<8x16x48xf32>
    %177 = arith.addf %169, %176 : vector<8x16x48xf32>
    %c0_85 = arith.constant 0 : index
    %c4_86 = arith.constant 4 : index
    %c2_87 = arith.constant 2 : index
    %c0_88 = arith.constant 0 : index
    %178 = vector.load %arg2[%c0_85, %c4_86, %c2_87, %c0_88] : memref<1x20x20x48xf32, #tpu.memory_space<vmem>>, vector<1x8x16x48xf32>
    %179 = vector.shape_cast %178 : vector<1x8x16x48xf32> to vector<8x16x48xf32>
    %180 = vector.extract_strided_slice %0 {offsets = [22, 0], sizes = [1, 48], strides = [1, 1]} : vector<25x48xf32> to vector<1x48xf32>
    %181 = vector.shape_cast %180 : vector<1x48xf32> to vector<48xf32>
    %182 = vector.shape_cast %181 : vector<48xf32> to vector<1x1x48xf32>
    %183 = vector.broadcast %182 : vector<1x1x48xf32> to vector<8x16x48xf32>
    %184 = arith.mulf %179, %183 : vector<8x16x48xf32>
    %185 = arith.addf %177, %184 : vector<8x16x48xf32>
    %c0_89 = arith.constant 0 : index
    %c4_90 = arith.constant 4 : index
    %c3_91 = arith.constant 3 : index
    %c0_92 = arith.constant 0 : index
    %186 = vector.load %arg2[%c0_89, %c4_90, %c3_91, %c0_92] : memref<1x20x20x48xf32, #tpu.memory_space<vmem>>, vector<1x8x16x48xf32>
    %187 = vector.shape_cast %186 : vector<1x8x16x48xf32> to vector<8x16x48xf32>
    %188 = vector.extract_strided_slice %0 {offsets = [23, 0], sizes = [1, 48], strides = [1, 1]} : vector<25x48xf32> to vector<1x48xf32>
    %189 = vector.shape_cast %188 : vector<1x48xf32> to vector<48xf32>
    %190 = vector.shape_cast %189 : vector<48xf32> to vector<1x1x48xf32>
    %191 = vector.broadcast %190 : vector<1x1x48xf32> to vector<8x16x48xf32>
    %192 = arith.mulf %187, %191 : vector<8x16x48xf32>
    %193 = arith.addf %185, %192 : vector<8x16x48xf32>
    %c0_93 = arith.constant 0 : index
    %c4_94 = arith.constant 4 : index
    %c4_95 = arith.constant 4 : index
    %c0_96 = arith.constant 0 : index
    %194 = vector.load %arg2[%c0_93, %c4_94, %c4_95, %c0_96] : memref<1x20x20x48xf32, #tpu.memory_space<vmem>>, vector<1x8x16x48xf32>
    %195 = vector.shape_cast %194 : vector<1x8x16x48xf32> to vector<8x16x48xf32>
    %196 = vector.extract_strided_slice %0 {offsets = [24, 0], sizes = [1, 48], strides = [1, 1]} : vector<25x48xf32> to vector<1x48xf32>
    %197 = vector.shape_cast %196 : vector<1x48xf32> to vector<48xf32>
    %198 = vector.shape_cast %197 : vector<48xf32> to vector<1x1x48xf32>
    %199 = vector.broadcast %198 : vector<1x1x48xf32> to vector<8x16x48xf32>
    %200 = arith.mulf %195, %199 : vector<8x16x48xf32>
    %201 = arith.addf %193, %200 : vector<8x16x48xf32>
    %202 = vector.shape_cast %201 : vector<8x16x48xf32> to vector<128x48xf32>
    %cst_97 = arith.constant 0.000000e+00 : f32
    %203 = vector.broadcast %cst_97 : f32 to vector<8x16x48xf32>
    %c0_98 = arith.constant 0 : index
    %c8 = arith.constant 8 : index
    %c0_99 = arith.constant 0 : index
    %c0_100 = arith.constant 0 : index
    %204 = vector.load %arg2[%c0_98, %c8, %c0_99, %c0_100] : memref<1x20x20x48xf32, #tpu.memory_space<vmem>>, vector<1x8x16x48xf32>
    %205 = vector.shape_cast %204 : vector<1x8x16x48xf32> to vector<8x16x48xf32>
    %206 = vector.extract_strided_slice %0 {offsets = [0, 0], sizes = [1, 48], strides = [1, 1]} : vector<25x48xf32> to vector<1x48xf32>
    %207 = vector.shape_cast %206 : vector<1x48xf32> to vector<48xf32>
    %208 = vector.shape_cast %207 : vector<48xf32> to vector<1x1x48xf32>
    %209 = vector.broadcast %208 : vector<1x1x48xf32> to vector<8x16x48xf32>
    %210 = arith.mulf %205, %209 : vector<8x16x48xf32>
    %211 = arith.addf %203, %210 : vector<8x16x48xf32>
    %c0_101 = arith.constant 0 : index
    %c8_102 = arith.constant 8 : index
    %c1_103 = arith.constant 1 : index
    %c0_104 = arith.constant 0 : index
    %212 = vector.load %arg2[%c0_101, %c8_102, %c1_103, %c0_104] : memref<1x20x20x48xf32, #tpu.memory_space<vmem>>, vector<1x8x16x48xf32>
    %213 = vector.shape_cast %212 : vector<1x8x16x48xf32> to vector<8x16x48xf32>
    %214 = vector.extract_strided_slice %0 {offsets = [1, 0], sizes = [1, 48], strides = [1, 1]} : vector<25x48xf32> to vector<1x48xf32>
    %215 = vector.shape_cast %214 : vector<1x48xf32> to vector<48xf32>
    %216 = vector.shape_cast %215 : vector<48xf32> to vector<1x1x48xf32>
    %217 = vector.broadcast %216 : vector<1x1x48xf32> to vector<8x16x48xf32>
    %218 = arith.mulf %213, %217 : vector<8x16x48xf32>
    %219 = arith.addf %211, %218 : vector<8x16x48xf32>
    %c0_105 = arith.constant 0 : index
    %c8_106 = arith.constant 8 : index
    %c2_107 = arith.constant 2 : index
    %c0_108 = arith.constant 0 : index
    %220 = vector.load %arg2[%c0_105, %c8_106, %c2_107, %c0_108] : memref<1x20x20x48xf32, #tpu.memory_space<vmem>>, vector<1x8x16x48xf32>
    %221 = vector.shape_cast %220 : vector<1x8x16x48xf32> to vector<8x16x48xf32>
    %222 = vector.extract_strided_slice %0 {offsets = [2, 0], sizes = [1, 48], strides = [1, 1]} : vector<25x48xf32> to vector<1x48xf32>
    %223 = vector.shape_cast %222 : vector<1x48xf32> to vector<48xf32>
    %224 = vector.shape_cast %223 : vector<48xf32> to vector<1x1x48xf32>
    %225 = vector.broadcast %224 : vector<1x1x48xf32> to vector<8x16x48xf32>
    %226 = arith.mulf %221, %225 : vector<8x16x48xf32>
    %227 = arith.addf %219, %226 : vector<8x16x48xf32>
    %c0_109 = arith.constant 0 : index
    %c8_110 = arith.constant 8 : index
    %c3_111 = arith.constant 3 : index
    %c0_112 = arith.constant 0 : index
    %228 = vector.load %arg2[%c0_109, %c8_110, %c3_111, %c0_112] : memref<1x20x20x48xf32, #tpu.memory_space<vmem>>, vector<1x8x16x48xf32>
    %229 = vector.shape_cast %228 : vector<1x8x16x48xf32> to vector<8x16x48xf32>
    %230 = vector.extract_strided_slice %0 {offsets = [3, 0], sizes = [1, 48], strides = [1, 1]} : vector<25x48xf32> to vector<1x48xf32>
    %231 = vector.shape_cast %230 : vector<1x48xf32> to vector<48xf32>
    %232 = vector.shape_cast %231 : vector<48xf32> to vector<1x1x48xf32>
    %233 = vector.broadcast %232 : vector<1x1x48xf32> to vector<8x16x48xf32>
    %234 = arith.mulf %229, %233 : vector<8x16x48xf32>
    %235 = arith.addf %227, %234 : vector<8x16x48xf32>
    %c0_113 = arith.constant 0 : index
    %c8_114 = arith.constant 8 : index
    %c4_115 = arith.constant 4 : index
    %c0_116 = arith.constant 0 : index
    %236 = vector.load %arg2[%c0_113, %c8_114, %c4_115, %c0_116] : memref<1x20x20x48xf32, #tpu.memory_space<vmem>>, vector<1x8x16x48xf32>
    %237 = vector.shape_cast %236 : vector<1x8x16x48xf32> to vector<8x16x48xf32>
    %238 = vector.extract_strided_slice %0 {offsets = [4, 0], sizes = [1, 48], strides = [1, 1]} : vector<25x48xf32> to vector<1x48xf32>
    %239 = vector.shape_cast %238 : vector<1x48xf32> to vector<48xf32>
    %240 = vector.shape_cast %239 : vector<48xf32> to vector<1x1x48xf32>
    %241 = vector.broadcast %240 : vector<1x1x48xf32> to vector<8x16x48xf32>
    %242 = arith.mulf %237, %241 : vector<8x16x48xf32>
    %243 = arith.addf %235, %242 : vector<8x16x48xf32>
    %c0_117 = arith.constant 0 : index
    %c9 = arith.constant 9 : index
    %c0_118 = arith.constant 0 : index
    %c0_119 = arith.constant 0 : index
    %244 = vector.load %arg2[%c0_117, %c9, %c0_118, %c0_119] : memref<1x20x20x48xf32, #tpu.memory_space<vmem>>, vector<1x8x16x48xf32>
    %245 = vector.shape_cast %244 : vector<1x8x16x48xf32> to vector<8x16x48xf32>
    %246 = vector.extract_strided_slice %0 {offsets = [5, 0], sizes = [1, 48], strides = [1, 1]} : vector<25x48xf32> to vector<1x48xf32>
    %247 = vector.shape_cast %246 : vector<1x48xf32> to vector<48xf32>
    %248 = vector.shape_cast %247 : vector<48xf32> to vector<1x1x48xf32>
    %249 = vector.broadcast %248 : vector<1x1x48xf32> to vector<8x16x48xf32>
    %250 = arith.mulf %245, %249 : vector<8x16x48xf32>
    %251 = arith.addf %243, %250 : vector<8x16x48xf32>
    %c0_120 = arith.constant 0 : index
    %c9_121 = arith.constant 9 : index
    %c1_122 = arith.constant 1 : index
    %c0_123 = arith.constant 0 : index
    %252 = vector.load %arg2[%c0_120, %c9_121, %c1_122, %c0_123] : memref<1x20x20x48xf32, #tpu.memory_space<vmem>>, vector<1x8x16x48xf32>
    %253 = vector.shape_cast %252 : vector<1x8x16x48xf32> to vector<8x16x48xf32>
    %254 = vector.extract_strided_slice %0 {offsets = [6, 0], sizes = [1, 48], strides = [1, 1]} : vector<25x48xf32> to vector<1x48xf32>
    %255 = vector.shape_cast %254 : vector<1x48xf32> to vector<48xf32>
    %256 = vector.shape_cast %255 : vector<48xf32> to vector<1x1x48xf32>
    %257 = vector.broadcast %256 : vector<1x1x48xf32> to vector<8x16x48xf32>
    %258 = arith.mulf %253, %257 : vector<8x16x48xf32>
    %259 = arith.addf %251, %258 : vector<8x16x48xf32>
    %c0_124 = arith.constant 0 : index
    %c9_125 = arith.constant 9 : index
    %c2_126 = arith.constant 2 : index
    %c0_127 = arith.constant 0 : index
    %260 = vector.load %arg2[%c0_124, %c9_125, %c2_126, %c0_127] : memref<1x20x20x48xf32, #tpu.memory_space<vmem>>, vector<1x8x16x48xf32>
    %261 = vector.shape_cast %260 : vector<1x8x16x48xf32> to vector<8x16x48xf32>
    %262 = vector.extract_strided_slice %0 {offsets = [7, 0], sizes = [1, 48], strides = [1, 1]} : vector<25x48xf32> to vector<1x48xf32>
    %263 = vector.shape_cast %262 : vector<1x48xf32> to vector<48xf32>
    %264 = vector.shape_cast %263 : vector<48xf32> to vector<1x1x48xf32>
    %265 = vector.broadcast %264 : vector<1x1x48xf32> to vector<8x16x48xf32>
    %266 = arith.mulf %261, %265 : vector<8x16x48xf32>
    %267 = arith.addf %259, %266 : vector<8x16x48xf32>
    %c0_128 = arith.constant 0 : index
    %c9_129 = arith.constant 9 : index
    %c3_130 = arith.constant 3 : index
    %c0_131 = arith.constant 0 : index
    %268 = vector.load %arg2[%c0_128, %c9_129, %c3_130, %c0_131] : memref<1x20x20x48xf32, #tpu.memory_space<vmem>>, vector<1x8x16x48xf32>
    %269 = vector.shape_cast %268 : vector<1x8x16x48xf32> to vector<8x16x48xf32>
    %270 = vector.extract_strided_slice %0 {offsets = [8, 0], sizes = [1, 48], strides = [1, 1]} : vector<25x48xf32> to vector<1x48xf32>
    %271 = vector.shape_cast %270 : vector<1x48xf32> to vector<48xf32>
    %272 = vector.shape_cast %271 : vector<48xf32> to vector<1x1x48xf32>
    %273 = vector.broadcast %272 : vector<1x1x48xf32> to vector<8x16x48xf32>
    %274 = arith.mulf %269, %273 : vector<8x16x48xf32>
    %275 = arith.addf %267, %274 : vector<8x16x48xf32>
    %c0_132 = arith.constant 0 : index
    %c9_133 = arith.constant 9 : index
    %c4_134 = arith.constant 4 : index
    %c0_135 = arith.constant 0 : index
    %276 = vector.load %arg2[%c0_132, %c9_133, %c4_134, %c0_135] : memref<1x20x20x48xf32, #tpu.memory_space<vmem>>, vector<1x8x16x48xf32>
    %277 = vector.shape_cast %276 : vector<1x8x16x48xf32> to vector<8x16x48xf32>
    %278 = vector.extract_strided_slice %0 {offsets = [9, 0], sizes = [1, 48], strides = [1, 1]} : vector<25x48xf32> to vector<1x48xf32>
    %279 = vector.shape_cast %278 : vector<1x48xf32> to vector<48xf32>
    %280 = vector.shape_cast %279 : vector<48xf32> to vector<1x1x48xf32>
    %281 = vector.broadcast %280 : vector<1x1x48xf32> to vector<8x16x48xf32>
    %282 = arith.mulf %277, %281 : vector<8x16x48xf32>
    %283 = arith.addf %275, %282 : vector<8x16x48xf32>
    %c0_136 = arith.constant 0 : index
    %c10 = arith.constant 10 : index
    %c0_137 = arith.constant 0 : index
    %c0_138 = arith.constant 0 : index
    %284 = vector.load %arg2[%c0_136, %c10, %c0_137, %c0_138] : memref<1x20x20x48xf32, #tpu.memory_space<vmem>>, vector<1x8x16x48xf32>
    %285 = vector.shape_cast %284 : vector<1x8x16x48xf32> to vector<8x16x48xf32>
    %286 = vector.extract_strided_slice %0 {offsets = [10, 0], sizes = [1, 48], strides = [1, 1]} : vector<25x48xf32> to vector<1x48xf32>
    %287 = vector.shape_cast %286 : vector<1x48xf32> to vector<48xf32>
    %288 = vector.shape_cast %287 : vector<48xf32> to vector<1x1x48xf32>
    %289 = vector.broadcast %288 : vector<1x1x48xf32> to vector<8x16x48xf32>
    %290 = arith.mulf %285, %289 : vector<8x16x48xf32>
    %291 = arith.addf %283, %290 : vector<8x16x48xf32>
    %c0_139 = arith.constant 0 : index
    %c10_140 = arith.constant 10 : index
    %c1_141 = arith.constant 1 : index
    %c0_142 = arith.constant 0 : index
    %292 = vector.load %arg2[%c0_139, %c10_140, %c1_141, %c0_142] : memref<1x20x20x48xf32, #tpu.memory_space<vmem>>, vector<1x8x16x48xf32>
    %293 = vector.shape_cast %292 : vector<1x8x16x48xf32> to vector<8x16x48xf32>
    %294 = vector.extract_strided_slice %0 {offsets = [11, 0], sizes = [1, 48], strides = [1, 1]} : vector<25x48xf32> to vector<1x48xf32>
    %295 = vector.shape_cast %294 : vector<1x48xf32> to vector<48xf32>
    %296 = vector.shape_cast %295 : vector<48xf32> to vector<1x1x48xf32>
    %297 = vector.broadcast %296 : vector<1x1x48xf32> to vector<8x16x48xf32>
    %298 = arith.mulf %293, %297 : vector<8x16x48xf32>
    %299 = arith.addf %291, %298 : vector<8x16x48xf32>
    %c0_143 = arith.constant 0 : index
    %c10_144 = arith.constant 10 : index
    %c2_145 = arith.constant 2 : index
    %c0_146 = arith.constant 0 : index
    %300 = vector.load %arg2[%c0_143, %c10_144, %c2_145, %c0_146] : memref<1x20x20x48xf32, #tpu.memory_space<vmem>>, vector<1x8x16x48xf32>
    %301 = vector.shape_cast %300 : vector<1x8x16x48xf32> to vector<8x16x48xf32>
    %302 = vector.extract_strided_slice %0 {offsets = [12, 0], sizes = [1, 48], strides = [1, 1]} : vector<25x48xf32> to vector<1x48xf32>
    %303 = vector.shape_cast %302 : vector<1x48xf32> to vector<48xf32>
    %304 = vector.shape_cast %303 : vector<48xf32> to vector<1x1x48xf32>
    %305 = vector.broadcast %304 : vector<1x1x48xf32> to vector<8x16x48xf32>
    %306 = arith.mulf %301, %305 : vector<8x16x48xf32>
    %307 = arith.addf %299, %306 : vector<8x16x48xf32>
    %c0_147 = arith.constant 0 : index
    %c10_148 = arith.constant 10 : index
    %c3_149 = arith.constant 3 : index
    %c0_150 = arith.constant 0 : index
    %308 = vector.load %arg2[%c0_147, %c10_148, %c3_149, %c0_150] : memref<1x20x20x48xf32, #tpu.memory_space<vmem>>, vector<1x8x16x48xf32>
    %309 = vector.shape_cast %308 : vector<1x8x16x48xf32> to vector<8x16x48xf32>
    %310 = vector.extract_strided_slice %0 {offsets = [13, 0], sizes = [1, 48], strides = [1, 1]} : vector<25x48xf32> to vector<1x48xf32>
    %311 = vector.shape_cast %310 : vector<1x48xf32> to vector<48xf32>
    %312 = vector.shape_cast %311 : vector<48xf32> to vector<1x1x48xf32>
    %313 = vector.broadcast %312 : vector<1x1x48xf32> to vector<8x16x48xf32>
    %314 = arith.mulf %309, %313 : vector<8x16x48xf32>
    %315 = arith.addf %307, %314 : vector<8x16x48xf32>
    %c0_151 = arith.constant 0 : index
    %c10_152 = arith.constant 10 : index
    %c4_153 = arith.constant 4 : index
    %c0_154 = arith.constant 0 : index
    %316 = vector.load %arg2[%c0_151, %c10_152, %c4_153, %c0_154] : memref<1x20x20x48xf32, #tpu.memory_space<vmem>>, vector<1x8x16x48xf32>
    %317 = vector.shape_cast %316 : vector<1x8x16x48xf32> to vector<8x16x48xf32>
    %318 = vector.extract_strided_slice %0 {offsets = [14, 0], sizes = [1, 48], strides = [1, 1]} : vector<25x48xf32> to vector<1x48xf32>
    %319 = vector.shape_cast %318 : vector<1x48xf32> to vector<48xf32>
    %320 = vector.shape_cast %319 : vector<48xf32> to vector<1x1x48xf32>
    %321 = vector.broadcast %320 : vector<1x1x48xf32> to vector<8x16x48xf32>
    %322 = arith.mulf %317, %321 : vector<8x16x48xf32>
    %323 = arith.addf %315, %322 : vector<8x16x48xf32>
    %c0_155 = arith.constant 0 : index
    %c11 = arith.constant 11 : index
    %c0_156 = arith.constant 0 : index
    %c0_157 = arith.constant 0 : index
    %324 = vector.load %arg2[%c0_155, %c11, %c0_156, %c0_157] : memref<1x20x20x48xf32, #tpu.memory_space<vmem>>, vector<1x8x16x48xf32>
    %325 = vector.shape_cast %324 : vector<1x8x16x48xf32> to vector<8x16x48xf32>
    %326 = vector.extract_strided_slice %0 {offsets = [15, 0], sizes = [1, 48], strides = [1, 1]} : vector<25x48xf32> to vector<1x48xf32>
    %327 = vector.shape_cast %326 : vector<1x48xf32> to vector<48xf32>
    %328 = vector.shape_cast %327 : vector<48xf32> to vector<1x1x48xf32>
    %329 = vector.broadcast %328 : vector<1x1x48xf32> to vector<8x16x48xf32>
    %330 = arith.mulf %325, %329 : vector<8x16x48xf32>
    %331 = arith.addf %323, %330 : vector<8x16x48xf32>
    %c0_158 = arith.constant 0 : index
    %c11_159 = arith.constant 11 : index
    %c1_160 = arith.constant 1 : index
    %c0_161 = arith.constant 0 : index
    %332 = vector.load %arg2[%c0_158, %c11_159, %c1_160, %c0_161] : memref<1x20x20x48xf32, #tpu.memory_space<vmem>>, vector<1x8x16x48xf32>
    %333 = vector.shape_cast %332 : vector<1x8x16x48xf32> to vector<8x16x48xf32>
    %334 = vector.extract_strided_slice %0 {offsets = [16, 0], sizes = [1, 48], strides = [1, 1]} : vector<25x48xf32> to vector<1x48xf32>
    %335 = vector.shape_cast %334 : vector<1x48xf32> to vector<48xf32>
    %336 = vector.shape_cast %335 : vector<48xf32> to vector<1x1x48xf32>
    %337 = vector.broadcast %336 : vector<1x1x48xf32> to vector<8x16x48xf32>
    %338 = arith.mulf %333, %337 : vector<8x16x48xf32>
    %339 = arith.addf %331, %338 : vector<8x16x48xf32>
    %c0_162 = arith.constant 0 : index
    %c11_163 = arith.constant 11 : index
    %c2_164 = arith.constant 2 : index
    %c0_165 = arith.constant 0 : index
    %340 = vector.load %arg2[%c0_162, %c11_163, %c2_164, %c0_165] : memref<1x20x20x48xf32, #tpu.memory_space<vmem>>, vector<1x8x16x48xf32>
    %341 = vector.shape_cast %340 : vector<1x8x16x48xf32> to vector<8x16x48xf32>
    %342 = vector.extract_strided_slice %0 {offsets = [17, 0], sizes = [1, 48], strides = [1, 1]} : vector<25x48xf32> to vector<1x48xf32>
    %343 = vector.shape_cast %342 : vector<1x48xf32> to vector<48xf32>
    %344 = vector.shape_cast %343 : vector<48xf32> to vector<1x1x48xf32>
    %345 = vector.broadcast %344 : vector<1x1x48xf32> to vector<8x16x48xf32>
    %346 = arith.mulf %341, %345 : vector<8x16x48xf32>
    %347 = arith.addf %339, %346 : vector<8x16x48xf32>
    %c0_166 = arith.constant 0 : index
    %c11_167 = arith.constant 11 : index
    %c3_168 = arith.constant 3 : index
    %c0_169 = arith.constant 0 : index
    %348 = vector.load %arg2[%c0_166, %c11_167, %c3_168, %c0_169] : memref<1x20x20x48xf32, #tpu.memory_space<vmem>>, vector<1x8x16x48xf32>
    %349 = vector.shape_cast %348 : vector<1x8x16x48xf32> to vector<8x16x48xf32>
    %350 = vector.extract_strided_slice %0 {offsets = [18, 0], sizes = [1, 48], strides = [1, 1]} : vector<25x48xf32> to vector<1x48xf32>
    %351 = vector.shape_cast %350 : vector<1x48xf32> to vector<48xf32>
    %352 = vector.shape_cast %351 : vector<48xf32> to vector<1x1x48xf32>
    %353 = vector.broadcast %352 : vector<1x1x48xf32> to vector<8x16x48xf32>
    %354 = arith.mulf %349, %353 : vector<8x16x48xf32>
    %355 = arith.addf %347, %354 : vector<8x16x48xf32>
    %c0_170 = arith.constant 0 : index
    %c11_171 = arith.constant 11 : index
    %c4_172 = arith.constant 4 : index
    %c0_173 = arith.constant 0 : index
    %356 = vector.load %arg2[%c0_170, %c11_171, %c4_172, %c0_173] : memref<1x20x20x48xf32, #tpu.memory_space<vmem>>, vector<1x8x16x48xf32>
    %357 = vector.shape_cast %356 : vector<1x8x16x48xf32> to vector<8x16x48xf32>
    %358 = vector.extract_strided_slice %0 {offsets = [19, 0], sizes = [1, 48], strides = [1, 1]} : vector<25x48xf32> to vector<1x48xf32>
    %359 = vector.shape_cast %358 : vector<1x48xf32> to vector<48xf32>
    %360 = vector.shape_cast %359 : vector<48xf32> to vector<1x1x48xf32>
    %361 = vector.broadcast %360 : vector<1x1x48xf32> to vector<8x16x48xf32>
    %362 = arith.mulf %357, %361 : vector<8x16x48xf32>
    %363 = arith.addf %355, %362 : vector<8x16x48xf32>
    %c0_174 = arith.constant 0 : index
    %c12 = arith.constant 12 : index
    %c0_175 = arith.constant 0 : index
    %c0_176 = arith.constant 0 : index
    %364 = vector.load %arg2[%c0_174, %c12, %c0_175, %c0_176] : memref<1x20x20x48xf32, #tpu.memory_space<vmem>>, vector<1x8x16x48xf32>
    %365 = vector.shape_cast %364 : vector<1x8x16x48xf32> to vector<8x16x48xf32>
    %366 = vector.extract_strided_slice %0 {offsets = [20, 0], sizes = [1, 48], strides = [1, 1]} : vector<25x48xf32> to vector<1x48xf32>
    %367 = vector.shape_cast %366 : vector<1x48xf32> to vector<48xf32>
    %368 = vector.shape_cast %367 : vector<48xf32> to vector<1x1x48xf32>
    %369 = vector.broadcast %368 : vector<1x1x48xf32> to vector<8x16x48xf32>
    %370 = arith.mulf %365, %369 : vector<8x16x48xf32>
    %371 = arith.addf %363, %370 : vector<8x16x48xf32>
    %c0_177 = arith.constant 0 : index
    %c12_178 = arith.constant 12 : index
    %c1_179 = arith.constant 1 : index
    %c0_180 = arith.constant 0 : index
    %372 = vector.load %arg2[%c0_177, %c12_178, %c1_179, %c0_180] : memref<1x20x20x48xf32, #tpu.memory_space<vmem>>, vector<1x8x16x48xf32>
    %373 = vector.shape_cast %372 : vector<1x8x16x48xf32> to vector<8x16x48xf32>
    %374 = vector.extract_strided_slice %0 {offsets = [21, 0], sizes = [1, 48], strides = [1, 1]} : vector<25x48xf32> to vector<1x48xf32>
    %375 = vector.shape_cast %374 : vector<1x48xf32> to vector<48xf32>
    %376 = vector.shape_cast %375 : vector<48xf32> to vector<1x1x48xf32>
    %377 = vector.broadcast %376 : vector<1x1x48xf32> to vector<8x16x48xf32>
    %378 = arith.mulf %373, %377 : vector<8x16x48xf32>
    %379 = arith.addf %371, %378 : vector<8x16x48xf32>
    %c0_181 = arith.constant 0 : index
    %c12_182 = arith.constant 12 : index
    %c2_183 = arith.constant 2 : index
    %c0_184 = arith.constant 0 : index
    %380 = vector.load %arg2[%c0_181, %c12_182, %c2_183, %c0_184] : memref<1x20x20x48xf32, #tpu.memory_space<vmem>>, vector<1x8x16x48xf32>
    %381 = vector.shape_cast %380 : vector<1x8x16x48xf32> to vector<8x16x48xf32>
    %382 = vector.extract_strided_slice %0 {offsets = [22, 0], sizes = [1, 48], strides = [1, 1]} : vector<25x48xf32> to vector<1x48xf32>
    %383 = vector.shape_cast %382 : vector<1x48xf32> to vector<48xf32>
    %384 = vector.shape_cast %383 : vector<48xf32> to vector<1x1x48xf32>
    %385 = vector.broadcast %384 : vector<1x1x48xf32> to vector<8x16x48xf32>
    %386 = arith.mulf %381, %385 : vector<8x16x48xf32>
    %387 = arith.addf %379, %386 : vector<8x16x48xf32>
    %c0_185 = arith.constant 0 : index
    %c12_186 = arith.constant 12 : index
    %c3_187 = arith.constant 3 : index
    %c0_188 = arith.constant 0 : index
    %388 = vector.load %arg2[%c0_185, %c12_186, %c3_187, %c0_188] : memref<1x20x20x48xf32, #tpu.memory_space<vmem>>, vector<1x8x16x48xf32>
    %389 = vector.shape_cast %388 : vector<1x8x16x48xf32> to vector<8x16x48xf32>
    %390 = vector.extract_strided_slice %0 {offsets = [23, 0], sizes = [1, 48], strides = [1, 1]} : vector<25x48xf32> to vector<1x48xf32>
    %391 = vector.shape_cast %390 : vector<1x48xf32> to vector<48xf32>
    %392 = vector.shape_cast %391 : vector<48xf32> to vector<1x1x48xf32>
    %393 = vector.broadcast %392 : vector<1x1x48xf32> to vector<8x16x48xf32>
    %394 = arith.mulf %389, %393 : vector<8x16x48xf32>
    %395 = arith.addf %387, %394 : vector<8x16x48xf32>
    %c0_189 = arith.constant 0 : index
    %c12_190 = arith.constant 12 : index
    %c4_191 = arith.constant 4 : index
    %c0_192 = arith.constant 0 : index
    %396 = vector.load %arg2[%c0_189, %c12_190, %c4_191, %c0_192] : memref<1x20x20x48xf32, #tpu.memory_space<vmem>>, vector<1x8x16x48xf32>
    %397 = vector.shape_cast %396 : vector<1x8x16x48xf32> to vector<8x16x48xf32>
    %398 = vector.extract_strided_slice %0 {offsets = [24, 0], sizes = [1, 48], strides = [1, 1]} : vector<25x48xf32> to vector<1x48xf32>
    %399 = vector.shape_cast %398 : vector<1x48xf32> to vector<48xf32>
    %400 = vector.shape_cast %399 : vector<48xf32> to vector<1x1x48xf32>
    %401 = vector.broadcast %400 : vector<1x1x48xf32> to vector<8x16x48xf32>
    %402 = arith.mulf %397, %401 : vector<8x16x48xf32>
    %403 = arith.addf %395, %402 : vector<8x16x48xf32>
    %404 = vector.shape_cast %403 : vector<8x16x48xf32> to vector<128x48xf32>
    %405 = tpu.concatenate %202, %404 in 0 : vector<128x48xf32>, vector<128x48xf32> -> vector<256x48xf32>
    %c0_193 = arith.constant 0 : index
    %c0_194 = arith.constant 0 : index
    %406 = vector.load %arg4[%c0_193, %c0_194] : memref<48x304xf32, #tpu.memory_space<vmem>>, vector<48x304xf32>
    %cst_195 = arith.constant dense<0.000000e+00> : vector<256x304xf32>
    %407 = tpu.matmul %405, %406, %cst_195 {dimension_numbers = #tpu.dot_dimension_numbers<[1], [0], [0], [1], [0, 0, 1, 1], [], []>} : vector<256x48xf32>, vector<48x304xf32>, vector<256x304xf32> -> vector<256x304xf32>
    %408 = vector.extract_strided_slice %407 {offsets = [0, 0], sizes = [256, 256], strides = [1, 1]} : vector<256x304xf32> to vector<256x256xf32>
    %cst_196 = arith.constant 0.000000e+00 : f32
    %409 = vector.broadcast %cst_196 : f32 to vector<256x256xf32>
    %410 = arith.maximumf %408, %409 : vector<256x256xf32>
    %411 = arith.mulf %410, %410 : vector<256x256xf32>
    %412 = vector.extract_strided_slice %407 {offsets = [0, 256], sizes = [256, 48], strides = [1, 1]} : vector<256x304xf32> to vector<256x48xf32>
    %413 = arith.negf %412 : vector<256x48xf32>
    %414 = math.exp %413 : vector<256x48xf32>
    %cst_197 = arith.constant 1.000000e+00 : f32
    %415 = vector.broadcast %cst_197 : f32 to vector<256x48xf32>
    %416 = arith.addf %415, %414 : vector<256x48xf32>
    %417 = arith.divf %415, %416 : vector<256x48xf32>
    %c0_198 = arith.constant 0 : index
    %c0_199 = arith.constant 0 : index
    %418 = vector.load %arg5[%c0_198, %c0_199] : memref<256x48xf32, #tpu.memory_space<vmem>>, vector<256x48xf32>
    %cst_200 = arith.constant dense<0.000000e+00> : vector<256x48xf32>
    %419 = tpu.matmul %411, %418, %cst_200 {dimension_numbers = #tpu.dot_dimension_numbers<[1], [0], [0], [1], [0, 0, 1, 1], [], []>} : vector<256x256xf32>, vector<256x48xf32>, vector<256x48xf32> -> vector<256x48xf32>
    %420 = arith.mulf %417, %419 : vector<256x48xf32>
    %cst_201 = arith.constant 0.000000e+00 : f32
    %421 = vector.broadcast %cst_201 : f32 to vector<256x80xf32>
    %422 = tpu.concatenate %420, %421 in 1 : vector<256x48xf32>, vector<256x80xf32> -> vector<256x128xf32>
    %c0_202 = arith.constant 0 : index
    %c0_203 = arith.constant 0 : index
    %c0_204 = arith.constant 0 : index
    %423 = vector.load %arg6[%c0_202, %c0_203, %c0_204] : memref<1x256x128xf32, #tpu.memory_space<vmem>>, vector<1x256x128xf32>
    %424 = vector.shape_cast %423 : vector<1x256x128xf32> to vector<256x128xf32>
    %425 = vector.shape_cast %422 : vector<256x128xf32> to vector<1x256x128xf32>
    tpu.vector_store %arg6[%c0_202, %c0_203, %c0_204], %425 {strides = array<i32>} : memref<1x256x128xf32, #tpu.memory_space<vmem>>, vector<1x256x128xf32>,
    return
  }
  func.func @transform_0(%arg0: i32, %arg1: i32) -> (i32, i32, i32, i32) {
    %c1_i32 = arith.constant 1 : i32
    %0 = arith.muli %arg0, %c1_i32 : i32
    %1 = arith.addi %0, %arg1 : i32
    %c0_i32 = arith.constant 0 : i32
    %c0_i32_0 = arith.constant 0 : i32
    %c0_i32_1 = arith.constant 0 : i32
    %c0_i32_2 = arith.constant 0 : i32
    return %1, %c0_i32, %c0_i32_0, %c0_i32_1 : i32, i32, i32, i32
  }
  func.func @transform_1(%arg0: i32, %arg1: i32) -> (i32, i32) {
    %c0_i32 = arith.constant 0 : i32
    %c0_i32_0 = arith.constant 0 : i32
    %c0_i32_1 = arith.constant 0 : i32
    return %c0_i32, %c0_i32_0 : i32, i32
  }
  func.func @transform_2(%arg0: i32, %arg1: i32) -> (i32, i32) {
    %c0_i32 = arith.constant 0 : i32
    %c0_i32_0 = arith.constant 0 : i32
    %c0_i32_1 = arith.constant 0 : i32
    return %c0_i32, %c0_i32_0 : i32, i32
  }
  func.func @transform_3(%arg0: i32, %arg1: i32) -> (i32, i32) {
    %c0_i32 = arith.constant 0 : i32
    %c0_i32_0 = arith.constant 0 : i32
    %c0_i32_1 = arith.constant 0 : i32
    return %c0_i32, %c0_i32_0 : i32, i32
  }
  func.func @transform_4(%arg0: i32, %arg1: i32) -> (i32, i32, i32) {
    %c0_i32 = arith.constant 0 : i32
    %c0_i32_0 = arith.constant 0 : i32
    return %arg0, %arg1, %c0_i32 : i32, i32, i32
  }
}

</mosaic_0001>

<bundles_post_ra>
// kernel: tpu_custom_call.1
= control target key start
LH: loop header
LB: loop body
LE: loop exit
PB: predicated region body
PF: predicated region fallthrough
CT: control target
= control target key end

     0   :  { %9 = vsyncpa [#allocation3], 0  ;;  %s8570_s0 = inlined_call_operand.vmem [shape: f32[2,20,20,48], index: 0, kind: input, shape index: {}]   ;;  %s8571_s1 = inlined_call_operand.vmem [shape: f32[25,48], index: 1, kind: input, shape index: {}]   ;;  %s8572_s2 = inlined_call_operand.vmem [shape: f32[48,304], index: 2, kind: input, shape index: {}]   ;;  %s8573_s3 = inlined_call_operand.vmem [shape: f32[256,48], index: 3, kind: input, shape index: {}]   ;;  %s8574_s4 = inlined_call_operand.hbm [shape: f32[2,256,128], index: 4, kind: output, shape index: {}]  }
   0x1   :  { %11 = vsyncpa [#allocation3 + $0x1], 0  ;;  %s5379_s15 = smov 0   ;;  %s5381_s16 = smov 0  }
   0x2   :  { %s5383_s17 = smov 0   ;;  %s5385_s18 = smov 0  }
   0x3   :  { %s5387_s19 = smov 0   ;;  %s5389_s20 = smov 0  }
   0x4 LB: > { %s4090_s21 = sadd.s32 4294967295, %s5348_s20   ;;  %s4091_s22 = sadd.s32 4294967294, %s5348_s20   ;;  %s5348_s20 = sphi %s5389_s20, %s17_s20   ;;  %s5344_s19 = sphi %s5387_s19, %s9412_s19   ;;  %s5340_s18 = sphi %s5385_s18, %s9411_s18   ;;  %s5336_s17 = sphi %s5383_s17, %s9410_s17   ;;  %s5332_s16 = sphi %s5381_s16, %s9409_s16   ;;  %s5328_s15 = sphi %s5379_s15, %s9408_s15  }
   0x5   : > { %s29_s23 = sadd.s32 1, %s5344_s19  ;;  %s129_s24 = sadd.s32 1, %s5336_s17 }
   0x6   : > { %p31_p0 = scmp.ge.s32.totalorder %s29_s23, 2  ;;  %p139_p1 = scmp.ne.s32.totalorder %s5336_s17, %s5332_s16 }
   0x7   : > { %p140_p2 = scmp.eq.s32.totalorder %s4090_s21, 1  ;;  %p145_p3 = scmp.ne.s32.totalorder %s5332_s16, %s5328_s15 }
   0x8   : > { %s9414_s23 = smov (%p31_p0, %s29_s23), 0  ;;  %p146_p5 = scmp.eq.s32.totalorder %s4091_s22, 1 }
   0x9   : > { %p5419_p4 = por %p140_p2, %p139_p1  ;;  %s124_s26 = ssub.s32 %s5344_s19, %s9414_s23 }
   0xa   : > { %p4094_p6 = scmp.ge.s32.totalorder %s5348_s20, 1  ;;  %p127_p7 = scmp.eq.s32.totalorder %s124_s26, 0 }
   0xb   : > { %p5426_p8 = por %p146_p5, %p145_p3  ;;  %p183_p9 = scmp.lt.s32.totalorder %s5348_s20, 3 }
   0xc   : > { %s5432_s28 = scalar_select %p127_p7, %s5336_s17, %s129_s24  }
   0xd   : > { %p184_p10 = pnand %p4094_p6, %p183_p9 }
   0xf   : > { %187 = sbr.rel (%p184_p10) target bundleno = 879 (0x36f), region = 36 }
  0x14   : > { %v2747_v0 = vld [vmem:[%s8572_s2 + $0x80] sm:$0xff]  ;;  %v2746_v1 = vld [vmem:[%s8572_s2 + $0x78] sm:$0xff]  ;;  %v2744_v2 = vld [vmem:[%s8572_s2 + $0x68] sm:$0xff]  ;;  %p211_p11 = scmp.lt.s32.totalorder %s5340_s18, 1  ;;  %v238_v3 = vlaneseq  ;;  %v8575_v5 = vmov 0.0   ;;  %vm2749_vm0 = vcmask 392192  }
  0x15   : > { %2866 = vmatprep.subr.mxu0 %v2747_v0  ;;  %v2743_v4 = vld [vmem:[%s8572_s2 + $0x60] sm:$0xff]  ;;  %2910 = vmatprep.mubr.f32.mxu0 %v8575_v5  ;;  %v2741_v6 = vld [vmem:[%s8572_s2 + $0x50] sm:$0xff]  ;;  %v2740_v8 = vld [vmem:[%s8572_s2 + $0x48] sm:$0xff]  ;;  %s5351_s8 = smov [#allocation2]  }
  0x16   : > { %2867 = vmatpush1.msra.mxu0 %v2746_v1  ;;  %s212_s13 = scalar_select %p211_p11, %s5340_s18, 1  ;;  %v239_v7 = vshrl.u32 %v238_v3, 7  ;;  %v2738_v9 = vld [vmem:[%s8572_s2 + $0x38] sm:$0xff]  ;;  %v218_v10 = vld [vmem:[%s8571_s1] sm:$0xff]  ;;  %v2737_v13 = vld [vmem:[%s8572_s2 + $0x30] sm:$0xff] }
  0x17   : > { %2868 = vmatprep.subr.mxu0 %v2744_v2  ;;  %v2735_v17 = vld [vmem:[%s8572_s2 + $0x20] sm:$0xff]  ;;  %v2734_v18 = vld [vmem:[%s8572_s2 + $0x18] sm:$0xff]  ;;  %v2732_v27 = vld [vmem:[%s8572_s2 + $0x8] sm:$0xff]  ;;  %s5276_s9 = sshll.u32 %s5351_s8, 4  ;;  %s5277_s9 = int_to_ptr.vmem [resolvable:$false] %s5276_s9 }
  0x18   : > { %2869 = vmatpush1.msra.mxu0 %v2743_v4  ;;  %s5082_s26 = smul.u32 480, %s212_s13  ;;  %v5461_v11 = vsub.s32 0, %v239_v7  ;;  %v5463_v12 = vsub.s32 1, %v239_v7  ;;  %v5468_v14 = vsub.s32 2, %v239_v7  ;;  %v5470_v15 = vsub.s32 3, %v239_v7  ;;  %v2731_v33 = vld [vmem:[%s8572_s2] sm:$0xff] }
  0x19   : > { %2870 = vmatprep.subr.mxu0 %v2741_v6  ;;  %v5472_v16 = vsub.s32 4, %v239_v7  ;;  %v5491_v21 = vsub.s32 5, %v239_v7  ;;  %v5511_v32 = vsub.s32 6, %v239_v7  ;;  %v5522_v39 = vsub.s32 7, %v239_v7  ;;  %v219_v44 = vld [vmem:[%s8571_s1 + $0x8] sm:$0xff]  ;;  %v220_v2 = vld [vmem:[%s8571_s1 + $0x10] sm:$0xff] }
  0x1a   : > { %2871 = vmatpush1.msra.mxu0 %v2740_v8  ;;  %s5483_s13 = scalar_lea.vmem %s8570_s0, %s5082_s26  ;;  %v5486_v19 = vrot.slane %v218_v10, %v5461_v11  ;;  %v5489_v20 = vrot.slane %v218_v10, %v5463_v12  ;;  %v5497_v25 = vrot.slane %v218_v10, %v5468_v14  ;;  %v5500_v26 = vrot.slane %v218_v10, %v5470_v15  ;;  %s4919_s26 = sshll.u32 %s5340_s18, 12 }
  0x1b   : > { %2872 = vmatprep.subr.mxu0 %v2738_v9  ;;  %v222_v22 = vld [vmem:[%s5483_s13] sm:$0xff]  ;;  %v5509_v31 = vrot.slane %v218_v10, %v5472_v16  ;;  %v5520_v38 = vrot.slane %v218_v10, %v5491_v21  ;;  %v5525_v40 = vld [vmem:[%s5483_s13 + $0x18] sm:$0xff]  ;;  %v5529_v43 = vrot.slane %v218_v10, %v5511_v32  ;;  %v5538_v47 = vrot.slane %v218_v10, %v5522_v39  ;;  %v223_v52 = vld [vmem:[%s5483_s13 + $0x8] sm:$0xff]  ;;  %s8517_s6 = scalar_lea.hbm %s8574_s4, %s4919_s26  ;;  %s5278_s10 = scalar_lea.vmem %s5277_s9, 8192 }
  0x1c   : > { %v274_v23 = vld [vmem:[%s5483_s13 + $0x1] sm:$0xff]  ;;  %8914 = vst [vmem:[#allocation5_spill] sm:$0xff] %v5497_v25  ;;  %8915 = vst [vmem:[#allocation6_spill] sm:$0xff] %v5500_v26  ;;  %2873 = vmatpush1.msra.mxu0 %v2737_v13  ;;  %v242_v28 = vmul.f32 %v5486_v19, %v222_v22  ;;  %v5541_v48 = vld [vmem:[%s5483_s13 + $0x19] sm:$0xff]  ;;  %v5546_v51 = vrot.slane %v219_v44, %v5461_v11  ;;  %v5554_v55 = vrot.slane %v219_v44, %v5463_v12 }
  0x1d   : > { %v326_v24 = vld [vmem:[%s5483_s13 + $0x2] sm:$0xff]  ;;  %v294_v29 = vmul.f32 %v5489_v20, %v274_v23  ;;  %2874 = vmatprep.subr.mxu0 %v2735_v17  ;;  %v503_v46 = vmul.f32 %v5525_v40, %v5520_v38  ;;  %8916 = vst [vmem:[#allocation7_spill] sm:$0xff] %v5538_v47  ;;  %v555_v50 = vmul.f32 %v5541_v48, %v5529_v43  ;;  %v5551_v54 = vld [vmem:[%s5483_s13 + $0x1a] sm:$0xff]  ;;  %v327_v56 = vld [vmem:[%s5483_s13 + $0xa] sm:$0xff] }
  0x1e   : > { %v378_v30 = vld [vmem:[%s5483_s13 + $0x3] sm:$0xff]  ;;  %v346_v34 = vmul.f32 %v5497_v25, %v326_v24  ;;  %2875 = vmatpush1.msra.mxu0 %v2734_v18  ;;  %8917 = vst [vmem:[#allocation8_spill] sm:$0xff] %v5546_v51  ;;  %8918 = vst [vmem:[#allocation9_spill] sm:$0xff] %v5554_v55  ;;  %v607_v58 = vmul.f32 %v5551_v54, %v5538_v47  ;;  %v5560_v59 = vrot.slane %v219_v44, %v5468_v14  ;;  %v379_v61 = vld [vmem:[%s5483_s13 + $0xb] sm:$0xff] }
  0x1f   : > { %v430_v35 = vld [vmem:[%s5483_s13 + $0x4] sm:$0xff]  ;;  %v310_v36 = vadd.f32 %v294_v29, %v242_v28  ;;  %v398_v37 = vmul.f32 %v5500_v26, %v378_v30  ;;  %2876 = vmatprep.subr.mxu0 %v2732_v27  ;;  %v5563_v60 = vrot.slane %v219_v44, %v5470_v15  ;;  %v5567_v62 = vld [vmem:[%s5483_s13 + $0x1b] sm:$0xff]  ;;  %v5570_v63 = vrot.slane %v219_v44, %v5472_v16  ;;  %v431_v9 = vld [vmem:[%s5483_s13 + $0xc] sm:$0xff] }
  0x20   : > { %2877 = vmatpush1.msra.mxu0 %v2731_v33  ;;  %v450_v42 = vmul.f32 %v5509_v31, %v430_v35  ;;  %v275_v53 = vld [vmem:[%s5483_s13 + $0x9] sm:$0xff]  ;;  %v243_v0 = vmul.f32 %v5486_v19, %v223_v52  ;;  %v659_v4 = vmul.f32 %v5567_v62, %v5546_v51  ;;  %v5580_v6 = vld [vmem:[%s5483_s13 + $0x1c] sm:$0xff]  ;;  %v5583_v7 = vrot.slane %v219_v44, %v5491_v21  ;;  %v5593_v17 = vld [vmem:[%s5483_s13 + $0x31] sm:$0xff] }
  0x21   : > { %v362_v41 = vadd.f32 %v346_v34, %v310_v36  ;;  %3680 = vmatprep.subr.mxu0 %v8575_v5  ;;  %v295_v1 = vmul.f32 %v5489_v20, %v275_v53  ;;  %v347_v8 = vmul.f32 %v5497_v25, %v327_v56  ;;  %v711_v10 = vmul.f32 %v5580_v6, %v5554_v55  ;;  %v5590_v13 = vld [vmem:[%s5483_s13 + $0x30] sm:$0xff]  ;;  %v5607_v30 = vld [vmem:[%s5483_s13 + $0x20] sm:$0xff] }
  0x22   : > { %8919 = vst [vmem:[#allocation10_spill] sm:$0xff] %v5583_v7  ;;  %8920 = vst [vmem:[#allocation11_spill] sm:$0xff] %v5590_v13  ;;  %v5596_v18 = vrot.slane %v219_v44, %v5511_v32  ;;  %v399_v23 = vmul.f32 %v5500_v26, %v379_v61  ;;  %v764_v27 = vmul.f32 %v5590_v13, %v5560_v59  ;;  %v5610_v33 = vld [vmem:[%s5483_s13 + $0x32] sm:$0xff]  ;;  %v4146_v5 = vld [vmem:[%s5483_s13 + $0x23] sm:$0xff] }
  0x23   : > { %v414_v45 = vadd.f32 %v398_v37, %v362_v41  ;;  %v311_v22 = vadd.f32 %v295_v1, %v243_v0  ;;  %v816_v28 = vmul.f32 %v5593_v17, %v5563_v60  ;;  %v5604_v29 = vrot.slane %v219_v44, %v5522_v39  ;;  %8922 = vst [vmem:[#allocation13_spill] sm:$0xff] %v5610_v33  ;;  %v5613_v34 = vld [vmem:[%s5483_s13 + $0x33] sm:$0xff]  ;;  %v5661_v0 = vld [vmem:[%s5483_s13 + $0x21] sm:$0xff] }
  0x24   : > { %v5616_v35 = vrot.slane %v220_v2, %v5461_v11  ;;  %v5619_v36 = vrot.slane %v220_v2, %v5463_v12  ;;  %v451_v41 = vmul.f32 %v5509_v31, %v431_v9  ;;  %v868_v44 = vmul.f32 %v5610_v33, %v5570_v63 }
  0x25   : > { %v466_v49 = vadd.f32 %v450_v42, %v414_v45  ;;  %8921 = vst [vmem:[#allocation12_spill] sm:$0xff] %v5604_v29  ;;  %v363_v37 = vadd.f32 %v347_v8, %v311_v22  ;;  %v920_v45 = vmul.f32 %v5613_v34, %v5583_v7  ;;  %v5630_v11 = vrot.slane %v220_v2, %v5468_v14  ;;  %v5649_v14 = vld [vmem:[%s5483_s13 + $0x49] sm:$0xff] }
  0x26   : > { %8923 = vst [vmem:[#allocation14_spill] sm:$0xff] %v5616_v35  ;;  %v504_v53 = vmul.f32 %v5607_v30, %v5520_v38  ;;  %8925 = vst [vmem:[#allocation16_spill] sm:$0xff] %v5649_v14  ;;  %v5655_v61 = vrot.slane %v220_v2, %v5472_v16  ;;  %v5665_v1 = vmul.f32 %v5649_v14, %v5616_v35 }
  0x27   : > { %v519_v57 = vadd.f32 %v503_v46, %v466_v49  ;;  %v5627_v46 = vld [vmem:[%s5483_s13 + $0x34] sm:$0xff]  ;;  %v5637_v49 = vld [vmem:[%s5483_s13 + $0x48] sm:$0xff]  ;;  %v415_v52 = vadd.f32 %v399_v23, %v363_v37  ;;  %v556_v16 = vmul.f32 %v5661_v0, %v5529_v43  ;;  %v244_v22 = vmul.f32 %v5525_v40, %v5486_v19 }
  0x28   : > { %v5634_v12 = vmul.f32 %v5627_v46, %v5596_v18  ;;  %8924 = vst [vmem:[#allocation15_spill] sm:$0xff] %v5637_v49  ;;  %v296_v23 = vmul.f32 %v5541_v48, %v5489_v20  ;;  %v5691_v37 = vrot.slane %v220_v2, %v5511_v32  ;;  %v5700_v48 = vld [vmem:[%s5483_s13 + $0x60] sm:$0xff] }
  0x29   : > { %v571_v3 = vadd.f32 %v555_v50, %v519_v57  ;;  %v5640_v50 = vrot.slane %v220_v2, %v5470_v15  ;;  %v5646_v57 = vmul.f32 %v5637_v49, %v5604_v29  ;;  %v5658_v15 = vrot.slane %v220_v2, %v5491_v21  ;;  %8932 = vst [vmem:[#allocation23_spill] sm:$0xff] %v5700_v48 }
  0x2a   : > { %v467_v8 = vadd.f32 %v451_v41, %v415_v52  ;;  %8930 = vst [vmem:[#allocation21_spill] sm:$0xff] %v5691_v37  ;;  %v5697_v52 = vld [vmem:[%s5483_s13 + $0x4c] sm:$0xff]  ;;  %v312_v32 = vadd.f32 %v296_v23, %v244_v22  ;;  %v5725_v22 = vld [vmem:[%s5483_s13 + $0x62] sm:$0xff] }
  0x2b   : > { %v623_v24 = vadd.f32 %v607_v58, %v571_v3  ;;  %v5652_v58 = vld [vmem:[%s5483_s13 + $0x4a] sm:$0xff]  ;;  %8927 = vst [vmem:[#allocation18_spill] sm:$0xff] %v5658_v15  ;;  %8931 = vst [vmem:[#allocation22_spill] sm:$0xff] %v5697_v52 }
  0x2c   : > { %8926 = vst [vmem:[#allocation17_spill] sm:$0xff] %v5652_v58  ;;  %v5669_v3 = vmul.f32 %v5652_v58, %v5619_v36  ;;  %8936 = vst [vmem:[#allocation27_spill] sm:$0xff] %v5725_v22  ;;  %v5728_v23 = vld [vmem:[%s5483_s13 + $0x64] sm:$0xff] }
  0x2d   : > { %v675_v42 = vadd.f32 %v659_v4, %v623_v24  ;;  %v5672_v4 = vld [vmem:[%s5483_s13 + $0x4b] sm:$0xff]  ;;  %v5688_v24 = vld [vmem:[%s8571_s1 + $0x18] ss:$0 sm:$0xff]  ;;  %8937 = vst [vmem:[#allocation28_spill] sm:$0xff] %v5728_v23 }
  0x2e   : > { %8928 = vst [vmem:[#allocation19_spill] sm:$0xff] %v5672_v4  ;;  %v5678_v9 = vmul.f32 %v5672_v4, %v5630_v11  ;;  %8929 = vst [vmem:[#allocation20_spill] sm:$0xff] %v5688_v24  ;;  %v452_v4 = vmul.f32 %v5580_v6, %v5509_v31 }
  0x2f   : > { %v727_v56 = vadd.f32 %v711_v10, %v675_v42  ;;  %v4130_v10 = vld [vmem:[%s5483_s13 + $0x22] sm:$0xff]  ;;  %v348_v42 = vmul.f32 %v5551_v54, %v5497_v25  ;;  %v5714_v54 = vmul.f32 %v5700_v48, %v5655_v61 }
  0x30   : > { %v608_v41 = vmul.f32 %v4130_v10, %v5538_v47 }
  0x31   : > { %v780_v21 = vadd.f32 %v764_v27, %v727_v56  ;;  %v520_v27 = vadd.f32 %v504_v53, %v467_v8  ;;  %v5703_v56 = vrot.slane %v220_v2, %v5522_v39  ;;  %v400_v53 = vmul.f32 %v5567_v62, %v5500_v26 }
  0x32   : > { %v5710_v8 = vmul.f32 %v5697_v52, %v5640_v50  ;;  %v660_v39 = vmul.f32 %v4146_v5, %v5546_v51  ;;  %v4162_v52 = vld [vmem:[%s5483_s13 + $0x24] sm:$0xff]  ;;  %v364_v48 = vadd.f32 %v348_v42, %v312_v32  ;;  %v5750_v32 = vld [vmem:[%s5483_s13 + $0x38] sm:$0xff] }
  0x33   : > { %v832_v40 = vadd.f32 %v816_v28, %v780_v21  ;;  %8933 = vst [vmem:[#allocation24_spill] sm:$0xff] %v5703_v56  ;;  %v5717_v28 = vld [vmem:[%s5483_s13 + $0x61] sm:$0xff]  ;;  %v572_v21 = vadd.f32 %v556_v16, %v520_v27  ;;  %v5735_v16 = vmul.f32 %v5725_v22, %v5691_v37  ;;  %v5742_v27 = vmul.f32 %v5688_v24, %v5728_v23  ;;  %v5753_v22 = vld [vmem:[%s5483_s13 + $0x39] sm:$0xff] }
  0x34   : > { %8934 = vst [vmem:[#allocation25_spill] sm:$0xff] %v5717_v28  ;;  %v5722_v62 = vmul.f32 %v5717_v28, %v5658_v15  ;;  %v712_v28 = vmul.f32 %v4162_v52, %v5554_v55  ;;  %8942 = vst [vmem:[#allocation33_spill] sm:$0xff] %v5750_v32  ;;  %v505_v23 = vmul.f32 %v5590_v13, %v5520_v38 }
  0x35   : > { %v884_v2 = vadd.f32 %v868_v44, %v832_v40  ;;  %8938 = vst [vmem:[#allocation29_spill] sm:$0xff] %v5735_v16  ;;  %v5738_v44 = vld [vmem:[%s5483_s13 + $0x63] sm:$0xff]  ;;  %8940 = vst [vmem:[#allocation31_spill] sm:$0xff] %v5742_v27  ;;  %v624_v40 = vadd.f32 %v608_v41, %v572_v21  ;;  %v5756_v16 = vld [vmem:[%s5483_s13 + $0x3a] sm:$0xff]  ;;  %v765_v21 = vmul.f32 %v5750_v32, %v5560_v59 }
  0x36   : > { %8935 = vst [vmem:[#allocation26_spill] sm:$0xff] %v5722_v62  ;;  %8939 = vst [vmem:[#allocation30_spill] sm:$0xff] %v5738_v44  ;;  %v5747_v6 = vmul.f32 %v5738_v44, %v5703_v56  ;;  %v416_v62 = vadd.f32 %v400_v53, %v364_v48  ;;  %v5767_v44 = vld [vmem:[%s5483_s13 + $0x3b] sm:$0xff] }
  0x37   : > { %v936_v42 = vadd.f32 %v920_v45, %v884_v2  ;;  %8943 = vst [vmem:[#allocation34_spill] sm:$0xff] %v5753_v22  ;;  %8944 = vst [vmem:[#allocation35_spill] sm:$0xff] %v5756_v16  ;;  %v676_v41 = vadd.f32 %v660_v39, %v624_v40  ;;  %v817_v45 = vmul.f32 %v5753_v22, %v5563_v60  ;;  %v5773_v53 = vld [vmem:[%s5483_s13 + $0x3c] sm:$0xff]  ;;  %v5776_v39 = vld [vmem:[%s5483_s13 + $0x50] sm:$0xff] }
  0x38   : > { %8941 = vst [vmem:[#allocation32_spill] sm:$0xff] %v5747_v6  ;;  %v869_v2 = vmul.f32 %v5756_v16, %v5570_v63  ;;  %8945 = vst [vmem:[#allocation36_spill] sm:$0xff] %v5767_v44  ;;  %v921_v48 = vmul.f32 %v5767_v44, %v5583_v7  ;;  %v468_v40 = vadd.f32 %v452_v4, %v416_v62  ;;  %v5788_v7 = vld [vmem:[%s5483_s13 + $0x51] sm:$0xff] }
  0x39   : > { %v988_v27 = vadd.f32 %v5634_v12, %v936_v42  ;;  %8946 = vst [vmem:[#allocation37_spill] sm:$0xff] %v5773_v53  ;;  %8947 = vst [vmem:[#allocation38_spill] sm:$0xff] %v5776_v39  ;;  %v557_v6 = vmul.f32 %v5593_v17, %v5529_v43  ;;  %v728_v13 = vadd.f32 %v712_v28, %v676_v41 }
  0x3a   : > { %v973_v16 = vmul.f32 %v5773_v53, %v5596_v18  ;;  %v1026_v12 = vmul.f32 %v5776_v39, %v5604_v29  ;;  %v609_v42 = vmul.f32 %v5610_v33, %v5538_v47  ;;  %8948 = vst [vmem:[#allocation39_spill] sm:$0xff] %v5788_v7  ;;  %v521_v4 = vadd.f32 %v505_v23, %v468_v40  ;;  %v5801_v23 = vld [vmem:[%s5483_s13 + $0x52] sm:$0xff] }
  0x3b   : > { %v1041_v44 = vadd.f32 %v5646_v57, %v988_v27  ;;  %v245_v62 = vmul.f32 %v5607_v30, %v5486_v19  ;;  %v297_v28 = vmul.f32 %v5661_v0, %v5489_v20  ;;  %v781_v41 = vadd.f32 %v765_v21, %v728_v13  ;;  %v5804_v40 = vld [vmem:[%s5483_s13 + $0x53] sm:$0xff] }
  0x3c   : > { %v1078_v39 = vmul.f32 %v5788_v7, %v5616_v35  ;;  %v661_v53 = vmul.f32 %v5613_v34, %v5546_v51  ;;  %v349_v57 = vmul.f32 %v4130_v10, %v5497_v25  ;;  %8949 = vst [vmem:[#allocation40_spill] sm:$0xff] %v5804_v40  ;;  %v573_v30 = vadd.f32 %v557_v6, %v521_v4  ;;  %v5818_v6 = vld [vmem:[%s5483_s13 + $0x68] sm:$0xff] }
  0x3d   : > { %v1093_v27 = vadd.f32 %v5665_v1, %v1041_v44  ;;  %v313_v33 = vadd.f32 %v297_v28, %v245_v62  ;;  %v401_v0 = vmul.f32 %v4146_v5, %v5500_v26  ;;  %v833_v13 = vadd.f32 %v817_v45, %v781_v41  ;;  %v5815_v44 = vld [vmem:[%s5483_s13 + $0x54] sm:$0xff]  ;;  %8951 = vst [vmem:[#allocation42_spill] sm:$0xff] %v5818_v6 }
  0x3e   : > { %v1130_v21 = vmul.f32 %v5801_v23, %v5619_v36  ;;  %v1182_v7 = vmul.f32 %v5804_v40, %v5630_v11  ;;  %v713_v1 = vmul.f32 %v5627_v46, %v5554_v55  ;;  %8950 = vst [vmem:[#allocation41_spill] sm:$0xff] %v5815_v44  ;;  %v625_v4 = vadd.f32 %v609_v42, %v573_v30  ;;  %v5831_v40 = vld [vmem:[%s5483_s13 + $0x69] sm:$0xff] }
  0x3f   : > { %v1145_v10 = vadd.f32 %v5669_v3, %v1093_v27  ;;  %v365_v5 = vadd.f32 %v349_v57, %v313_v33  ;;  %v453_v45 = vmul.f32 %v4162_v52, %v5509_v31  ;;  %v885_v62 = vadd.f32 %v869_v2, %v833_v13  ;;  %8952 = vst [vmem:[#allocation43_spill] sm:$0xff] %v5831_v40  ;;  %v5834_v33 = vld [vmem:[%s5483_s13 + $0x6a] sm:$0xff] }
  0x40   : > { %v1234_v28 = vmul.f32 %v5815_v44, %v5640_v50  ;;  %v5825_v41 = vmul.f32 %v5818_v6, %v5655_v61  ;;  %v766_v3 = vmul.f32 %v5637_v49, %v5560_v59  ;;  %8953 = vst [vmem:[#allocation44_spill] sm:$0xff] %v5834_v33  ;;  %v677_v52 = vadd.f32 %v661_v53, %v625_v4  ;;  %v5850_v6 = vld [vmem:[%s5483_s13 + $0x6b] sm:$0xff] }
  0x41   : > { %v1197_v27 = vadd.f32 %v5678_v9, %v1145_v10  ;;  %v417_v42 = vadd.f32 %v401_v0, %v365_v5  ;;  %v506_v2 = vmul.f32 %v5750_v32, %v5520_v38  ;;  %v937_v57 = vadd.f32 %v921_v48, %v885_v62  ;;  %8955 = vst [vmem:[#allocation46_spill] sm:$0xff] %v5850_v6  ;;  %v5853_v53 = vld [vmem:[%s5483_s13 + $0x6c] sm:$0xff] }
  0x42   : > { %v5840_v30 = vmul.f32 %v5831_v40, %v5658_v15  ;;  %v5844_v13 = vmul.f32 %v5834_v33, %v5691_v37  ;;  %v818_v9 = vmul.f32 %v5649_v14, %v5563_v60  ;;  %8956 = vst [vmem:[#allocation47_spill] sm:$0xff] %v5853_v53  ;;  %v729_v0 = vadd.f32 %v713_v1, %v677_v52  ;;  %v8959_v52 = vld [vmem:[#allocation35_spill] sm:$0xff] }
  0x43   : > { %v1249_v10 = vadd.f32 %v5710_v8, %v1197_v27  ;;  %v469_v4 = vadd.f32 %v453_v45, %v417_v42  ;;  %v558_v48 = vmul.f32 %v5753_v22, %v5529_v43  ;;  %v989_v5 = vadd.f32 %v973_v16, %v937_v57  ;;  %v8960_v16 = vld [vmem:[#allocation10_spill] sm:$0xff]  ;;  %v8961_v57 = vld [vmem:[#allocation19_spill] sm:$0xff] }
  0x44   : > { %8954 = vst [vmem:[#allocation45_spill] sm:$0xff] %v5844_v13  ;;  %v5859_v62 = vmul.f32 %v5850_v6, %v5703_v56  ;;  %v5863_v33 = vmul.f32 %v5688_v24, %v5853_v53  ;;  %v870_v8 = vmul.f32 %v5652_v58, %v5570_v63  ;;  %v782_v1 = vadd.f32 %v766_v3, %v729_v0  ;;  %v8962_v6 = vld [vmem:[#allocation22_spill] sm:$0xff]  ;;  %v8963_v53 = vld [vmem:[#allocation36_spill] sm:$0xff] }
  0x45   : > { %v1302_v27 = vadd.f32 %v5714_v54, %v1249_v10  ;;  %v522_v45 = vadd.f32 %v506_v2, %v469_v4  ;;  %v610_v42 = vmul.f32 %v8959_v52, %v5538_v47  ;;  %v1042_v22 = vadd.f32 %v1026_v12, %v989_v5  ;;  %v8965_v54 = vld [vmem:[#allocation11_spill] sm:$0xff]  ;;  %v8967_v4 = vld [vmem:[#allocation13_spill] sm:$0xff] }
  0x46   : > { %8957 = vst [vmem:[#allocation48_spill] sm:$0xff] %v5859_v62  ;;  %8958 = vst [vmem:[#allocation49_spill] sm:$0xff] %v5863_v33  ;;  %v922_v32 = vmul.f32 %v8961_v57, %v8960_v16  ;;  %v974_v56 = vmul.f32 %v8962_v6, %v5596_v18  ;;  %v662_v24 = vmul.f32 %v8963_v53, %v5546_v51  ;;  %v8964_v33 = vld [vmem:[#allocation26_spill] sm:$0xff]  ;;  %v8966_v10 = vld [vmem:[#allocation23_spill] sm:$0xff] }
  0x47   : > { %v1354_v62 = vadd.f32 %v8964_v33, %v1302_v27  ;;  %v834_v40 = vadd.f32 %v818_v9, %v782_v1  ;;  %v574_v13 = vadd.f32 %v558_v48, %v522_v45  ;;  %v246_v3 = vmul.f32 %v8965_v54, %v5486_v19  ;;  %v8968_v52 = vld [vmem:[#allocation29_spill] sm:$0xff]  ;;  %v8971_v45 = vld [vmem:[#allocation32_spill] sm:$0xff] }
  0x48   : > { %v1094_v2 = vadd.f32 %v1078_v39, %v1042_v22  ;;  %v1027_v12 = vmul.f32 %v8966_v10, %v5604_v29  ;;  %v298_v0 = vmul.f32 %v5593_v17, %v5489_v20  ;;  %v350_v5 = vmul.f32 %v8967_v4, %v5497_v25  ;;  %v8969_v33 = vld [vmem:[#allocation37_spill] sm:$0xff]  ;;  %v8972_v4 = vld [vmem:[#allocation38_spill] sm:$0xff] }
  0x49   : > { %v1406_v6 = vadd.f32 %v8968_v52, %v1354_v62  ;;  %v886_v53 = vadd.f32 %v870_v8, %v834_v40  ;;  %v626_v57 = vadd.f32 %v610_v42, %v574_v13  ;;  %v714_v9 = vmul.f32 %v8969_v33, %v5554_v55  ;;  %v8970_v27 = vld [vmem:[#allocation25_spill] sm:$0xff]  ;;  %v8973_v13 = vld [vmem:[#allocation27_spill] sm:$0xff] }
  0x4a   : > { %v1146_v48 = vadd.f32 %v1130_v21, %v1094_v2  ;;  %v1079_v22 = vmul.f32 %v8970_v27, %v5616_v35  ;;  %v314_v39 = vadd.f32 %v298_v0, %v246_v3  ;;  %v402_v1 = vmul.f32 %v5613_v34, %v5500_v26  ;;  %v8974_v42 = vld [vmem:[#allocation31_spill] sm:$0xff] }
  0x4b   : > { %v1458_v17 = vadd.f32 %v8971_v45, %v1406_v6  ;;  %v938_v54 = vadd.f32 %v922_v32, %v886_v53  ;;  %v678_v10 = vadd.f32 %v662_v24, %v626_v57  ;;  %v767_v62 = vmul.f32 %v8972_v4, %v5560_v59  ;;  %v8975_v32 = vld [vmem:[#allocation39_spill] sm:$0xff]  ;;  %v8976_v53 = vld [vmem:[#allocation30_spill] sm:$0xff]  ;;  %v5919_v45 = vld [vmem:[%s5483_s13 + $0x79] sm:$0xff] }
  0x4c   : > { %v1198_v40 = vadd.f32 %v1182_v7, %v1146_v48  ;;  %v1131_v8 = vmul.f32 %v8973_v13, %v5619_v36  ;;  %v366_v21 = vadd.f32 %v350_v5, %v314_v39  ;;  %v454_v52 = vmul.f32 %v5627_v46, %v5509_v31  ;;  %v8977_v5 = vld [vmem:[#allocation28_spill] sm:$0xff]  ;;  %8980 = vst [vmem:[#allocation26_spill] sm:$0xff] %v5919_v45 }
  0x4d   : > { %v1510_v3 = vadd.f32 %v8974_v42, %v1458_v17  ;;  %v990_v2 = vadd.f32 %v974_v56, %v938_v54  ;;  %v730_v34 = vadd.f32 %v714_v9, %v678_v10  ;;  %v819_v24 = vmul.f32 %v8975_v32, %v5563_v60  ;;  %v5910_v48 = vld [vmem:[%s5483_s13 + $0x78] sm:$0xff] }
  0x4e   : > { %v1250_v6 = vadd.f32 %v1234_v28, %v1198_v40  ;;  %v1183_v57 = vmul.f32 %v8976_v53, %v5630_v11  ;;  %v418_v7 = vadd.f32 %v402_v1, %v366_v21  ;;  %v507_v0 = vmul.f32 %v5637_v49, %v5520_v38  ;;  %8978 = vst [vmem:[#allocation10_spill] sm:$0xff] %v5910_v48  ;;  %v5926_v40 = vld [vmem:[%s5483_s13 + $0x7a] sm:$0xff] }
  0x4f   : > { %4818 = vmatmul.mubr.msk.f32.vlgmr.msra.gmra.mxu0 %vm2749_vm0, %v1510_v3  ;;  %v1043_v46 = vadd.f32 %v1027_v12, %v990_v2  ;;  %v1235_v56 = vmul.f32 %v8977_v5, %v5640_v50  ;;  %v783_v10 = vadd.f32 %v767_v62, %v730_v34  ;;  %v871_v28 = vmul.f32 %v5801_v23, %v5570_v63  ;;  %v8982_v42 = vld [vmem:[#allocation40_spill] sm:$0xff] }
  0x50   : > { %v8979_v9 = vmov 0.0   ;;  %v1303_v39 = vadd.f32 %v5825_v41, %v1250_v6  ;;  %v1288_v1 = vmul.f32 %v5910_v48, %v5655_v61  ;;  %v470_v17 = vadd.f32 %v454_v52, %v418_v7  ;;  %8981 = vst [vmem:[#allocation11_spill] sm:$0xff] %v5926_v40  ;;  %4970 = vmatprep.mubr.msk.f32.mxu1 %vm2749_vm0, %v1510_v3  ;;  %v8985_v3 = vld [vmem:[#allocation43_spill] sm:$0xff] }
  0x51   : > { %2916 = vmatprep.mubr.f32.mxu0 %v8979_v9  ;;  %v559_v12 = vmul.f32 %v5649_v14, %v5529_v43  ;;  %v1095_v54 = vadd.f32 %v1079_v22, %v1043_v46  ;;  %v1340_v62 = vmul.f32 %v5919_v45, %v5658_v15  ;;  %v835_v21 = vadd.f32 %v819_v24, %v783_v10  ;;  %v8983_v24 = vld [vmem:[#allocation42_spill] sm:$0xff]  ;;  %v8984_v45 = vld [vmem:[#allocation45_spill] sm:$0xff] }
  0x52   : > { %v923_v2 = vmul.f32 %v8982_v42, %v8960_v16  ;;  %v1355_v41 = vadd.f32 %v5840_v30, %v1303_v39  ;;  %v1392_v52 = vmul.f32 %v5926_v40, %v5691_v37  ;;  %v523_v34 = vadd.f32 %v507_v0, %v470_v17  ;;  %v8986_v40 = vld [vmem:[#allocation19_spill] sm:$0xff] }
  0x53   : > { %v611_v22 = vmul.f32 %v5652_v58, %v5538_v47  ;;  %v1147_v6 = vadd.f32 %v1131_v8, %v1095_v54  ;;  %v887_v7 = vadd.f32 %v871_v28, %v835_v21  ;;  %v975_v46 = vmul.f32 %v5815_v44, %v5596_v18  ;;  %v8987_v8 = vld [vmem:[#allocation33_spill] sm:$0xff]  ;;  %v8988_v54 = vld [vmem:[#allocation34_spill] sm:$0xff]  ;;  %v8989_v58 = vld [vmem:[#allocation48_spill] sm:$0xff] }
  0x54   : > { %v1028_v10 = vmul.f32 %v8983_v24, %v5604_v29  ;;  %v1407_v14 = vadd.f32 %v8984_v45, %v1355_v41  ;;  %v1080_v30 = vmul.f32 %v8985_v3, %v5616_v35  ;;  %v575_v39 = vadd.f32 %v559_v12, %v523_v34  ;;  %v8990_v45 = vld [vmem:[#allocation22_spill] sm:$0xff]  ;;  %v8991_v12 = vld [vmem:[#allocation35_spill] sm:$0xff]  ;;  %v5964_v35 = vld [vmem:[%s5483_s13 + $0x7b] sm:$0xff] }
  0x55   : > { %v663_v0 = vmul.f32 %v8986_v40, %v5546_v51  ;;  %v1199_v17 = vadd.f32 %v1183_v57, %v1147_v6  ;;  %v939_v49 = vadd.f32 %v923_v2, %v887_v7  ;;  %v247_v28 = vmul.f32 %v8987_v8, %v5486_v19  ;;  %v8992_v2 = vld [vmem:[#allocation36_spill] sm:$0xff]  ;;  %v8993_v7 = vld [vmem:[#allocation49_spill] sm:$0xff] }
  0x56   : > { %v299_v21 = vmul.f32 %v8988_v54, %v5489_v20  ;;  %v1459_v24 = vadd.f32 %v8989_v58, %v1407_v14  ;;  %v627_v44 = vadd.f32 %v611_v22, %v575_v39  ;;  %v715_v41 = vmul.f32 %v8990_v45, %v5554_v55  ;;  %v8995_v54 = vld [vmem:[#allocation44_spill] sm:$0xff]  ;;  %v8996_v22 = vld [vmem:[#allocation23_spill] sm:$0xff] }
  0x57   : > { %v351_v34 = vmul.f32 %v8991_v12, %v5497_v25  ;;  %v1251_v3 = vadd.f32 %v1235_v56, %v1199_v17  ;;  %v991_v40 = vadd.f32 %v975_v46, %v939_v49  ;;  %v403_v6 = vmul.f32 %v8992_v2, %v5500_v26  ;;  %v9000_v12 = vld [vmem:[#allocation20_spill] sm:$0xff] }
  0x58   : > { %v315_v57 = vadd.f32 %v299_v21, %v247_v28  ;;  %v5957_v8 = vadd.f32 %v8993_v7, %v1459_v24  ;;  %v1132_v14 = vmul.f32 %v8995_v54, %v5619_v36  ;;  %v679_v58 = vadd.f32 %v663_v0, %v627_v44  ;;  %v8997_v24 = vld [vmem:[#allocation24_spill] sm:$0xff]  ;;  %v8998_v28 = vld [vmem:[#allocation46_spill] sm:$0xff] }
  0x59   : > { %v768_v39 = vmul.f32 %v8996_v22, %v5560_v59  ;;  %v1304_v45 = vadd.f32 %v1288_v1, %v1251_v3  ;;  %v1044_v56 = vadd.f32 %v1028_v10, %v991_v40  ;;  %v455_v46 = vmul.f32 %v8969_v33, %v5509_v31  ;;  %v5978_v10 = vld [vmem:[%s5483_s13 + $0x7c] sm:$0xff] }
  0x5a   : > { %8994 = vst [vmem:[#allocation13_spill] sm:$0xff] %v5957_v8  ;;  %v367_v49 = vadd.f32 %v351_v34, %v315_v57  ;;  %4819 = vmatmul.mubr.msk.f32.gmra.mxu0 %vm2749_vm0, %v5957_v8  ;;  %v1444_v17 = vmul.f32 %v5964_v35, %v8997_v24  ;;  %v1184_v44 = vmul.f32 %v8998_v28, %v5630_v11  ;;  %8999 = vst [vmem:[#allocation29_spill] sm:$0xff] %v5978_v10 }
  0x5b   : > { %v731_v0 = vadd.f32 %v715_v41, %v679_v58  ;;  %v820_v1 = vmul.f32 %v8970_v27, %v5563_v60  ;;  %2922 = vmatprep.mubr.f32.mxu0 %v8979_v9  ;;  %v1356_v40 = vadd.f32 %v1340_v62, %v1304_v45  ;;  %v1096_v33 = vadd.f32 %v1080_v30, %v1044_v56  ;;  %v9001_v41 = vld [vmem:[#allocation47_spill] sm:$0xff]  ;;  %v5989_v58 = vld [vmem:[%s5483_s13 + $0x80] sm:$0xff] }
  0x5c   : > { %v419_v3 = vadd.f32 %v403_v6, %v367_v49  ;;  %v508_v21 = vmul.f32 %v8972_v4, %v5520_v38  ;;  %v1496_v34 = vmul.f32 %v9000_v12, %v5978_v10  ;;  %v1236_v57 = vmul.f32 %v9001_v41, %v5640_v50  ;;  %9002 = vst [vmem:[#allocation37_spill] sm:$0xff] %v5989_v58  ;;  %v6001_v41 = vld [vmem:[%s5483_s13 + $0x82] sm:$0xff] }
  0x5d   : > { %v784_v2 = vadd.f32 %v768_v39, %v731_v0  ;;  %v872_v7 = vmul.f32 %v8973_v13, %v5570_v63  ;;  %v1408_v62 = vadd.f32 %v1392_v52, %v1356_v40  ;;  %v1148_v45 = vadd.f32 %v1132_v14, %v1096_v33  ;;  %v5998_v0 = vld [vmem:[%s5483_s13 + $0x81] sm:$0xff]  ;;  %9004 = vst [vmem:[#allocation32_spill] sm:$0xff] %v6001_v41 }
  0x5e   : > { %v471_v30 = vadd.f32 %v455_v46, %v419_v3  ;;  %v560_v6 = vmul.f32 %v8975_v32, %v5529_v43  ;;  %v1289_v56 = vmul.f32 %v5989_v58, %v5655_v61  ;;  %v924_v8 = vmul.f32 %v8976_v53, %v8960_v16  ;;  %9003 = vst [vmem:[#allocation25_spill] sm:$0xff] %v5998_v0 }
  0x5f   : > { %v836_v49 = vadd.f32 %v820_v1, %v784_v2  ;;  %v1460_v4 = vadd.f32 %v1444_v17, %v1408_v62  ;;  %v1200_v39 = vadd.f32 %v1184_v44, %v1148_v45  ;;  %v612_v14 = vmul.f32 %v5801_v23, %v5538_v47  ;;  %v9006_v45 = vld [vmem:[#allocation15_spill] sm:$0xff] }
  0x60   : > { %v524_v52 = vadd.f32 %v508_v21, %v471_v30  ;;  %v1341_v46 = vmul.f32 %v5998_v0, %v5658_v15  ;;  %v1393_v40 = vmul.f32 %v6001_v41, %v5691_v37  ;;  %v976_v17 = vmul.f32 %v8977_v5, %v5596_v18  ;;  %v9012_v41 = vld [vmem:[#allocation26_spill] sm:$0xff]  ;;  %v9013_v0 = vld [vmem:[#allocation19_spill] sm:$0xff] }
  0x61   : > { %v888_v1 = vadd.f32 %v872_v7, %v836_v49  ;;  %v6011_v44 = vadd.f32 %v1496_v34, %v1460_v4  ;;  %v1252_v33 = vadd.f32 %v1236_v57, %v1200_v39  ;;  %v664_v21 = vmul.f32 %v8982_v42, %v5546_v51  ;;  %v9007_v7 = vld [vmem:[#allocation16_spill] sm:$0xff]  ;;  %v9008_v57 = vld [vmem:[#allocation41_spill] sm:$0xff] }
  0x62   : > { %v576_v3 = vadd.f32 %v560_v6, %v524_v52  ;;  %v1029_v62 = vmul.f32 %v5910_v48, %v5604_v29  ;;  %v248_v30 = vmul.f32 %v9006_v45, %v5486_v19  ;;  %v300_v49 = vmul.f32 %v9007_v7, %v5489_v20  ;;  %v6029_v52 = vld [vmem:[%s5483_s13 + $0x83] sm:$0xff] }
  0x63   : > { %9005 = vst [vmem:[#allocation27_spill] sm:$0xff] %v6011_v44  ;;  %v940_v2 = vadd.f32 %v924_v8, %v888_v1  ;;  %4820 = vmatmul.mubr.msk.f32.gmra.mxu0 %vm2749_vm0, %v6011_v44  ;;  %v1305_v4 = vadd.f32 %v1289_v56, %v1252_v33  ;;  %v716_v6 = vmul.f32 %v9008_v57, %v5554_v55  ;;  %v9009_v8 = vld [vmem:[#allocation17_spill] sm:$0xff]  ;;  %9010 = vst [vmem:[#allocation31_spill] sm:$0xff] %v6029_v52  ;;  %v9011_v45 = vld [vmem:[#allocation14_spill] sm:$0xff] }
  0x64   : > { %v628_v34 = vadd.f32 %v612_v14, %v576_v3  ;;  %v352_v39 = vmul.f32 %v9009_v8, %v5497_v25  ;;  %2928 = vmatprep.mubr.f32.mxu0 %v8979_v9  ;;  %v1081_v7 = vmul.f32 %v9012_v41, %v9011_v45  ;;  %v316_v48 = vadd.f32 %v300_v49, %v248_v30  ;;  %v9014_v3 = vld [vmem:[#allocation42_spill] sm:$0xff] }
  0x65   : > { %v992_v1 = vadd.f32 %v976_v17, %v940_v2  ;;  %v404_v44 = vmul.f32 %v9013_v0, %v5500_v26  ;;  %v1357_v56 = vadd.f32 %v1341_v46, %v1305_v4  ;;  %v1445_v14 = vmul.f32 %v6029_v52, %v8997_v24  ;;  %v6040_v57 = vld [vmem:[%s5483_s13 + $0x84] sm:$0xff]  ;;  %v9016_v17 = vld [vmem:[#allocation11_spill] sm:$0xff] }
  0x66   : > { %v680_v33 = vadd.f32 %v664_v21, %v628_v34  ;;  %v769_v8 = vmul.f32 %v9014_v3, %v5560_v59  ;;  %9015 = vst [vmem:[#allocation39_spill] sm:$0xff] %v6040_v57  ;;  %v1133_v2 = vmul.f32 %v9016_v17, %v5619_v36  ;;  %v368_v41 = vadd.f32 %v352_v39, %v316_v48  ;;  %v9017_v30 = vld [vmem:[#allocation22_spill] sm:$0xff]  ;;  %v9018_v21 = vld [vmem:[#allocation43_spill] sm:$0xff] }
  0x67   : > { %v1045_v42 = vadd.f32 %v1029_v62, %v992_v1  ;;  %v456_v49 = vmul.f32 %v9017_v30, %v5509_v31  ;;  %v1409_v0 = vadd.f32 %v1393_v40, %v1357_v56  ;;  %v1497_v46 = vmul.f32 %v9000_v12, %v6040_v57 }
  0x68   : > { %v732_v4 = vadd.f32 %v716_v6, %v680_v33  ;;  %v821_v34 = vmul.f32 %v9018_v21, %v5563_v60  ;;  %v1185_v62 = vmul.f32 %v5964_v35, %v5630_v11  ;;  %v420_v1 = vadd.f32 %v404_v44, %v368_v41  ;;  %v6059_v33 = vld [vmem:[%s5483_s13 + $0x90] sm:$0xff] }
  0x69   : > { %v1097_v52 = vadd.f32 %v1081_v7, %v1045_v42  ;;  %v509_v48 = vmul.f32 %v8996_v22, %v5520_v38  ;;  %v1461_v39 = vadd.f32 %v1445_v14, %v1409_v0  ;;  %v873_v40 = vmul.f32 %v8995_v54, %v5570_v63  ;;  %9019 = vst [vmem:[#allocation30_spill] sm:$0xff] %v6059_v33  ;;  %v6068_v44 = vld [vmem:[%s5483_s13 + $0x91] sm:$0xff] }
  0x6a   : > { %v785_v30 = vadd.f32 %v769_v8, %v732_v4  ;;  %v1237_v6 = vmul.f32 %v5978_v10, %v5640_v50  ;;  %v472_v42 = vadd.f32 %v456_v49, %v420_v1  ;;  %v561_v7 = vmul.f32 %v8970_v27, %v5529_v43  ;;  %9021 = vst [vmem:[#allocation45_spill] sm:$0xff] %v6068_v44  ;;  %v6075_v0 = vld [vmem:[%s5483_s13 + $0x92] sm:$0xff] }
  0x6b   : > { %v1149_v56 = vadd.f32 %v1133_v2, %v1097_v52  ;;  %v6063_v41 = vadd.f32 %v1497_v46, %v1461_v39  ;;  %v1290_v22 = vmul.f32 %v6059_v33, %v5655_v61  ;;  %v925_v52 = vmul.f32 %v8998_v28, %v8960_v16  ;;  %9022 = vst [vmem:[#allocation33_spill] sm:$0xff] %v6075_v0 }
  0x6c   : > { %v837_v14 = vadd.f32 %v821_v34, %v785_v30  ;;  %v1342_v2 = vmul.f32 %v6068_v44, %v5658_v15  ;;  %v525_v49 = vadd.f32 %v509_v48, %v472_v42  ;;  %v613_v27 = vmul.f32 %v8973_v13, %v5538_v47  ;;  %v9023_v34 = vld [vmem:[#allocation47_spill] sm:$0xff]  ;;  %v9024_v13 = vld [vmem:[#allocation38_spill] sm:$0xff] }
  0x6d   : > { %9020 = vst [vmem:[#allocation28_spill] sm:$0xff] %v6063_v41  ;;  %v1201_v8 = vadd.f32 %v1185_v62, %v1149_v56  ;;  %4821 = vmatmul.mubr.msk.f32.gmra.mxu0 %vm2749_vm0, %v6063_v41  ;;  %v1394_v46 = vmul.f32 %v6075_v0, %v5691_v37  ;;  %v977_v62 = vmul.f32 %v9023_v34, %v5596_v18 }
  0x6e   : > { %v889_v4 = vadd.f32 %v873_v40, %v837_v14  ;;  %v665_v1 = vmul.f32 %v8976_v53, %v5546_v51  ;;  %2934 = vmatprep.mubr.f32.mxu0 %v8979_v9  ;;  %v577_v39 = vadd.f32 %v561_v7, %v525_v49  ;;  %v249_v30 = vmul.f32 %v9024_v13, %v5486_v19  ;;  %v9026_v49 = vld [vmem:[#allocation40_spill] sm:$0xff] }
  0x6f   : > { %v1253_v48 = vadd.f32 %v1237_v6, %v1201_v8  ;;  %v301_v56 = vmul.f32 %v8975_v32, %v5489_v20  ;;  %v1030_v40 = vmul.f32 %v5989_v58, %v5604_v29  ;;  %v717_v14 = vmul.f32 %v8977_v5, %v5554_v55  ;;  %v6099_v6 = vld [vmem:[%s5483_s13 + $0x93] sm:$0xff]  ;;  %v9028_v5 = vld [vmem:[#allocation10_spill] sm:$0xff] }
  0x70   : > { %v941_v42 = vadd.f32 %v925_v52, %v889_v4  ;;  %v353_v53 = vmul.f32 %v5801_v23, %v5497_v25  ;;  %9025 = vst [vmem:[#allocation34_spill] sm:$0xff] %v6099_v6  ;;  %v629_v7 = vadd.f32 %v613_v27, %v577_v39  ;;  %v405_v13 = vmul.f32 %v9026_v49, %v5500_v26  ;;  %v9027_v4 = vld [vmem:[#allocation25_spill] sm:$0xff]  ;;  %v6110_v23 = vld [vmem:[%s5483_s13 + $0x94] sm:$0xff]  ;;  %v9031_v49 = vld [vmem:[#allocation26_spill] sm:$0xff] }
  0x71   : > { %v1306_v41 = vadd.f32 %v1290_v22, %v1253_v48  ;;  %v317_v8 = vadd.f32 %v301_v56, %v249_v30  ;;  %v1446_v32 = vmul.f32 %v6099_v6, %v8997_v24  ;;  %v1082_v0 = vmul.f32 %v9027_v4, %v9011_v45  ;;  %v9029_v48 = vld [vmem:[#allocation41_spill] sm:$0xff] }
  0x72   : > { %v993_v52 = vadd.f32 %v977_v62, %v941_v42  ;;  %v770_v58 = vmul.f32 %v9028_v5, %v5560_v59  ;;  %v681_v22 = vadd.f32 %v665_v1, %v629_v7  ;;  %v457_v39 = vmul.f32 %v9029_v48, %v5509_v31  ;;  %v9030_v62 = vld [vmem:[#allocation32_spill] sm:$0xff]  ;;  %v9032_v7 = vld [vmem:[#allocation31_spill] sm:$0xff] }
  0x73   : > { %v1358_v44 = vadd.f32 %v1342_v2, %v1306_v41  ;;  %v369_v27 = vadd.f32 %v353_v53, %v317_v8  ;;  %v1498_v30 = vmul.f32 %v9000_v12, %v6110_v23  ;;  %v1134_v42 = vmul.f32 %v9030_v62, %v5619_v36  ;;  %v6127_v48 = vld [vmem:[%s5483_s13 + $0x98] sm:$0xff] }
  0x74   : > { %v1046_v56 = vadd.f32 %v1030_v40, %v993_v52  ;;  %v822_v6 = vmul.f32 %v9031_v49, %v5563_v60  ;;  %v733_v41 = vadd.f32 %v717_v14, %v681_v22  ;;  %v510_v1 = vmul.f32 %v9014_v3, %v5520_v38  ;;  %9033 = vst [vmem:[#allocation48_spill] sm:$0xff] %v6127_v48 }
  0x75   : > { %v1410_v5 = vadd.f32 %v1394_v46, %v1358_v44  ;;  %v421_v2 = vadd.f32 %v405_v13, %v369_v27  ;;  %v1186_v8 = vmul.f32 %v9032_v7, %v5630_v11  ;;  %v874_v40 = vmul.f32 %v9016_v17, %v5570_v63 }
  0x76   : > { %v1098_v53 = vadd.f32 %v1082_v0, %v1046_v56  ;;  %v786_v44 = vadd.f32 %v770_v58, %v733_v41  ;;  %v562_v14 = vmul.f32 %v9018_v21, %v5529_v43  ;;  %v1238_v3 = vmul.f32 %v6040_v57, %v5640_v50  ;;  %v6142_v58 = vld [vmem:[%s5483_s13 + $0x99] sm:$0xff] }
  0x77   : > { %v1462_v52 = vadd.f32 %v1446_v32, %v1410_v5  ;;  %v473_v46 = vadd.f32 %v457_v39, %v421_v2  ;;  %v1291_v0 = vmul.f32 %v6127_v48, %v5655_v61  ;;  %v926_v22 = vmul.f32 %v5964_v35, %v8960_v16  ;;  %v230_v32 = vld [vmem:[%s5483_s13 + $0x60] sm:$0xff]  ;;  %9035 = vst [vmem:[#allocation36_spill] sm:$0xff] %v6142_v58 }
  0x78   : > { %v1150_v13 = vadd.f32 %v1134_v42, %v1098_v53  ;;  %v282_v5 = vld [vmem:[%s5483_s13 + $0x61] sm:$0xff]  ;;  %v838_v39 = vadd.f32 %v822_v6, %v786_v44  ;;  %v614_v21 = vmul.f32 %v8995_v54, %v5538_v47  ;;  %v1343_v2 = vmul.f32 %v6142_v58, %v5658_v15 }
  0x79   : > { %v6139_v27 = vadd.f32 %v1498_v30, %v1462_v52  ;;  %v526_v56 = vadd.f32 %v510_v1, %v473_v46  ;;  %v334_v42 = vld [vmem:[%s5483_s13 + $0x62] sm:$0xff]  ;;  %v978_v53 = vmul.f32 %v5978_v10, %v5596_v18  ;;  %v666_v30 = vmul.f32 %v8998_v28, %v5546_v51 }
  0x7a   : > { %v1202_v41 = vadd.f32 %v1186_v8, %v1150_v13  ;;  %v386_v52 = vld [vmem:[%s5483_s13 + $0x63] sm:$0xff]  ;;  %v890_v6 = vadd.f32 %v874_v40, %v838_v39  ;;  %v250_v54 = vmul.f32 %v5486_v19, %v230_v32  ;;  %v302_v8 = vmul.f32 %v5489_v20, %v282_v5 }
  0x7b   : > { %9034 = vst [vmem:[#allocation35_spill] sm:$0xff] %v6139_v27  ;;  %4822 = vmatmul.mubr.msk.f32.gmra.mxu0 %vm2749_vm0, %v6139_v27  ;;  %v578_v1 = vadd.f32 %v562_v14, %v526_v56  ;;  %v1031_v46 = vmul.f32 %v6059_v33, %v5604_v29  ;;  %v718_v28 = vmul.f32 %v9023_v34, %v5554_v55  ;;  %v438_v58 = vld [vmem:[%s5483_s13 + $0x64] sm:$0xff]  ;;  %v6166_v27 = vld [vmem:[%s5483_s13 + $0x9a] sm:$0xff] }
  0x7c   : > { %2940 = vmatprep.mubr.f32.mxu0 %v8979_v9  ;;  %v1254_v44 = vadd.f32 %v1238_v3, %v1202_v41  ;;  %v354_v13 = vmul.f32 %v5497_v25, %v334_v42  ;;  %v942_v40 = vadd.f32 %v926_v22, %v890_v6  ;;  %v318_v32 = vadd.f32 %v302_v8, %v250_v54  ;;  %v9036_v56 = vld [vmem:[#allocation45_spill] sm:$0xff] }
  0x7d   : > { %v630_v14 = vadd.f32 %v614_v21, %v578_v1  ;;  %v406_v5 = vmul.f32 %v5500_v26, %v386_v52  ;;  %v1395_v3 = vmul.f32 %v6166_v27, %v5691_v37  ;;  %v1083_v41 = vmul.f32 %v9036_v56, %v9011_v45  ;;  %v9037_v34 = vld [vmem:[#allocation37_spill] sm:$0xff] }
  0x7e   : > { %v1307_v39 = vadd.f32 %v1291_v0, %v1254_v44  ;;  %v771_v33 = vmul.f32 %v9037_v34, %v5560_v59  ;;  %v6176_v42 = vld [vmem:[%s5483_s13 + $0x9b] sm:$0xff]  ;;  %v994_v10 = vadd.f32 %v978_v53, %v942_v40  ;;  %v370_v22 = vadd.f32 %v354_v13, %v318_v32  ;;  %v9041_v40 = vld [vmem:[#allocation34_spill] sm:$0xff] }
  0x7f   : > { %v682_v55 = vadd.f32 %v666_v30, %v630_v14  ;;  %v458_v21 = vmul.f32 %v5509_v31, %v438_v58  ;;  %v1447_v0 = vmul.f32 %v6176_v42, %v8997_v24  ;;  %v9038_v52 = vld [vmem:[#allocation33_spill] sm:$0xff]  ;;  %v823_v54 = vmul.f32 %v9027_v4, %v5563_v60  ;;  %v9040_v30 = vld [vmem:[#allocation10_spill] sm:$0xff] }
  0x80   : > { %v1359_v6 = vadd.f32 %v1343_v2, %v1307_v39  ;;  %v1135_v1 = vmul.f32 %v9038_v52, %v5619_v36  ;;  %v6186_v8 = vld [vmem:[%s5483_s13 + $0x9c] sm:$0xff]  ;;  %v1047_v44 = vadd.f32 %v1031_v46, %v994_v10  ;;  %v422_v53 = vadd.f32 %v406_v5, %v370_v22 }
  0x81   : > { %9039 = vst [vmem:[#allocation49_spill] sm:$0xff] %v6186_v8  ;;  %v734_v34 = vadd.f32 %v718_v28, %v682_v55  ;;  %v511_v13 = vmul.f32 %v9040_v30, %v5520_v38  ;;  %v1499_v2 = vmul.f32 %v9000_v12, %v6186_v8  ;;  %v1187_v14 = vmul.f32 %v9041_v40, %v5630_v11  ;;  %v6197_v55 = vld [vmem:[%s5483_s13 + $0xa8] sm:$0xff] }
  0x82   : > { %v1411_v58 = vadd.f32 %v1395_v3, %v1359_v6  ;;  %v875_v32 = vmul.f32 %v9030_v62, %v5570_v63  ;;  %v1099_v39 = vadd.f32 %v1083_v41, %v1047_v44  ;;  %9042 = vst [vmem:[#allocation44_spill] sm:$0xff] %v6197_v55  ;;  %v474_v46 = vadd.f32 %v458_v21, %v422_v53  ;;  %v231_v41 = vld [vmem:[%s5483_s13 + $0x68] sm:$0xff] }
  0x83   : > { %v787_v10 = vadd.f32 %v771_v33, %v734_v34  ;;  %v563_v28 = vmul.f32 %v9031_v49, %v5529_v43  ;;  %v1239_v3 = vmul.f32 %v6110_v23, %v5640_v50  ;;  %v1292_v22 = vmul.f32 %v6197_v55, %v5655_v61  ;;  %v6209_v30 = vld [vmem:[%s5483_s13 + $0xa9] sm:$0xff] }
  0x84   : > { %v1463_v5 = vadd.f32 %v1447_v0, %v1411_v58  ;;  %v927_v6 = vmul.f32 %v9032_v7, %v8960_v16  ;;  %v1151_v44 = vadd.f32 %v1135_v1, %v1099_v39  ;;  %9043 = vst [vmem:[#allocation23_spill] sm:$0xff] %v6209_v30  ;;  %v527_v34 = vadd.f32 %v511_v13, %v474_v46  ;;  %v283_v21 = vld [vmem:[%s5483_s13 + $0x69] sm:$0xff] }
  0x85   : > { %v839_v33 = vadd.f32 %v823_v54, %v787_v10  ;;  %v615_v49 = vmul.f32 %v9016_v17, %v5538_v47  ;;  %v335_v0 = vld [vmem:[%s5483_s13 + $0x6a] sm:$0xff]  ;;  %v1344_v58 = vmul.f32 %v6209_v30, %v5658_v15  ;;  %v979_v55 = vmul.f32 %v6040_v57, %v5596_v18 }
  0x86   : > { %v6215_v53 = vadd.f32 %v1499_v2, %v1463_v5  ;;  %v667_v1 = vmul.f32 %v5964_v35, %v5546_v51  ;;  %v1203_v39 = vadd.f32 %v1187_v14, %v1151_v44  ;;  %v6224_v54 = vld [vmem:[%s5483_s13 + $0xaa] sm:$0xff]  ;;  %v579_v17 = vadd.f32 %v563_v28, %v527_v34  ;;  %v9047_v34 = vld [vmem:[#allocation29_spill] sm:$0xff] }
  0x87   : > { %9045 = vst [vmem:[#allocation20_spill] sm:$0xff] %v6224_v54  ;;  %v891_v13 = vadd.f32 %v875_v32, %v839_v33  ;;  %v251_v10 = vmul.f32 %v5486_v19, %v231_v41  ;;  %v387_v2 = vld [vmem:[%s5483_s13 + $0x6b] sm:$0xff]  ;;  %v1396_v46 = vmul.f32 %v6224_v54, %v5691_v37  ;;  %v1032_v5 = vmul.f32 %v6127_v48, %v5604_v29  ;;  %v9046_v33 = vld [vmem:[#allocation9_spill] sm:$0xff]  ;;  %v9048_v48 = vld [vmem:[#allocation36_spill] sm:$0xff] }
  0x88   : > { %9044 = vst [vmem:[#allocation46_spill] sm:$0xff] %v6215_v53  ;;  %4823 = vmatmul.mubr.msk.f32.gmra.mxu0 %vm2749_vm0, %v6215_v53  ;;  %v303_v35 = vmul.f32 %v5489_v20, %v283_v21  ;;  %v355_v14 = vmul.f32 %v5497_v25, %v335_v0  ;;  %v1255_v32 = vadd.f32 %v1239_v3, %v1203_v39  ;;  %v6238_v28 = vld [vmem:[%s5483_s13 + $0xab] sm:$0xff] }
  0x89   : > { %2946 = vmatprep.mubr.f32.mxu0 %v8979_v9  ;;  %v943_v41 = vadd.f32 %v927_v6, %v891_v13  ;;  %v631_v44 = vadd.f32 %v615_v49, %v579_v17  ;;  %v719_v53 = vmul.f32 %v9047_v34, %v9046_v33  ;;  %v439_v30 = vld [vmem:[%s5483_s13 + $0x6c] sm:$0xff]  ;;  %v1448_v54 = vmul.f32 %v6238_v28, %v8997_v24 }
  0x8a   : > { %v1084_v57 = vmul.f32 %v9048_v48, %v9011_v45  ;;  %v319_v21 = vadd.f32 %v303_v35, %v251_v10  ;;  %v407_v0 = vmul.f32 %v5500_v26, %v387_v2  ;;  %v1308_v29 = vadd.f32 %v1292_v22, %v1255_v32  ;;  %v6249_v9 = vld [vmem:[%s5483_s13 + $0xac] sm:$0xff] }
  0x8b   : > { %v995_v3 = vadd.f32 %v979_v55, %v943_v41  ;;  %v683_v39 = vadd.f32 %v667_v1, %v631_v44  ;;  %v9049_v6 = vld [vmem:[#allocation30_spill] sm:$0xff]  ;;  %v1500_v13 = vmul.f32 %v9000_v12, %v6249_v9  ;;  %v1136_v17 = vmul.f32 %v6166_v27, %v5619_v36  ;;  %v9050_v44 = vld [vmem:[#allocation37_spill] sm:$0xff] }
  0x8c   : > { %v772_v49 = vmul.f32 %v9049_v6, %v5560_v59  ;;  %v371_v34 = vadd.f32 %v355_v14, %v319_v21  ;;  %v459_v10 = vmul.f32 %v5509_v31, %v439_v30  ;;  %v1360_v2 = vadd.f32 %v1344_v58, %v1308_v29  ;;  %v6267_v30 = vld [vmem:[%s5483_s13 + $0xb0] sm:$0xff] }
  0x8d   : > { %v1048_v22 = vadd.f32 %v1032_v5, %v995_v3  ;;  %v735_v35 = vadd.f32 %v719_v53, %v683_v39  ;;  %v824_v55 = vmul.f32 %v9036_v56, %v5563_v60  ;;  %v1188_v1 = vmul.f32 %v6176_v42, %v5630_v11  ;;  %9051 = vst [vmem:[#allocation15_spill] sm:$0xff] %v6267_v30  ;;  %v6270_v53 = vld [vmem:[%s5483_s13 + $0xb1] sm:$0xff] }
  0x8e   : > { %v1240_v32 = vmul.f32 %v6186_v8, %v5640_v50  ;;  %v423_v41 = vadd.f32 %v407_v0, %v371_v34  ;;  %v512_v14 = vmul.f32 %v9050_v44, %v5520_v38  ;;  %v1412_v21 = vadd.f32 %v1396_v46, %v1360_v2  ;;  %9052 = vst [vmem:[#allocation16_spill] sm:$0xff] %v6270_v53  ;;  %v284_v44 = vld [vmem:[%s5483_s13 + $0x79] sm:$0xff] }
  0x8f   : > { %v1100_v29 = vadd.f32 %v1084_v57, %v1048_v22  ;;  %v788_v58 = vadd.f32 %v772_v49, %v735_v35  ;;  %v876_v5 = vmul.f32 %v9038_v52, %v5570_v63  ;;  %v1293_v3 = vmul.f32 %v6267_v30, %v5655_v61  ;;  %v232_v57 = vld [vmem:[%s5483_s13 + $0x78] sm:$0xff] }
  0x90   : > { %v1345_v0 = vmul.f32 %v6270_v53, %v5658_v15  ;;  %v475_v39 = vadd.f32 %v459_v10, %v423_v41  ;;  %v564_v46 = vmul.f32 %v9027_v4, %v5529_v43  ;;  %v1464_v34 = vadd.f32 %v1448_v54, %v1412_v21  ;;  %v6282_v22 = vld [vmem:[%s5483_s13 + $0xb2] sm:$0xff]  ;;  %v336_v30 = vld [vmem:[%s5483_s13 + $0x7a] sm:$0xff] }
  0x91   : > { %v1152_v2 = vadd.f32 %v1136_v17, %v1100_v29  ;;  %9053 = vst [vmem:[#allocation17_spill] sm:$0xff] %v6282_v22  ;;  %v840_v49 = vadd.f32 %v824_v55, %v788_v58  ;;  %v928_v35 = vmul.f32 %v9041_v40, %v8960_v16  ;;  %v1397_v53 = vmul.f32 %v6282_v22, %v5691_v37  ;;  %v388_v29 = vld [vmem:[%s5483_s13 + $0x7b] sm:$0xff]  ;;  %v6299_v58 = vld [vmem:[%s5483_s13 + $0xb3] sm:$0xff] }
  0x92   : > { %v980_v10 = vmul.f32 %v6110_v23, %v5596_v18  ;;  %v528_v4 = vadd.f32 %v512_v14, %v475_v39  ;;  %v616_v54 = vmul.f32 %v9030_v62, %v5538_v47  ;;  %v6294_v17 = vadd.f32 %v1500_v13, %v1464_v34  ;;  %9055 = vst [vmem:[#allocation19_spill] sm:$0xff] %v6299_v58 }
  0x93   : > { %v1204_v41 = vadd.f32 %v1188_v1, %v1152_v2  ;;  %v892_v55 = vadd.f32 %v876_v5, %v840_v49  ;;  %v252_v21 = vmul.f32 %v5486_v19, %v232_v57  ;;  %v668_v22 = vmul.f32 %v9032_v7, %v5546_v51  ;;  %v9056_v5 = vld [vmem:[#allocation12_spill] sm:$0xff] }
  0x94   : > { %9054 = vst [vmem:[#allocation14_spill] sm:$0xff] %v6294_v17  ;;  %v580_v40 = vadd.f32 %v564_v46, %v528_v4  ;;  %v304_v14 = vmul.f32 %v5489_v20, %v284_v44  ;;  %v356_v39 = vmul.f32 %v5497_v25, %v336_v30  ;;  %4824 = vmatmul.mubr.msk.f32.gmra.mxu0 %vm2749_vm0, %v6294_v17  ;;  %v9057_v57 = vld [vmem:[#allocation44_spill] sm:$0xff]  ;;  %v9058_v46 = vmov 0.0   ;;  %v9060_v44 = vld [vmem:[#allocation39_spill] sm:$0xff] }
  0x95   : > { %v1256_v62 = vadd.f32 %v1240_v32, %v1204_v41  ;;  %v1449_v13 = vmul.f32 %v6299_v58, %v8997_v24  ;;  %v944_v1 = vadd.f32 %v928_v35, %v892_v55  ;;  %v1033_v34 = vmul.f32 %v9057_v57, %v9056_v5  ;;  %v440_v2 = vld [vmem:[%s5483_s13 + $0x7c] sm:$0xff]  ;;  %2952 = vmatprep.mubr.f32.mxu0 %v9058_v46  ;;  %v6314_v49 = vld [vmem:[%s5483_s13 + $0xb4] sm:$0xff] }
  0x96   : > { %9059 = vst [vmem:[#allocation42_spill] sm:$0xff] %v6314_v49  ;;  %v632_v7 = vadd.f32 %v616_v54, %v580_v40  ;;  %v720_v30 = vmul.f32 %v9060_v44, %v9046_v33  ;;  %v320_v4 = vadd.f32 %v304_v14, %v252_v21  ;;  %v408_v32 = vmul.f32 %v5500_v26, %v388_v29  ;;  %v9061_v17 = vld [vmem:[#allocation23_spill] sm:$0xff]  ;;  %v9062_v24 = vld [vmem:[#allocation48_spill] sm:$0xff] }
  0x97   : > { %v1309_v41 = vadd.f32 %v1293_v3, %v1256_v62  ;;  %v1501_v35 = vmul.f32 %v9000_v12, %v6314_v49  ;;  %v996_v55 = vadd.f32 %v980_v10, %v944_v1  ;;  %v1085_v58 = vmul.f32 %v9061_v17, %v9011_v45  ;;  %v9063_v29 = vld [vmem:[#allocation20_spill] sm:$0xff]  ;;  %v6331_v10 = vld [vmem:[%s5483_s13 + $0xc0] sm:$0xff] }
  0x98   : > { %v684_v57 = vadd.f32 %v668_v22, %v632_v7  ;;  %v773_v46 = vmul.f32 %v9062_v24, %v5560_v59  ;;  %v372_v40 = vadd.f32 %v356_v39, %v320_v4  ;;  %v460_v54 = vmul.f32 %v5509_v31, %v440_v2  ;;  %9064 = vst [vmem:[#allocation11_spill] sm:$0xff] %v6331_v10  ;;  %v6342_v7 = vld [vmem:[%s5483_s13 + $0xc1] sm:$0xff] }
  0x99   : > { %v1361_v44 = vadd.f32 %v1345_v0, %v1309_v41  ;;  %v1049_v21 = vadd.f32 %v1033_v34, %v996_v55  ;;  %v1137_v3 = vmul.f32 %v9063_v29, %v5619_v36  ;;  %v1189_v12 = vmul.f32 %v6238_v28, %v5630_v11  ;;  %9065 = vst [vmem:[#allocation22_spill] sm:$0xff] %v6342_v7 }
  0x9a   : > { %v736_v14 = vadd.f32 %v720_v30, %v684_v57  ;;  %v825_v22 = vmul.f32 %v9048_v48, %v5563_v60  ;;  %v424_v62 = vadd.f32 %v408_v32, %v372_v40  ;;  %v513_v39 = vmul.f32 %v9049_v6, %v5520_v38  ;;  %v233_v6 = vld [vmem:[%s5483_s13 + $0x80] sm:$0xff] }
  0x9b   : > { %v1413_v0 = vadd.f32 %v1397_v53, %v1361_v44  ;;  %v1101_v1 = vadd.f32 %v1085_v58, %v1049_v21  ;;  %v1241_v34 = vmul.f32 %v6249_v9, %v5640_v50  ;;  %v1294_v2 = vmul.f32 %v6331_v10, %v5655_v61  ;;  %v285_v40 = vld [vmem:[%s5483_s13 + $0x81] sm:$0xff] }
  0x9c   : > { %v789_v57 = vadd.f32 %v773_v46, %v736_v14  ;;  %v877_v30 = vmul.f32 %v6166_v27, %v5570_v63  ;;  %v476_v4 = vadd.f32 %v460_v54, %v424_v62  ;;  %v565_v32 = vmul.f32 %v9036_v56, %v5529_v43  ;;  %v337_v46 = vld [vmem:[%s5483_s13 + $0x82] sm:$0xff] }
  0x9d   : > { %v1465_v53 = vadd.f32 %v1449_v13, %v1413_v0  ;;  %v1153_v58 = vadd.f32 %v1137_v3, %v1101_v1  ;;  %v1346_v41 = vmul.f32 %v6342_v7, %v5658_v15  ;;  %v929_v55 = vmul.f32 %v6176_v42, %v8960_v16  ;;  %v9067_v3 = vld [vmem:[#allocation34_spill] sm:$0xff] }
  0x9e   : > { %v841_v44 = vadd.f32 %v825_v22, %v789_v57  ;;  %v981_v54 = vmul.f32 %v6186_v8, %v5596_v18  ;;  %v529_v21 = vadd.f32 %v513_v39, %v476_v4  ;;  %v617_v56 = vmul.f32 %v9038_v52, %v5538_v47  ;;  %v389_v1 = vld [vmem:[%s5483_s13 + $0x83] sm:$0xff] }
  0x9f   : > { %v6359_v14 = vadd.f32 %v1501_v35, %v1465_v53  ;;  %v1205_v13 = vadd.f32 %v1189_v12, %v1153_v58  ;;  %v669_v62 = vmul.f32 %v9067_v3, %v5546_v51  ;;  %v253_v0 = vmul.f32 %v5486_v19, %v233_v6  ;;  %v6366_v7 = vld [vmem:[%s5483_s13 + $0xc2] sm:$0xff]  ;;  %v9069_v12 = vld [vmem:[#allocation15_spill] sm:$0xff] }
  0xa0   : > { %9068 = vst [vmem:[#allocation47_spill] sm:$0xff] %v6366_v7  ;;  %v893_v22 = vadd.f32 %v877_v30, %v841_v44  ;;  %v581_v57 = vadd.f32 %v565_v32, %v529_v21  ;;  %v305_v39 = vmul.f32 %v5489_v20, %v285_v40  ;;  %v357_v4 = vmul.f32 %v5497_v25, %v337_v46  ;;  %v441_v30 = vld [vmem:[%s5483_s13 + $0x84] sm:$0xff] }
  0xa1   : > { %9066 = vst [vmem:[#allocation43_spill] sm:$0xff] %v6359_v14  ;;  %4825 = vmatmul.mubr.msk.f32.gmra.mxu0 %vm2749_vm0, %v6359_v14  ;;  %v1257_v52 = vadd.f32 %v1241_v34, %v1205_v13  ;;  %v1398_v35 = vmul.f32 %v6366_v7, %v5691_v37  ;;  %v1034_v6 = vmul.f32 %v9069_v12, %v9056_v5  ;;  %v9070_v32 = vmov 0.0   ;;  %v6381_v58 = vld [vmem:[%s5483_s13 + $0xc3] sm:$0xff]  ;;  %v9072_v13 = vld [vmem:[#allocation24_spill] sm:$0xff] }
  0xa2   : > { %v721_v53 = vmul.f32 %v6110_v23, %v9046_v33  ;;  %2958 = vmatprep.mubr.f32.mxu0 %v9070_v32  ;;  %9071 = vst [vmem:[#allocation38_spill] sm:$0xff] %v6381_v58  ;;  %v945_v40 = vadd.f32 %v929_v55, %v893_v22  ;;  %v633_v46 = vadd.f32 %v617_v56, %v581_v57  ;;  %v9073_v14 = vld [vmem:[#allocation16_spill] sm:$0xff]  ;;  %v6391_v37 = vld [vmem:[%s5483_s13 + $0xc4] sm:$0xff] }
  0xa3   : > { %v321_v44 = vadd.f32 %v305_v39, %v253_v0  ;;  %v409_v21 = vmul.f32 %v5500_v26, %v389_v1  ;;  %v1310_v34 = vadd.f32 %v1294_v2, %v1257_v52  ;;  %v1450_v3 = vmul.f32 %v6381_v58, %v9072_v13  ;;  %v9074_v12 = vld [vmem:[#allocation44_spill] sm:$0xff]  ;;  %v9075_v1 = vld [vmem:[#allocation17_spill] sm:$0xff]  ;;  %v9076_v52 = vld [vmem:[#allocation19_spill] sm:$0xff] }
  0xa4   : > { %v1086_v7 = vmul.f32 %v9073_v14, %v9011_v45  ;;  %v774_v23 = vmul.f32 %v9074_v12, %v5560_v59  ;;  %v997_v32 = vadd.f32 %v981_v54, %v945_v40  ;;  %v685_v25 = vadd.f32 %v669_v62, %v633_v46  ;;  %v6397_v2 = vld [vmem:[%s8571_s1 + $0x18] ss:$0 sm:$0xff] }
  0xa5   : > { %v373_v8 = vadd.f32 %v357_v4, %v321_v44  ;;  %v461_v55 = vmul.f32 %v5509_v31, %v441_v30  ;;  %v1362_v56 = vadd.f32 %v1346_v41, %v1310_v34  ;;  %v1502_v0 = vmul.f32 %v6397_v2, %v6391_v37  ;;  %v6414_v34 = vld [vmem:[%s5483_s13 + $0xc8] sm:$0xff] }
  0xa6   : > { %v1138_v22 = vmul.f32 %v9075_v1, %v5619_v36  ;;  %v826_v54 = vmul.f32 %v9061_v17, %v5563_v60  ;;  %v1050_v62 = vadd.f32 %v1034_v6, %v997_v32  ;;  %v737_v57 = vadd.f32 %v721_v53, %v685_v25  ;;  %9077 = vst [vmem:[#allocation40_spill] sm:$0xff] %v6414_v34  ;;  %v6417_v25 = vld [vmem:[%s5483_s13 + $0xc9] sm:$0xff] }
  0xa7   : > { %v425_v39 = vadd.f32 %v409_v21, %v373_v8  ;;  %v514_v41 = vmul.f32 %v9062_v24, %v5520_v38  ;;  %v1414_v4 = vadd.f32 %v1398_v35, %v1362_v56  ;;  %v1190_v30 = vmul.f32 %v9076_v52, %v5630_v11  ;;  %9078 = vst [vmem:[#allocation25_spill] sm:$0xff] %v6417_v25  ;;  %v234_v6 = vld [vmem:[%s5483_s13 + $0x90] sm:$0xff] }
  0xa8   : > { %v1242_v40 = vmul.f32 %v6314_v49, %v5640_v50  ;;  %v878_v46 = vmul.f32 %v9063_v29, %v5570_v63  ;;  %v1102_v44 = vadd.f32 %v1086_v7, %v1050_v62  ;;  %v790_v8 = vadd.f32 %v774_v23, %v737_v57  ;;  %v286_v56 = vld [vmem:[%s5483_s13 + $0x91] sm:$0xff] }
  0xa9   : > { %v477_v24 = vadd.f32 %v461_v55, %v425_v39  ;;  %v566_v35 = vmul.f32 %v9048_v48, %v5529_v43  ;;  %v1466_v53 = vadd.f32 %v1450_v3, %v1414_v4  ;;  %v1295_v32 = vmul.f32 %v6414_v34, %v5655_v61  ;;  %v338_v48 = vld [vmem:[%s5483_s13 + $0x92] sm:$0xff] }
  0xaa   : > { %v1347_v21 = vmul.f32 %v6417_v25, %v5658_v15  ;;  %v930_v7 = vmul.f32 %v6238_v28, %v8960_v16  ;;  %v1154_v62 = vadd.f32 %v1138_v22, %v1102_v44  ;;  %v842_v49 = vadd.f32 %v826_v54, %v790_v8  ;;  %v390_v57 = vld [vmem:[%s5483_s13 + $0x93] sm:$0xff] }
  0xab   : > { %v530_v23 = vadd.f32 %v514_v41, %v477_v24  ;;  %v618_v55 = vmul.f32 %v6166_v27, %v5538_v47  ;;  %v6433_v3 = vadd.f32 %v1502_v0, %v1466_v53  ;;  %v982_v39 = vmul.f32 %v6249_v9, %v5596_v18  ;;  %v442_v44 = vld [vmem:[%s5483_s13 + $0x94] sm:$0xff]  ;;  %v9080_v0 = vld [vmem:[#allocation49_spill] sm:$0xff] }
  0xac   : > { %v670_v4 = vmul.f32 %v6176_v42, %v5546_v51  ;;  %v254_v25 = vmul.f32 %v5486_v19, %v234_v6  ;;  %v1206_v34 = vadd.f32 %v1190_v30, %v1154_v62  ;;  %v894_v22 = vadd.f32 %v878_v46, %v842_v49  ;;  %v9081_v24 = vld [vmem:[#allocation5_spill] sm:$0xff]  ;;  %v6452_v46 = vld [vmem:[%s5483_s13 + $0xca] sm:$0xff] }
  0xad   : > { %9079 = vst [vmem:[#allocation41_spill] sm:$0xff] %v6433_v3  ;;  %v582_v54 = vadd.f32 %v566_v35, %v530_v23  ;;  %v306_v41 = vmul.f32 %v5489_v20, %v286_v56  ;;  %4826 = vmatmul.mubr.msk.f32.gmra.mxu0 %vm2749_vm0, %v6433_v3  ;;  %v1035_v27 = vmul.f32 %v6331_v10, %v9056_v5  ;;  %v9082_v30 = vmov 0.0   ;;  %v9083_v62 = vld [vmem:[#allocation21_spill] sm:$0xff]  ;;  %v9084_v3 = vld [vmem:[#allocation22_spill] sm:$0xff] }
  0xae   : > { %v722_v8 = vmul.f32 %v9080_v0, %v9046_v33  ;;  %v358_v42 = vmul.f32 %v9081_v24, %v338_v48  ;;  %v410_v6 = vmul.f32 %v5500_v26, %v390_v57  ;;  %2964 = vmatprep.mubr.f32.mxu0 %v9082_v30  ;;  %v1258_v49 = vadd.f32 %v1242_v40, %v1206_v34  ;;  %v9085_v0 = vld [vmem:[#allocation15_spill] sm:$0xff] }
  0xaf   : > { %v946_v35 = vadd.f32 %v930_v7, %v894_v22  ;;  %v634_v53 = vadd.f32 %v618_v55, %v582_v54  ;;  %v322_v56 = vadd.f32 %v306_v41, %v254_v25  ;;  %v1399_v23 = vmul.f32 %v6452_v46, %v9083_v62  ;;  %v6462_v30 = vld [vmem:[%s5483_s13 + $0xcb] sm:$0xff] }
  0xb0   : > { %v1087_v10 = vmul.f32 %v9084_v3, %v9011_v45  ;;  %v775_v48 = vmul.f32 %v9085_v0, %v5560_v59  ;;  %v462_v57 = vmul.f32 %v5509_v31, %v442_v44  ;;  %v1311_v26 = vadd.f32 %v1295_v32, %v1258_v49  ;;  %9086 = vst [vmem:[#allocation32_spill] sm:$0xff] %v6462_v30  ;;  %v9087_v55 = vld [vmem:[#allocation47_spill] sm:$0xff] }
  0xb1   : > { %v998_v40 = vadd.f32 %v982_v39, %v946_v35  ;;  %v686_v34 = vadd.f32 %v670_v4, %v634_v53  ;;  %v374_v7 = vadd.f32 %v358_v42, %v322_v56  ;;  %v1451_v25 = vmul.f32 %v6462_v30, %v9072_v13  ;;  %v6473_v44 = vld [vmem:[%s5483_s13 + $0xcc] sm:$0xff] }
  0xb2   : > { %v1139_v22 = vmul.f32 %v9087_v55, %v5619_v36  ;;  %v827_v54 = vmul.f32 %v9073_v14, %v5563_v60  ;;  %v515_v41 = vmul.f32 %v9074_v12, %v5520_v38  ;;  %v1363_v32 = vadd.f32 %v1347_v21, %v1311_v26  ;;  %v6484_v21 = vld [vmem:[%s5483_s13 + $0xd8] sm:$0xff] }
  0xb3   : > { %v1051_v39 = vadd.f32 %v1035_v27, %v998_v40  ;;  %v738_v4 = vadd.f32 %v722_v8, %v686_v34  ;;  %v426_v42 = vadd.f32 %v410_v6, %v374_v7  ;;  %v1503_v49 = vmul.f32 %v6397_v2, %v6473_v44  ;;  %9088 = vst [vmem:[#allocation26_spill] sm:$0xff] %v6484_v21  ;;  %v235_v6 = vld [vmem:[%s5483_s13 + $0x98] sm:$0xff] }
  0xb4   : > { %v1191_v35 = vmul.f32 %v6381_v58, %v5630_v11  ;;  %v879_v53 = vmul.f32 %v9075_v1, %v5570_v63  ;;  %v567_v56 = vmul.f32 %v9061_v17, %v5529_v43  ;;  %v1415_v26 = vadd.f32 %v1399_v23, %v1363_v32  ;;  %v6496_v32 = vld [vmem:[%s5483_s13 + $0xd9] sm:$0xff] }
  0xb5   : > { %v1103_v12 = vadd.f32 %v1087_v10, %v1051_v39  ;;  %v791_v27 = vadd.f32 %v775_v48, %v738_v4  ;;  %v478_v8 = vadd.f32 %v462_v57, %v426_v42  ;;  %v1243_v40 = vmul.f32 %v6391_v37, %v5640_v50  ;;  %9089 = vst [vmem:[#allocation31_spill] sm:$0xff] %v6496_v32  ;;  %v287_v39 = vld [vmem:[%s5483_s13 + $0x99] sm:$0xff] }
  0xb6   : > { %v1296_v34 = vmul.f32 %v6484_v21, %v5655_v61  ;;  %v931_v7 = vmul.f32 %v9076_v52, %v8960_v16  ;;  %v619_v17 = vmul.f32 %v9063_v29, %v5538_v47  ;;  %v1467_v23 = vadd.f32 %v1451_v25, %v1415_v26  ;;  %v339_v4 = vld [vmem:[%s5483_s13 + $0x9a] sm:$0xff]  ;;  %v9090_v21 = vld [vmem:[#allocation42_spill] sm:$0xff] }
  0xb7   : > { %v1155_v10 = vadd.f32 %v1139_v22, %v1103_v12  ;;  %v843_v48 = vadd.f32 %v827_v54, %v791_v27  ;;  %v531_v57 = vadd.f32 %v515_v41, %v478_v8  ;;  %v1348_v42 = vmul.f32 %v6496_v32, %v5658_v15  ;;  %v6510_v54 = vld [vmem:[%s5483_s13 + $0xda] sm:$0xff] }
  0xb8   : > { %v983_v1 = vmul.f32 %v9090_v21, %v5596_v18  ;;  %v671_v52 = vmul.f32 %v6238_v28, %v5546_v51  ;;  %v255_v29 = vmul.f32 %v5486_v19, %v235_v6  ;;  %v6507_v25 = vadd.f32 %v1503_v49, %v1467_v23  ;;  %9092 = vst [vmem:[#allocation33_spill] sm:$0xff] %v6510_v54  ;;  %v391_v12 = vld [vmem:[%s5483_s13 + $0x9b] sm:$0xff] }
  0xb9   : > { %v1207_v22 = vadd.f32 %v1191_v35, %v1155_v10  ;;  %v895_v41 = vadd.f32 %v879_v53, %v843_v48  ;;  %v583_v26 = vadd.f32 %v567_v56, %v531_v57  ;;  %v1400_v27 = vmul.f32 %v6510_v54, %v9083_v62  ;;  %v9093_v8 = vld [vmem:[#allocation40_spill] sm:$0xff] }
  0xba   : > { %9091 = vst [vmem:[#allocation45_spill] sm:$0xff] %v6507_v25  ;;  %v1036_v32 = vmul.f32 %v9093_v8, %v9056_v5  ;;  %v307_v28 = vmul.f32 %v5489_v20, %v287_v39  ;;  %v359_v6 = vmul.f32 %v9081_v24, %v339_v4  ;;  %4827 = vmatmul.mubr.msk.f32.gmra.mxu0 %vm2749_vm0, %v6507_v25  ;;  %v6522_v35 = vld [vmem:[%s5483_s13 + $0xdb] sm:$0xff]  ;;  %v9095_v48 = vmov 0.0   ;;  %v9097_v8 = vld [vmem:[#allocation6_spill] sm:$0xff] }
  0xbb   : > { %v1259_v49 = vadd.f32 %v1243_v40, %v1207_v22  ;;  %9094 = vst [vmem:[#allocation10_spill] sm:$0xff] %v6522_v35  ;;  %v947_v53 = vadd.f32 %v931_v7, %v895_v41  ;;  %v635_v56 = vadd.f32 %v619_v17, %v583_v26  ;;  %v723_v23 = vmul.f32 %v6249_v9, %v9046_v33  ;;  %v443_v10 = vld [vmem:[%s5483_s13 + $0x9c] sm:$0xff]  ;;  %v9098_v41 = vld [vmem:[#allocation11_spill] sm:$0xff] }
  0xbc   : > { %2970 = vmatprep.mubr.f32.mxu0 %v9095_v48  ;;  %v1452_v57 = vmul.f32 %v6522_v35, %v9072_v13  ;;  %v9096_v39 = vld [vmem:[#allocation25_spill] sm:$0xff]  ;;  %v323_v54 = vadd.f32 %v307_v28, %v255_v29  ;;  %v411_v25 = vmul.f32 %v9097_v8, %v391_v12  ;;  %v776_v9 = vmul.f32 %v9098_v41, %v5560_v59 }
  0xbd   : > { %v1088_v4 = vmul.f32 %v9096_v39, %v9011_v45  ;;  %v1312_v40 = vadd.f32 %v1296_v34, %v1259_v49  ;;  %v6534_v22 = vld [vmem:[%s5483_s13 + $0xdc] sm:$0xff]  ;;  %v999_v7 = vadd.f32 %v983_v1, %v947_v53  ;;  %v687_v17 = vadd.f32 %v671_v52, %v635_v56 }
  0xbe   : > { %v1504_v26 = vmul.f32 %v6397_v2, %v6534_v22  ;;  %v1140_v35 = vmul.f32 %v6452_v46, %v5619_v36  ;;  %v375_v39 = vadd.f32 %v359_v6, %v323_v54  ;;  %v463_v29 = vmul.f32 %v5509_v31, %v443_v10  ;;  %v6555_v56 = vld [vmem:[%s5483_s13 + $0xe1] sm:$0xff] }
  0xbf   : > { %v1364_v12 = vadd.f32 %v1348_v42, %v1312_v40  ;;  %v1052_v34 = vadd.f32 %v1036_v32, %v999_v7  ;;  %v739_v28 = vadd.f32 %v723_v23, %v687_v17  ;;  %v828_v1 = vmul.f32 %v9084_v3, %v5563_v60  ;;  %v6552_v32 = vld [vmem:[%s5483_s13 + $0xe0] sm:$0xff]  ;;  %9100 = vst [vmem:[#allocation29_spill] sm:$0xff] %v6555_v56 }
  0xc0   : > { %v1192_v52 = vmul.f32 %v6462_v30, %v5630_v11  ;;  %v1244_v49 = vmul.f32 %v6473_v44, %v5640_v50  ;;  %v427_v53 = vadd.f32 %v411_v25, %v375_v39  ;;  %v516_v54 = vmul.f32 %v9085_v0, %v5520_v38  ;;  %9099 = vst [vmem:[#allocation9_spill] sm:$0xff] %v6552_v32  ;;  %v6567_v17 = vld [vmem:[%s5483_s13 + $0xe2] sm:$0xff] }
  0xc1   : > { %v1416_v6 = vadd.f32 %v1400_v27, %v1364_v12  ;;  %v1104_v42 = vadd.f32 %v1088_v4, %v1052_v34  ;;  %v792_v23 = vadd.f32 %v776_v9, %v739_v28  ;;  %v880_v10 = vmul.f32 %v9087_v55, %v5570_v63  ;;  %v236_v27 = vld [vmem:[%s5483_s13 + $0xa8] sm:$0xff]  ;;  %9101 = vst [vmem:[#allocation36_spill] sm:$0xff] %v6567_v17 }
  0xc2   : > { %v1297_v40 = vmul.f32 %v6552_v32, %v5655_v61  ;;  %v1349_v25 = vmul.f32 %v6555_v56, %v5658_v15  ;;  %v479_v39 = vadd.f32 %v463_v29, %v427_v53  ;;  %v568_v0 = vmul.f32 %v9073_v14, %v5529_v43  ;;  %v288_v34 = vld [vmem:[%s5483_s13 + $0xa9] sm:$0xff]  ;;  %v9102_v53 = vld [vmem:[#allocation17_spill] sm:$0xff] }
  0xc3   : > { %v1468_v4 = vadd.f32 %v1452_v57, %v1416_v6  ;;  %v1156_v7 = vadd.f32 %v1140_v35, %v1104_v42  ;;  %v844_v9 = vadd.f32 %v828_v1, %v792_v23  ;;  %v932_v12 = vmul.f32 %v6381_v58, %v8960_v16  ;;  %v340_v28 = vld [vmem:[%s5483_s13 + $0xaa] sm:$0xff] }
  0xc4   : > { %v1401_v56 = vmul.f32 %v6567_v17, %v9083_v62  ;;  %v984_v29 = vmul.f32 %v6391_v37, %v5596_v18  ;;  %v532_v14 = vadd.f32 %v516_v54, %v479_v39  ;;  %v620_v57 = vmul.f32 %v9102_v53, %v5538_v47  ;;  %v392_v23 = vld [vmem:[%s5483_s13 + $0xab] sm:$0xff]  ;;  %v6584_v32 = vld [vmem:[%s5483_s13 + $0xe3] sm:$0xff] }
  0xc5   : > { %v6579_v35 = vadd.f32 %v1504_v26, %v1468_v4  ;;  %v1208_v6 = vadd.f32 %v1192_v52, %v1156_v7  ;;  %v896_v1 = vadd.f32 %v880_v10, %v844_v9  ;;  %v256_v42 = vmul.f32 %v5486_v19, %v236_v27  ;;  %9104 = vst [vmem:[#allocation37_spill] sm:$0xff] %v6584_v32  ;;  %v9105_v17 = vld [vmem:[#allocation19_spill] sm:$0xff]  ;;  %v9106_v27 = vld [vmem:[#allocation26_spill] sm:$0xff] }
  0xc6   : > { %v584_v58 = vadd.f32 %v568_v0, %v532_v14  ;;  %v672_v62 = vmul.f32 %v9105_v17, %v5546_v51  ;;  %v308_v54 = vmul.f32 %v5489_v20, %v288_v34  ;;  %v360_v39 = vmul.f32 %v9081_v24, %v340_v28  ;;  %v444_v7 = vld [vmem:[%s5483_s13 + $0xac] sm:$0xff]  ;;  %v6599_v0 = vld [vmem:[%s5483_s13 + $0xe4] sm:$0xff] }
  0xc7   : > { %9103 = vst [vmem:[#allocation30_spill] sm:$0xff] %v6579_v35  ;;  %4828 = vmatmul.mubr.msk.f32.gmra.mxu0 %vm2749_vm0, %v6579_v35  ;;  %v1260_v26 = vadd.f32 %v1244_v49, %v1208_v6  ;;  %v1453_v52 = vmul.f32 %v6584_v32, %v9072_v13  ;;  %v948_v10 = vadd.f32 %v932_v12, %v896_v1  ;;  %9107 = vst [vmem:[#allocation12_spill] sm:$0xff] %v6599_v0  ;;  %v9108_v53 = vld [vmem:[#allocation31_spill] sm:$0xff]  ;;  %v9109_v35 = vld [vmem:[#allocation40_spill] sm:$0xff] }
  0xc8   : > { %v1037_v4 = vmul.f32 %v9106_v27, %v9056_v5  ;;  %2976 = vmatprep.mubr.f32.mxu0 %v9095_v48  ;;  %v636_v17 = vadd.f32 %v620_v57, %v584_v58  ;;  %v724_v9 = vmul.f32 %v9090_v21, %v9046_v33  ;;  %v324_v34 = vadd.f32 %v308_v54, %v256_v42  ;;  %v9111_v54 = vld [vmem:[#allocation10_spill] sm:$0xff] }
  0xc9   : > { %v412_v49 = vmul.f32 %v9097_v8, %v392_v23  ;;  %v1313_v28 = vadd.f32 %v1297_v40, %v1260_v26  ;;  %v1505_v12 = vmul.f32 %v6397_v2, %v6599_v0  ;;  %v1000_v14 = vadd.f32 %v984_v29, %v948_v10  ;;  %v9110_v23 = vld [vmem:[#allocation33_spill] sm:$0xff]  ;;  %v6616_v26 = vld [vmem:[%s5483_s13 + $0xf0] sm:$0xff] }
  0xca   : > { %v1089_v6 = vmul.f32 %v9108_v53, %v9011_v45  ;;  %v688_v1 = vadd.f32 %v672_v62, %v636_v17  ;;  %v777_v32 = vmul.f32 %v9109_v35, %v5560_v59  ;;  %v376_v58 = vadd.f32 %v360_v39, %v324_v34  ;;  %9112 = vst [vmem:[#allocation39_spill] sm:$0xff] %v6616_v26  ;;  %v9113_v62 = vld [vmem:[#allocation25_spill] sm:$0xff] }
  0xcb   : > { %v464_v57 = vmul.f32 %v5509_v31, %v444_v7  ;;  %v1365_v21 = vadd.f32 %v1349_v25, %v1313_v28  ;;  %v1053_v42 = vadd.f32 %v1037_v4, %v1000_v14  ;;  %v1141_v40 = vmul.f32 %v9110_v23, %v5619_v36  ;;  %v6627_v28 = vld [vmem:[%s5483_s13 + $0xf1] sm:$0xff] }
  0xcc   : > { %v1193_v29 = vmul.f32 %v9111_v54, %v5630_v11  ;;  %v740_v10 = vadd.f32 %v724_v9, %v688_v1  ;;  %v829_v17 = vmul.f32 %v9113_v62, %v5563_v60  ;;  %v428_v0 = vadd.f32 %v412_v49, %v376_v58  ;;  %9114 = vst [vmem:[#allocation23_spill] sm:$0xff] %v6627_v28 }
  0xcd   : > { %v517_v39 = vmul.f32 %v9098_v41, %v5520_v38  ;;  %v1417_v25 = vadd.f32 %v1401_v56, %v1365_v21  ;;  %v1105_v4 = vadd.f32 %v1089_v6, %v1053_v42  ;;  %v1245_v7 = vmul.f32 %v6534_v22, %v5640_v50  ;;  %v237_v41 = vld [vmem:[%s5483_s13 + $0xb0] sm:$0xff] }
  0xce   : > { %v1298_v34 = vmul.f32 %v6616_v26, %v5655_v61  ;;  %v793_v9 = vadd.f32 %v777_v32, %v740_v10  ;;  %v881_v14 = vmul.f32 %v6452_v46, %v5570_v63  ;;  %v480_v49 = vadd.f32 %v464_v57, %v428_v0  ;;  %v289_v42 = vld [vmem:[%s5483_s13 + $0xb1] sm:$0xff] }
  0xcf   : > { %v569_v1 = vmul.f32 %v9084_v3, %v5529_v43  ;;  %v1469_v56 = vadd.f32 %v1453_v52, %v1417_v25  ;;  %v1157_v6 = vadd.f32 %v1141_v40, %v1105_v4  ;;  %v1350_v58 = vmul.f32 %v6627_v28, %v5658_v15  ;;  %v341_v32 = vld [vmem:[%s5483_s13 + $0xb2] sm:$0xff]  ;;  %v9116_v40 = vld [vmem:[#allocation38_spill] sm:$0xff] }
  0xd0   : > { %v933_v21 = vmul.f32 %v6462_v30, %v8960_v16  ;;  %v845_v10 = vadd.f32 %v829_v17, %v793_v9  ;;  %v985_v0 = vmul.f32 %v6473_v44, %v5596_v18  ;;  %v533_v57 = vadd.f32 %v517_v39, %v480_v49  ;;  %v393_v28 = vld [vmem:[%s5483_s13 + $0xb3] sm:$0xff] }
  0xd1   : > { %v621_v3 = vmul.f32 %v9087_v55, %v5538_v47  ;;  %v6644_v26 = vadd.f32 %v1505_v12, %v1469_v56  ;;  %v1209_v52 = vadd.f32 %v1193_v29, %v1157_v6  ;;  %v673_v25 = vmul.f32 %v9116_v40, %v5546_v51  ;;  %v6651_v30 = vld [vmem:[%s5483_s13 + $0xf2] sm:$0xff]  ;;  %v9118_v12 = vld [vmem:[#allocation21_spill] sm:$0xff] }
  0xd2   : > { %v257_v4 = vmul.f32 %v5486_v19, %v237_v41  ;;  %9117 = vst [vmem:[#allocation20_spill] sm:$0xff] %v6651_v30  ;;  %v897_v17 = vadd.f32 %v881_v14, %v845_v10  ;;  %v585_v9 = vadd.f32 %v569_v1, %v533_v57  ;;  %v309_v39 = vmul.f32 %v5489_v20, %v289_v42  ;;  %v9119_v56 = vld [vmem:[#allocation9_spill] sm:$0xff]  ;;  %v445_v14 = vld [vmem:[%s5483_s13 + $0xb4] sm:$0xff] }
  0xd3   : > { %9115 = vst [vmem:[#allocation48_spill] sm:$0xff] %v6644_v26  ;;  %v361_v49 = vmul.f32 %v9081_v24, %v341_v32  ;;  %4829 = vmatmul.mubr.msk.f32.gmra.mxu0 %vm2749_vm0, %v6644_v26  ;;  %v1261_v55 = vadd.f32 %v1245_v7, %v1209_v52  ;;  %v1402_v29 = vmul.f32 %v6651_v30, %v9118_v12  ;;  %v6666_v1 = vld [vmem:[%s5483_s13 + $0xf3] sm:$0xff]  ;;  %v9121_v40 = vld [vmem:[#allocation29_spill] sm:$0xff] }
  0xd4   : > { %v1038_v41 = vmul.f32 %v9119_v56, %v9056_v5  ;;  %v725_v6 = vmul.f32 %v6391_v37, %v9046_v33  ;;  %2982 = vmatprep.mubr.f32.mxu0 %v9095_v48  ;;  %9120 = vst [vmem:[#allocation34_spill] sm:$0xff] %v6666_v1  ;;  %v949_v42 = vadd.f32 %v933_v21, %v897_v17  ;;  %v6676_v30 = vld [vmem:[%s5483_s13 + $0xf4] sm:$0xff] }
  0xd5   : > { %v637_v32 = vadd.f32 %v621_v3, %v585_v9  ;;  %v325_v10 = vadd.f32 %v309_v39, %v257_v4  ;;  %v413_v57 = vmul.f32 %v9097_v8, %v393_v28  ;;  %v1314_v7 = vadd.f32 %v1298_v34, %v1261_v55  ;;  %9122 = vst [vmem:[#allocation24_spill] sm:$0xff] %v6676_v30  ;;  %v9123_v4 = vld [vmem:[#allocation36_spill] sm:$0xff] }
  0xd6   : > { %v1454_v52 = vmul.f32 %v6666_v1, %v9072_v13  ;;  %v1090_v26 = vmul.f32 %v9121_v40, %v9011_v45  ;;  %v778_v37 = vmul.f32 %v9106_v27, %v5560_v59  ;;  %v1001_v56 = vadd.f32 %v985_v0, %v949_v42  ;;  %v9125_v42 = vld [vmem:[#allocation12_spill] sm:$0xff] }
  0xd7   : > { %v689_v12 = vadd.f32 %v673_v25, %v637_v32  ;;  %v377_v21 = vadd.f32 %v361_v49, %v325_v10  ;;  %v465_v3 = vmul.f32 %v5509_v31, %v445_v14  ;;  %v1366_v28 = vadd.f32 %v1350_v58, %v1314_v7  ;;  %v9124_v58 = vld [vmem:[#allocation37_spill] sm:$0xff] }
  0xd8   : > { %v1506_v34 = vmul.f32 %v6397_v2, %v6676_v30  ;;  %v1142_v17 = vmul.f32 %v9123_v4, %v5619_v36  ;;  %v830_v9 = vmul.f32 %v9108_v53, %v5563_v60  ;;  %v1054_v39 = vadd.f32 %v1038_v41, %v1001_v56  ;;  %v6694_v30 = vld [vmem:[%s5483_s13 + $0xf8] sm:$0xff]  ;;  %v4418_v41 = vld [vmem:[%s5483_s13 + $0xc0] sm:$0xff] }
  0xd9   : > { %v741_v55 = vadd.f32 %v725_v6, %v689_v12  ;;  %v429_v0 = vadd.f32 %v413_v57, %v377_v21  ;;  %v518_v25 = vmul.f32 %v9109_v35, %v5520_v38  ;;  %v1418_v49 = vadd.f32 %v1402_v29, %v1366_v28  ;;  %9126 = vst [vmem:[#allocation16_spill] sm:$0xff] %v6694_v30  ;;  %v6697_v12 = vld [vmem:[%s5483_s13 + $0xf9] sm:$0xff]  ;;  %v4434_v28 = vld [vmem:[%s5483_s13 + $0xc1] sm:$0xff] }
  0xda   : > { %v1194_v14 = vmul.f32 %v9124_v58, %v5630_v11  ;;  %v1246_v32 = vmul.f32 %v9125_v42, %v5640_v50  ;;  %v882_v10 = vmul.f32 %v9110_v23, %v5570_v63  ;;  %v1106_v7 = vadd.f32 %v1090_v26, %v1054_v39  ;;  %9127 = vst [vmem:[#allocation44_spill] sm:$0xff] %v6697_v12 }
  0xdb   : > { %v794_v56 = vadd.f32 %v778_v37, %v741_v55  ;;  %v481_v35 = vadd.f32 %v465_v3, %v429_v0  ;;  %v570_v29 = vmul.f32 %v9113_v62, %v5529_v43  ;;  %v1470_v6 = vadd.f32 %v1454_v52, %v1418_v49  ;;  %v4450_v62 = vld [vmem:[%s5483_s13 + $0xc2] sm:$0xff]  ;;  %v9129_v49 = vld [vmem:[#allocation32_spill] sm:$0xff] }
  0xdc   : > { %v1299_v57 = vmul.f32 %v6694_v30, %v5655_v61  ;;  %v1351_v21 = vmul.f32 %v6697_v12, %v5658_v15  ;;  %v934_v26 = vmul.f32 %v9111_v54, %v8960_v16  ;;  %v1158_v39 = vadd.f32 %v1142_v17, %v1106_v7  ;;  %v4466_v55 = vld [vmem:[%s5483_s13 + $0xc3] sm:$0xff] }
  0xdd   : > { %v846_v42 = vadd.f32 %v830_v9, %v794_v56  ;;  %v534_v37 = vadd.f32 %v518_v25, %v481_v35  ;;  %v622_v3 = vmul.f32 %v6452_v46, %v5538_v47  ;;  %v6713_v52 = vadd.f32 %v1506_v34, %v1470_v6  ;;  %v4482_v7 = vld [vmem:[%s5483_s13 + $0xc4] sm:$0xff]  ;;  %v9130_v46 = vld [vmem:[#allocation39_spill] sm:$0xff] }
  0xde   : > { %v986_v0 = vmul.f32 %v6534_v22, %v5596_v18  ;;  %v674_v12 = vmul.f32 %v9129_v49, %v5546_v51  ;;  %v1543_v30 = vmul.f32 %v4418_v41, %v5486_v19  ;;  %v1210_v54 = vadd.f32 %v1194_v14, %v1158_v39 }
  0xdf   : > { %9128 = vst [vmem:[#allocation49_spill] sm:$0xff] %v6713_v52  ;;  %v898_v17 = vadd.f32 %v882_v10, %v846_v42  ;;  %v586_v9 = vadd.f32 %v570_v29, %v534_v37  ;;  %v1591_v25 = vmul.f32 %v4434_v28, %v5489_v20  ;;  %4830 = vmatmul.mubr.msk.f32.gmra.mxu0 %vm2749_vm0, %v6713_v52  ;;  %v6732_v42 = vld [vmem:[%s5483_s13 + $0xfa] sm:$0xff]  ;;  %v9133_v37 = vld [vmem:[#allocation23_spill] sm:$0xff] }
  0xe0   : > { %v1039_v34 = vmul.f32 %v9130_v46, %v9056_v5  ;;  %v726_v56 = vmul.f32 %v6473_v44, %v9046_v33  ;;  %v1639_v35 = vmul.f32 %v4450_v62, %v9081_v24  ;;  %v1687_v41 = vmul.f32 %v4466_v55, %v9097_v8  ;;  %2988 = vmatprep.mubr.f32.mxu0 %v9095_v48  ;;  %v9132_v28 = vld [vmem:[#allocation21_spill] sm:$0xff] }
  0xe1   : > { %v1262_v14 = vadd.f32 %v1246_v32, %v1210_v54  ;;  %9131 = vst [vmem:[#allocation5_spill] sm:$0xff] %v6732_v42  ;;  %v950_v10 = vadd.f32 %v934_v26, %v898_v17  ;;  %v638_v29 = vadd.f32 %v622_v3, %v586_v9  ;;  %v1607_v6 = vadd.f32 %v1591_v25, %v1543_v30  ;;  %v9134_v44 = vld [vmem:[#allocation9_spill] sm:$0xff]  ;;  %v9136_v3 = vld [vmem:[#allocation20_spill] sm:$0xff] }
  0xe2   : > { %v1403_v39 = vmul.f32 %v6732_v42, %v9132_v28  ;;  %v1091_v49 = vmul.f32 %v9133_v37, %v9011_v45  ;;  %v779_v62 = vmul.f32 %v9134_v44, %v5560_v59  ;;  %v1735_v55 = vmul.f32 %v4482_v7, %v5509_v31  ;;  %v6742_v46 = vld [vmem:[%s5483_s13 + $0xfb] sm:$0xff] }
  0xe3   : > { %v1315_v52 = vadd.f32 %v1299_v57, %v1262_v14  ;;  %9135 = vst [vmem:[#allocation22_spill] sm:$0xff] %v6742_v46  ;;  %v1002_v54 = vadd.f32 %v986_v0, %v950_v10  ;;  %v690_v32 = vadd.f32 %v674_v12, %v638_v29  ;;  %v1655_v26 = vadd.f32 %v1639_v35, %v1607_v6  ;;  %v6753_v7 = vld [vmem:[%s5483_s13 + $0xfc] sm:$0xff] }
  0xe4   : > { %v1455_v30 = vmul.f32 %v6742_v46, %v9072_v13  ;;  %v1143_v17 = vmul.f32 %v9136_v3, %v5619_v36  ;;  %v831_v9 = vmul.f32 %v9121_v40, %v5563_v60  ;;  %v1784_v25 = vmul.f32 %v9106_v27, %v5520_v38  ;;  %9137 = vst [vmem:[#allocation15_spill] sm:$0xff] %v6753_v7 }
  0xe5   : > { %v1367_v57 = vadd.f32 %v1351_v21, %v1315_v52  ;;  %v1055_v0 = vadd.f32 %v1039_v34, %v1002_v54  ;;  %v742_v12 = vadd.f32 %v726_v56, %v690_v32  ;;  %v1703_v35 = vadd.f32 %v1687_v41, %v1655_v26  ;;  %v6764_v52 = vld [vmem:[%s5483_s13 + $0x108] sm:$0xff]  ;;  %v9139_v54 = vld [vmem:[#allocation24_spill] sm:$0xff] }
  0xe6   : > { %v1507_v14 = vmul.f32 %v6397_v2, %v6753_v7  ;;  %v1195_v10 = vmul.f32 %v6666_v1, %v5630_v11  ;;  %v883_v29 = vmul.f32 %v9123_v4, %v5570_v63  ;;  %v1832_v6 = vmul.f32 %v9108_v53, %v5529_v43  ;;  %9138 = vst [vmem:[#allocation47_spill] sm:$0xff] %v6764_v52  ;;  %v4419_v41 = vld [vmem:[%s5483_s13 + $0xc8] sm:$0xff] }
  0xe7   : > { %v1419_v27 = vadd.f32 %v1403_v39, %v1367_v57  ;;  %v1107_v21 = vadd.f32 %v1091_v49, %v1055_v0  ;;  %v795_v34 = vadd.f32 %v779_v62, %v742_v12  ;;  %v1751_v56 = vadd.f32 %v1735_v55, %v1703_v35  ;;  %v6776_v57 = vld [vmem:[%s5483_s13 + $0x109] sm:$0xff] }
  0xe8   : > { %v1247_v32 = vmul.f32 %v9139_v54, %v5640_v50  ;;  %v1300_v26 = vmul.f32 %v6764_v52, %v5655_v61  ;;  %v935_v4 = vmul.f32 %v9124_v58, %v8960_v16  ;;  %v1880_v53 = vmul.f32 %v9110_v23, %v5538_v47  ;;  %9140 = vst [vmem:[#allocation42_spill] sm:$0xff] %v6776_v57  ;;  %v4435_v0 = vld [vmem:[%s5483_s13 + $0xc9] sm:$0xff]  ;;  %v9141_v52 = vld [vmem:[#allocation12_spill] sm:$0xff] }
  0xe9   : > { %v1471_v39 = vadd.f32 %v1455_v30, %v1419_v27  ;;  %v1159_v49 = vadd.f32 %v1143_v17, %v1107_v21  ;;  %v847_v62 = vadd.f32 %v831_v9, %v795_v34  ;;  %v1800_v55 = vadd.f32 %v1784_v25, %v1751_v56  ;;  %v4451_v12 = vld [vmem:[%s5483_s13 + $0xca] sm:$0xff]  ;;  %v9144_v56 = vld [vmem:[#allocation16_spill] sm:$0xff] }
  0xea   : > { %v1352_v35 = vmul.f32 %v6776_v57, %v5658_v15  ;;  %v987_v54 = vmul.f32 %v9141_v52, %v5596_v18  ;;  %v9142_v58 = vld [vmem:[#allocation10_spill] sm:$0xff]  ;;  %v1544_v23 = vmul.f32 %v4419_v41, %v5486_v19  ;;  %v1040_v57 = vmul.f32 %v9144_v56, %v9056_v5 }
  0xeb   : > { %v1928_v1 = vmul.f32 %v9142_v58, %v5546_v51  ;;  %v6787_v30 = vadd.f32 %v1507_v14, %v1471_v39  ;;  %v1211_v17 = vadd.f32 %v1195_v10, %v1159_v49  ;;  %v6790_v9 = vld [vmem:[%s5483_s13 + $0x10a] sm:$0xff]  ;;  %v899_v25 = vadd.f32 %v883_v29, %v847_v62 }
  0xec   : > { %v1848_v27 = vadd.f32 %v1832_v6, %v1800_v55  ;;  %v4467_v21 = vld [vmem:[%s5483_s13 + $0xcb] sm:$0xff]  ;;  %v1404_v34 = vmul.f32 %v6790_v9, %v9132_v28  ;;  %v1592_v58 = vmul.f32 %v4435_v0, %v5489_v20  ;;  %v1640_v41 = vmul.f32 %v4451_v12, %v9081_v24  ;;  %v9146_v55 = vld [vmem:[#allocation44_spill] sm:$0xff] }
  0xed   : > { %9143 = vst [vmem:[#allocation6_spill] sm:$0xff] %v6787_v30  ;;  %4831 = vmatmul.mubr.msk.f32.gmra.mxu0 %vm2749_vm0, %v6787_v30  ;;  %v1263_v14 = vadd.f32 %v1247_v32, %v1211_v17  ;;  %v6802_v10 = vld [vmem:[%s5483_s13 + $0x10b] sm:$0xff]  ;;  %v951_v29 = vadd.f32 %v935_v4, %v899_v25  ;;  %v1976_v39 = vmul.f32 %v6534_v22, %v9046_v33 }
  0xee   : > { %9145 = vst [vmem:[#allocation11_spill] sm:$0xff] %v6802_v10  ;;  %v1896_v6 = vadd.f32 %v1880_v53, %v1848_v27  ;;  %v4483_v49 = vld [vmem:[%s5483_s13 + $0xcc] sm:$0xff]  ;;  %2994 = vmatprep.mubr.f32.mxu0 %v9095_v48  ;;  %v1456_v62 = vmul.f32 %v6802_v10, %v9072_v13  ;;  %v1092_v0 = vmul.f32 %v9146_v55, %v9011_v45 }
  0xef   : > { %v1608_v12 = vadd.f32 %v1592_v58, %v1544_v23  ;;  %v1688_v30 = vmul.f32 %v4467_v21, %v9097_v8  ;;  %v1316_v32 = vadd.f32 %v1300_v26, %v1263_v14  ;;  %v6814_v17 = vld [vmem:[%s5483_s13 + $0x10c] sm:$0xff]  ;;  %v1003_v4 = vadd.f32 %v987_v54, %v951_v29 }
  0xf0   : > { %9147 = vst [vmem:[#allocation17_spill] sm:$0xff] %v6814_v17  ;;  %v1944_v53 = vadd.f32 %v1928_v1, %v1896_v6  ;;  %v9148_v25 = vld [vmem:[#allocation39_spill] sm:$0xff]  ;;  %v1508_v27 = vmul.f32 %v6397_v2, %v6814_v17  ;;  %v1144_v10 = vmul.f32 %v6732_v42, %v5619_v36  ;;  %v1736_v23 = vmul.f32 %v4483_v49, %v5509_v31 }
  0xf1   : > { %v2025_v22 = vmul.f32 %v9148_v25, %v5560_v59  ;;  %v1656_v55 = vadd.f32 %v1640_v41, %v1608_v12  ;;  %v1368_v21 = vadd.f32 %v1352_v35, %v1316_v32  ;;  %v1056_v26 = vadd.f32 %v1040_v57, %v1003_v4  ;;  %v6832_v57 = vld [vmem:[%s5483_s13 + $0x110] sm:$0xff] }
  0xf2   : > { %v1992_v58 = vadd.f32 %v1976_v39, %v1944_v53  ;;  %v2073_v1 = vmul.f32 %v9133_v37, %v5563_v60  ;;  %v1196_v54 = vmul.f32 %v6742_v46, %v5630_v11  ;;  %v1248_v14 = vmul.f32 %v6753_v7, %v5640_v50  ;;  %9149 = vst [vmem:[#allocation19_spill] sm:$0xff] %v6832_v57  ;;  %v6835_v39 = vld [vmem:[%s5483_s13 + $0x111] sm:$0xff] }
  0xf3   : > { %v1704_v29 = vadd.f32 %v1688_v30, %v1656_v55  ;;  %v1785_v41 = vmul.f32 %v9134_v44, %v5520_v38  ;;  %v1420_v6 = vadd.f32 %v1404_v34, %v1368_v21  ;;  %v1108_v35 = vadd.f32 %v1092_v0, %v1056_v26  ;;  %9150 = vst [vmem:[#allocation26_spill] sm:$0xff] %v6835_v39  ;;  %v4420_v34 = vld [vmem:[%s5483_s13 + $0xd8] sm:$0xff]  ;;  %v9152_v21 = vld [vmem:[#allocation34_spill] sm:$0xff] }
  0xf4   : > { %v2041_v49 = vadd.f32 %v2025_v22, %v1992_v58  ;;  %v2121_v12 = vmul.f32 %v9136_v3, %v5570_v63  ;;  %v1301_v32 = vmul.f32 %v6832_v57, %v5655_v61  ;;  %v1353_v30 = vmul.f32 %v6835_v39, %v5658_v15  ;;  %v6847_v53 = vld [vmem:[%s5483_s13 + $0x112] sm:$0xff]  ;;  %v4452_v57 = vld [vmem:[%s5483_s13 + $0xda] sm:$0xff] }
  0xf5   : > { %v1752_v55 = vadd.f32 %v1736_v23, %v1704_v29  ;;  %v1833_v44 = vmul.f32 %v9121_v40, %v5529_v43  ;;  %v1472_v0 = vadd.f32 %v1456_v62, %v1420_v6  ;;  %v1160_v4 = vadd.f32 %v1144_v10, %v1108_v35  ;;  %9151 = vst [vmem:[#allocation31_spill] sm:$0xff] %v6847_v53  ;;  %v4436_v58 = vld [vmem:[%s5483_s13 + $0xd9] sm:$0xff] }
  0xf6   : > { %v2089_v22 = vadd.f32 %v2073_v1, %v2041_v49  ;;  %v2169_v26 = vmul.f32 %v9152_v21, %v8960_v16  ;;  %v1405_v39 = vmul.f32 %v6847_v53, %v9132_v28  ;;  %v9153_v23 = vld [vmem:[#allocation24_spill] sm:$0xff]  ;;  %v1545_v35 = vmul.f32 %v4420_v34, %v5486_v19  ;;  %v9157_v53 = vld [vmem:[#allocation37_spill] sm:$0xff] }
  0xf7   : > { %v2217_v29 = vmul.f32 %v9153_v23, %v5596_v18  ;;  %v1801_v40 = vadd.f32 %v1785_v41, %v1752_v55  ;;  %v9154_v3 = vld [vmem:[#allocation36_spill] sm:$0xff]  ;;  %v6859_v10 = vadd.f32 %v1508_v27, %v1472_v0  ;;  %v1212_v6 = vadd.f32 %v1196_v54, %v1160_v4 }
  0xf8   : > { %v1881_v62 = vmul.f32 %v9154_v3, %v5538_v47  ;;  %v2137_v1 = vadd.f32 %v2121_v12, %v2089_v22  ;;  %v4468_v49 = vld [vmem:[%s5483_s13 + $0xdb] sm:$0xff]  ;;  %v6864_v21 = vld [vmem:[%s5483_s13 + $0x113] sm:$0xff]  ;;  %v1929_v28 = vmul.f32 %v9157_v53, %v5546_v51  ;;  %v1593_v41 = vmul.f32 %v4436_v58, %v5489_v20 }
  0xf9   : > { %9155 = vst [vmem:[#allocation40_spill] sm:$0xff] %v6859_v10  ;;  %9156 = vst [vmem:[#allocation33_spill] sm:$0xff] %v6864_v21  ;;  %v1849_v7 = vadd.f32 %v1833_v44, %v1801_v40  ;;  %v1641_v55 = vmul.f32 %v4452_v57, %v9081_v24  ;;  %4832 = vmatmul.mubr.msk.f32.gmra.mxu0 %vm2749_vm0, %v6859_v10  ;;  %v1264_v3 = vadd.f32 %v1248_v14, %v1212_v6  ;;  %v9158_v12 = vld [vmem:[#allocation47_spill] sm:$0xff]  ;;  %v4484_v0 = vld [vmem:[%s5483_s13 + $0xdc] sm:$0xff] }
  0xfa   : > { %v1457_v27 = vmul.f32 %v6864_v21, %v9072_v13  ;;  %v2185_v54 = vadd.f32 %v2169_v26, %v2137_v1  ;;  %v2266_v34 = vmul.f32 %v9158_v12, %v9056_v5  ;;  %3000 = vmatprep.mubr.f32.mxu0 %v9095_v48  ;;  %v6879_v44 = vld [vmem:[%s5483_s13 + $0x114] sm:$0xff]  ;;  %v1977_v57 = vmul.f32 %v9141_v52, %v9046_v33  ;;  %v9160_v40 = vld [vmem:[#allocation42_spill] sm:$0xff] }
  0xfb   : > { %9159 = vst [vmem:[#allocation25_spill] sm:$0xff] %v6879_v44  ;;  %v1897_v4 = vadd.f32 %v1881_v62, %v1849_v7  ;;  %v1609_v53 = vadd.f32 %v1593_v41, %v1545_v35  ;;  %v1689_v14 = vmul.f32 %v4468_v49, %v9097_v8  ;;  %v1317_v22 = vadd.f32 %v1301_v32, %v1264_v3  ;;  %v9161_v49 = vld [vmem:[#allocation11_spill] sm:$0xff]  ;;  %v6896_v41 = vld [vmem:[%s5483_s13 + $0x120] sm:$0xff] }
  0xfc   : > { %v1509_v26 = vmul.f32 %v6397_v2, %v6879_v44  ;;  %v2233_v58 = vadd.f32 %v2217_v29, %v2185_v54  ;;  %v2314_v6 = vmul.f32 %v9160_v40, %v9011_v45  ;;  %v2026_v10 = vmul.f32 %v9144_v56, %v5560_v59  ;;  %9162 = vst [vmem:[#allocation38_spill] sm:$0xff] %v6896_v41 }
  0xfd   : > { %v1945_v1 = vadd.f32 %v1929_v28, %v1897_v4  ;;  %v1657_v7 = vadd.f32 %v1641_v55, %v1609_v53  ;;  %v1737_v62 = vmul.f32 %v4484_v0, %v5509_v31  ;;  %v1369_v52 = vadd.f32 %v1353_v30, %v1317_v22  ;;  %v9163_v28 = vld [vmem:[#allocation44_spill] sm:$0xff]  ;;  %v6907_v22 = vld [vmem:[%s5483_s13 + $0x121] sm:$0xff] }
  0xfe   : > { %v2282_v35 = vadd.f32 %v2266_v34, %v2233_v58  ;;  %v2362_v32 = vmul.f32 %v6790_v9, %v5619_v36  ;;  %v2410_v29 = vmul.f32 %v9161_v49, %v5630_v11  ;;  %v2074_v54 = vmul.f32 %v9163_v28, %v5563_v60  ;;  %9164 = vst [vmem:[#allocation29_spill] sm:$0xff] %v6907_v22 }
  0xff   : > { %v1993_v3 = vadd.f32 %v1977_v57, %v1945_v1  ;;  %v1705_v4 = vadd.f32 %v1689_v14, %v1657_v7  ;;  %v1786_v55 = vmul.f32 %v9148_v25, %v5520_v38  ;;  %v1421_v30 = vadd.f32 %v1405_v39, %v1369_v52  ;;  %v4421_v25 = vld [vmem:[%s5483_s13 + $0xe0] sm:$0xff] }
 0x100   : > { %v2330_v34 = vadd.f32 %v2314_v6, %v2282_v35  ;;  %v2458_v0 = vmul.f32 %v6814_v17, %v5640_v50  ;;  %v2507_v53 = vmul.f32 %v6896_v41, %v5655_v61  ;;  %v2122_v58 = vmul.f32 %v6732_v42, %v5570_v63  ;;  %v4437_v35 = vld [vmem:[%s5483_s13 + $0xe1] sm:$0xff]  ;;  %v9165_v41 = vld [vmem:[#allocation15_spill] sm:$0xff] }
 0x101   : > { %v2042_v57 = vadd.f32 %v2026_v10, %v1993_v3  ;;  %v1753_v14 = vadd.f32 %v1737_v62, %v1705_v4  ;;  %v1834_v1 = vmul.f32 %v9133_v37, %v5529_v43  ;;  %v1473_v39 = vadd.f32 %v1457_v27, %v1421_v30  ;;  %v4453_v10 = vld [vmem:[%s5483_s13 + $0xe2] sm:$0xff]  ;;  %v9166_v37 = vld [vmem:[#allocation20_spill] sm:$0xff] }
 0x102   : > { %v2378_v6 = vadd.f32 %v2362_v32, %v2330_v34  ;;  %v2555_v7 = vmul.f32 %v6907_v22, %v5658_v15  ;;  %v2170_v52 = vmul.f32 %v6742_v46, %v8960_v16  ;;  %v2218_v62 = vmul.f32 %v9165_v41, %v5596_v18  ;;  %v9168_v32 = vld [vmem:[#allocation34_spill] sm:$0xff] }
 0x103   : > { %v2090_v3 = vadd.f32 %v2074_v54, %v2042_v57  ;;  %v1802_v4 = vadd.f32 %v1786_v55, %v1753_v14  ;;  %v1882_v17 = vmul.f32 %v9166_v37, %v5538_v47  ;;  %v6924_v42 = vadd.f32 %v1509_v26, %v1473_v39  ;;  %v4469_v22 = vld [vmem:[%s5483_s13 + $0xe3] sm:$0xff] }
 0x104   : > { %v2426_v27 = vadd.f32 %v2410_v29, %v2378_v6  ;;  %v1930_v30 = vmul.f32 %v9168_v32, %v5546_v51  ;;  %v1546_v34 = vmul.f32 %v4421_v25, %v5486_v19  ;;  %v6931_v46 = vld [vmem:[%s5483_s13 + $0x122] sm:$0xff]  ;;  %v1594_v55 = vmul.f32 %v4437_v35, %v5489_v20  ;;  %v9171_v6 = vld [vmem:[#allocation19_spill] sm:$0xff] }
 0x105   : > { %9167 = vst [vmem:[#allocation32_spill] sm:$0xff] %v6924_v42  ;;  %9169 = vst [vmem:[#allocation23_spill] sm:$0xff] %v6931_v46  ;;  %v2138_v54 = vadd.f32 %v2122_v58, %v2090_v3  ;;  %v1850_v57 = vadd.f32 %v1834_v1, %v1802_v4  ;;  %v1642_v14 = vmul.f32 %v4453_v10, %v9081_v24  ;;  %4833 = vmatmul.mubr.msk.f32.gmra.mxu0 %vm2749_vm0, %v6924_v42  ;;  %v9170_v29 = vld [vmem:[#allocation21_spill] sm:$0xff]  ;;  %v9173_v32 = vld [vmem:[#allocation26_spill] sm:$0xff] }
 0x106   : > { %v2474_v26 = vadd.f32 %v2458_v0, %v2426_v27  ;;  %v2603_v39 = vmul.f32 %v6931_v46, %v9170_v29  ;;  %v2267_v25 = vmul.f32 %v9171_v6, %v9056_v5  ;;  %v1978_v37 = vmul.f32 %v9153_v23, %v9046_v33  ;;  %v4485_v58 = vld [vmem:[%s5483_s13 + $0xe4] sm:$0xff]  ;;  %3006 = vmatprep.mubr.f32.mxu0 %v9095_v48 }
 0x107   : > { %v6946_v1 = vld [vmem:[%s5483_s13 + $0x123] sm:$0xff]  ;;  %v2186_v35 = vadd.f32 %v2170_v52, %v2138_v54  ;;  %v1898_v10 = vadd.f32 %v1882_v17, %v1850_v57  ;;  %v1610_v3 = vadd.f32 %v1594_v55, %v1546_v34  ;;  %v1690_v4 = vmul.f32 %v4469_v22, %v9097_v8  ;;  %v9175_v34 = vld [vmem:[#allocation31_spill] sm:$0xff] }
 0x108   : > { %9172 = vst [vmem:[#allocation9_spill] sm:$0xff] %v6946_v1  ;;  %v2523_v0 = vadd.f32 %v2507_v53, %v2474_v26  ;;  %v2651_v27 = vmul.f32 %v6946_v1, %v9072_v13  ;;  %v2315_v42 = vmul.f32 %v9173_v32, %v9011_v45  ;;  %v2027_v23 = vmul.f32 %v9158_v12, %v5560_v59  ;;  %v6956_v46 = vld [vmem:[%s5483_s13 + $0x124] sm:$0xff] }
 0x109   : > { %9174 = vst [vmem:[#allocation12_spill] sm:$0xff] %v6956_v46  ;;  %v2234_v6 = vadd.f32 %v2218_v62, %v2186_v35  ;;  %v1946_v29 = vadd.f32 %v1930_v30, %v1898_v10  ;;  %v1658_v52 = vadd.f32 %v1642_v14, %v1610_v3  ;;  %v1738_v17 = vmul.f32 %v4485_v58, %v5509_v31  ;;  %v6974_v10 = vld [vmem:[%s5483_s13 + $0x128] sm:$0xff] }
 0x10a   : > { %v2571_v22 = vadd.f32 %v2555_v7, %v2523_v0  ;;  %v2699_v53 = vmul.f32 %v6397_v2, %v6956_v46  ;;  %v2363_v54 = vmul.f32 %v9175_v34, %v5619_v36  ;;  %v2075_v57 = vmul.f32 %v9160_v40, %v5563_v60  ;;  %9176 = vst [vmem:[#allocation10_spill] sm:$0xff] %v6974_v10  ;;  %v4438_v0 = vld [vmem:[%s5483_s13 + $0xf1] sm:$0xff] }
 0x10b   : > { %v2283_v55 = vadd.f32 %v2267_v25, %v2234_v6  ;;  %v1994_v26 = vadd.f32 %v1978_v37, %v1946_v29  ;;  %v1706_v62 = vadd.f32 %v1690_v4, %v1658_v52  ;;  %v1787_v30 = vmul.f32 %v9144_v56, %v5520_v38  ;;  %v6977_v29 = vld [vmem:[%s5483_s13 + $0x129] sm:$0xff] }
 0x10c   : > { %v2619_v14 = vadd.f32 %v2603_v39, %v2571_v22  ;;  %v2411_v7 = vmul.f32 %v6864_v21, %v5630_v11  ;;  %v2459_v2 = vmul.f32 %v6879_v44, %v5640_v50  ;;  %v2123_v58 = vmul.f32 %v6790_v9, %v5570_v63  ;;  %9177 = vst [vmem:[#allocation16_spill] sm:$0xff] %v6977_v29  ;;  %v4422_v25 = vld [vmem:[%s5483_s13 + $0xf0] sm:$0xff] }
 0x10d   : > { %v2331_v35 = vadd.f32 %v2315_v42, %v2283_v55  ;;  %v2043_v6 = vadd.f32 %v2027_v23, %v1994_v26  ;;  %v1754_v56 = vadd.f32 %v1738_v17, %v1706_v62  ;;  %v1835_v39 = vmul.f32 %v9163_v28, %v5529_v43  ;;  %v9178_v17 = vld [vmem:[#allocation5_spill] sm:$0xff]  ;;  %v4454_v28 = vld [vmem:[%s5483_s13 + $0xf2] sm:$0xff] }
 0x10e   : > { %v2667_v37 = vadd.f32 %v2651_v27, %v2619_v14  ;;  %v2508_v3 = vmul.f32 %v6974_v10, %v5655_v61  ;;  %v2556_v4 = vmul.f32 %v6977_v29, %v5658_v15  ;;  %v2171_v42 = vmul.f32 %v9161_v49, %v8960_v16  ;;  %v4470_v26 = vld [vmem:[%s5483_s13 + $0xf3] sm:$0xff]  ;;  %v9180_v62 = vld [vmem:[#allocation17_spill] sm:$0xff]  ;;  %v9181_v29 = vld [vmem:[#allocation22_spill] sm:$0xff] }
 0x10f   : > { %v2379_v52 = vadd.f32 %v2363_v54, %v2331_v35  ;;  %v2091_v22 = vadd.f32 %v2075_v57, %v2043_v6  ;;  %v1803_v23 = vadd.f32 %v1787_v30, %v1754_v56  ;;  %v1883_v55 = vmul.f32 %v9178_v17, %v5538_v47  ;;  %v4486_v35 = vld [vmem:[%s5483_s13 + $0xf4] sm:$0xff] }
 0x110   : > { %v6993_v27 = vadd.f32 %v2699_v53, %v2667_v37  ;;  %v2219_v14 = vmul.f32 %v9180_v62, %v5596_v18  ;;  %v1931_v10 = vmul.f32 %v9181_v29, %v5546_v51  ;;  %v1547_v49 = vmul.f32 %v4422_v25, %v5486_v19  ;;  %v9182_v53 = vld [vmem:[#allocation38_spill] sm:$0xff] }
 0x111   : > { %v2427_v44 = vadd.f32 %v2411_v7, %v2379_v52  ;;  %v2139_v54 = vadd.f32 %v2123_v58, %v2091_v22  ;;  %v1851_v57 = vadd.f32 %v1835_v39, %v1803_v23  ;;  %v1595_v30 = vmul.f32 %v4438_v0, %v5489_v20  ;;  %v7012_v58 = vld [vmem:[%s5483_s13 + $0x12a] sm:$0xff]  ;;  %v9184_v52 = vld [vmem:[#allocation21_spill] sm:$0xff] }
 0x112   : > { %9179 = vst [vmem:[#allocation39_spill] sm:$0xff] %v6993_v27  ;;  %4834 = vmatmul.mubr.msk.f32.gmra.mxu0 %vm2749_vm0, %v6993_v27  ;;  %v2268_v6 = vmul.f32 %v9182_v53, %v9056_v5  ;;  %v1979_v56 = vmul.f32 %v9165_v41, %v9046_v33  ;;  %v1643_v29 = vmul.f32 %v4454_v28, %v9081_v24  ;;  %9183 = vst [vmem:[#allocation24_spill] sm:$0xff] %v7012_v58  ;;  %v9185_v23 = vld [vmem:[#allocation29_spill] sm:$0xff]  ;;  %v9186_v41 = vld [vmem:[#allocation19_spill] sm:$0xff] }
 0x113   : > { %v1691_v25 = vmul.f32 %v4470_v26, %v9097_v8  ;;  %3012 = vmatprep.mubr.f32.mxu0 %v9095_v48  ;;  %v2475_v7 = vadd.f32 %v2459_v2, %v2427_v44  ;;  %v2187_v39 = vadd.f32 %v2171_v42, %v2139_v54  ;;  %v1899_v37 = vadd.f32 %v1883_v55, %v1851_v57  ;;  %v7022_v53 = vld [vmem:[%s5483_s13 + $0x12b] sm:$0xff] }
 0x114   : > { %v1611_v0 = vadd.f32 %v1595_v30, %v1547_v49  ;;  %v2604_v22 = vmul.f32 %v7012_v58, %v9184_v52  ;;  %v2316_v17 = vmul.f32 %v9185_v23, %v9011_v45  ;;  %v2028_v28 = vmul.f32 %v9186_v41, %v5560_v59  ;;  %9187 = vst [vmem:[#allocation36_spill] sm:$0xff] %v7022_v53  ;;  %v9188_v55 = vld [vmem:[#allocation23_spill] sm:$0xff] }
 0x115   : > { %v1739_v26 = vmul.f32 %v4486_v35, %v5509_v31  ;;  %v2524_v27 = vadd.f32 %v2508_v3, %v2475_v7  ;;  %v2235_v44 = vadd.f32 %v2219_v14, %v2187_v39  ;;  %v1947_v2 = vadd.f32 %v1931_v10, %v1899_v37  ;;  %v7033_v35 = vld [vmem:[%s5483_s13 + $0x12c] sm:$0xff]  ;;  %v7038_v7 = vld [vmem:[%s8571_s1 + $0x18] ss:$0 sm:$0xff] }
 0x116   : > { %v1659_v42 = vadd.f32 %v1643_v29, %v1611_v0  ;;  %v2652_v49 = vmul.f32 %v7022_v53, %v9072_v13  ;;  %v2364_v54 = vmul.f32 %v9188_v55, %v5619_v36  ;;  %v2076_v57 = vmul.f32 %v9173_v32, %v5563_v60  ;;  %9189 = vst [vmem:[#allocation37_spill] sm:$0xff] %v7033_v35 }
 0x117   : > { %v1788_v30 = vmul.f32 %v9158_v12, %v5520_v38  ;;  %v2572_v3 = vadd.f32 %v2556_v4, %v2524_v27  ;;  %v2284_v14 = vadd.f32 %v2268_v6, %v2235_v44  ;;  %v1995_v10 = vadd.f32 %v1979_v56, %v1947_v2  ;;  %v7049_v56 = vld [vmem:[%s5483_s13 + $0x138] sm:$0xff] }
 0x118   : > { %v1707_v29 = vadd.f32 %v1691_v25, %v1659_v42  ;;  %v2700_v39 = vmul.f32 %v7038_v7, %v7033_v35  ;;  %v2412_v37 = vmul.f32 %v6946_v1, %v5630_v11  ;;  %v2124_v12 = vmul.f32 %v9175_v34, %v5570_v63  ;;  %9190 = vst [vmem:[#allocation47_spill] sm:$0xff] %v7049_v56  ;;  %v4423_v44 = vld [vmem:[%s5483_s13 + $0xf8] sm:$0xff] }
 0x119   : > { %v1836_v4 = vmul.f32 %v9160_v40, %v5529_v43  ;;  %v2620_v27 = vadd.f32 %v2604_v22, %v2572_v3  ;;  %v2332_v6 = vadd.f32 %v2316_v17, %v2284_v14  ;;  %v2044_v25 = vadd.f32 %v2028_v28, %v1995_v10  ;;  %v7061_v3 = vld [vmem:[%s5483_s13 + $0x139] sm:$0xff] }
 0x11a   : > { %v1755_v0 = vadd.f32 %v1739_v26, %v1707_v29  ;;  %v2460_v2 = vmul.f32 %v6956_v46, %v5640_v50  ;;  %v2509_v42 = vmul.f32 %v7049_v56, %v5655_v61  ;;  %v2172_v34 = vmul.f32 %v6864_v21, %v8960_v16  ;;  %9191 = vst [vmem:[#allocation42_spill] sm:$0xff] %v7061_v3  ;;  %v4439_v14 = vld [vmem:[%s5483_s13 + $0xf9] sm:$0xff]  ;;  %v9193_v21 = vld [vmem:[#allocation11_spill] sm:$0xff] }
 0x11b   : > { %v1884_v40 = vmul.f32 %v6790_v9, %v5538_v47  ;;  %v2668_v22 = vadd.f32 %v2652_v49, %v2620_v27  ;;  %v2380_v17 = vadd.f32 %v2364_v54, %v2332_v6  ;;  %v2092_v28 = vadd.f32 %v2076_v57, %v2044_v25  ;;  %v4455_v10 = vld [vmem:[%s5483_s13 + $0xfa] sm:$0xff] }
 0x11c   : > { %v1804_v26 = vadd.f32 %v1788_v30, %v1755_v0  ;;  %v2557_v29 = vmul.f32 %v7061_v3, %v5658_v15  ;;  %v9192_v56 = vld [vmem:[#allocation25_spill] sm:$0xff]  ;;  %v1932_v1 = vmul.f32 %v9193_v21, %v5546_v51  ;;  %v1548_v9 = vmul.f32 %v4423_v44, %v5486_v19  ;;  %v9195_v0 = vld [vmem:[#allocation10_spill] sm:$0xff] }
 0x11d   : > { %v2220_v46 = vmul.f32 %v9192_v56, %v5596_v18  ;;  %v7072_v49 = vadd.f32 %v2700_v39, %v2668_v22  ;;  %v2428_v54 = vadd.f32 %v2412_v37, %v2380_v17  ;;  %v7075_v57 = vld [vmem:[%s5483_s13 + $0x13a] sm:$0xff]  ;;  %v2140_v30 = vadd.f32 %v2124_v12, %v2092_v28 }
 0x11e   : > { %v1852_v27 = vadd.f32 %v1836_v4, %v1804_v26  ;;  %v4471_v6 = vld [vmem:[%s5483_s13 + $0xfb] sm:$0xff]  ;;  %v2605_v25 = vmul.f32 %v7075_v57, %v9184_v52  ;;  %v2269_v3 = vmul.f32 %v9195_v0, %v9056_v5  ;;  %v1596_v21 = vmul.f32 %v4439_v14, %v5489_v20 }
 0x11f   : > { %9194 = vst [vmem:[#allocation44_spill] sm:$0xff] %v7072_v49  ;;  %v1644_v44 = vmul.f32 %v4455_v10, %v9081_v24  ;;  %4835 = vmatmul.mubr.msk.f32.gmra.mxu0 %vm2749_vm0, %v7072_v49  ;;  %v2476_v39 = vadd.f32 %v2460_v2, %v2428_v54  ;;  %v7087_v37 = vld [vmem:[%s5483_s13 + $0x13b] sm:$0xff]  ;;  %v2188_v12 = vadd.f32 %v2172_v34, %v2140_v30  ;;  %v9199_v30 = vld [vmem:[#allocation38_spill] sm:$0xff] }
 0x120   : > { %9196 = vst [vmem:[#allocation15_spill] sm:$0xff] %v7087_v37  ;;  %v1900_v4 = vadd.f32 %v1884_v40, %v1852_v27  ;;  %v1980_v22 = vmul.f32 %v9180_v62, %v9046_v33  ;;  %v4487_v17 = vld [vmem:[%s5483_s13 + $0xfc] sm:$0xff]  ;;  %3018 = vmatprep.mubr.f32.mxu0 %v9095_v48  ;;  %v2653_v28 = vmul.f32 %v7087_v37, %v9072_v13 }
 0x121   : > { %v9197_v26 = vld [vmem:[#allocation16_spill] sm:$0xff]  ;;  %v1612_v10 = vadd.f32 %v1596_v21, %v1548_v9  ;;  %v1692_v49 = vmul.f32 %v4471_v6, %v9097_v8  ;;  %v2525_v2 = vadd.f32 %v2509_v42, %v2476_v39  ;;  %v2236_v34 = vadd.f32 %v2220_v46, %v2188_v12 }
 0x122   : > { %v2317_v14 = vmul.f32 %v9197_v26, %v9011_v45  ;;  %v7099_v54 = vld [vmem:[%s5483_s13 + $0x13c] sm:$0xff]  ;;  %v1948_v40 = vadd.f32 %v1932_v1, %v1900_v4  ;;  %v2029_v62 = vmul.f32 %v9199_v30, %v5560_v59  ;;  %v2365_v37 = vmul.f32 %v7012_v58, %v5619_v36 }
 0x123   : > { %9198 = vst [vmem:[#allocation20_spill] sm:$0xff] %v7099_v54  ;;  %v2701_v27 = vmul.f32 %v7038_v7, %v7099_v54  ;;  %v1660_v26 = vadd.f32 %v1644_v44, %v1612_v10  ;;  %v1740_v9 = vmul.f32 %v4487_v17, %v5509_v31  ;;  %v2573_v6 = vadd.f32 %v2557_v29, %v2525_v2 }
 0x124   : > { %v2285_v42 = vadd.f32 %v2269_v3, %v2236_v34  ;;  %v1996_v21 = vadd.f32 %v1980_v22, %v1948_v40  ;;  %v2077_v46 = vmul.f32 %v9185_v23, %v5563_v60  ;;  %v2413_v1 = vmul.f32 %v7022_v53, %v5630_v11  ;;  %v7117_v3 = vld [vmem:[%s5483_s13 + $0x140] sm:$0xff] }
 0x125   : > { %v2461_v39 = vmul.f32 %v7033_v35, %v5640_v50  ;;  %v1708_v12 = vadd.f32 %v1692_v49, %v1660_v26  ;;  %v1789_v44 = vmul.f32 %v9186_v41, %v5520_v38  ;;  %v2621_v4 = vadd.f32 %v2605_v25, %v2573_v6  ;;  %9200 = vst [vmem:[#allocation34_spill] sm:$0xff] %v7117_v3  ;;  %v7120_v22 = vld [vmem:[%s5483_s13 + $0x141] sm:$0xff] }
 0x126   : > { %v2333_v29 = vadd.f32 %v2317_v14, %v2285_v42  ;;  %9201 = vst [vmem:[#allocation26_spill] sm:$0xff] %v7120_v22  ;;  %v2045_v17 = vadd.f32 %v2029_v62, %v1996_v21  ;;  %v2125_v10 = vmul.f32 %v9188_v55, %v5570_v63  ;;  %v2510_v2 = vmul.f32 %v7117_v3, %v5655_v61  ;;  %v4424_v25 = vld [vmem:[%s5483_s13 + $0x108] sm:$0xff]  ;;  %v9203_v6 = vld [vmem:[#allocation9_spill] sm:$0xff]  ;;  %v9205_v55 = vld [vmem:[#allocation31_spill] sm:$0xff] }
 0x127   : > { %v2558_v49 = vmul.f32 %v7120_v22, %v5658_v15  ;;  %v1756_v26 = vadd.f32 %v1740_v9, %v1708_v12  ;;  %v1837_v41 = vmul.f32 %v9173_v32, %v5529_v43  ;;  %v2669_v14 = vadd.f32 %v2653_v28, %v2621_v4  ;;  %v7132_v40 = vld [vmem:[%s5483_s13 + $0x142] sm:$0xff]  ;;  %v4456_v3 = vld [vmem:[%s5483_s13 + $0x10a] sm:$0xff]  ;;  %v9204_v9 = vld [vmem:[#allocation12_spill] sm:$0xff] }
 0x128   : > { %v2381_v34 = vadd.f32 %v2365_v37, %v2333_v29  ;;  %9202 = vst [vmem:[#allocation5_spill] sm:$0xff] %v7132_v40  ;;  %v2093_v62 = vadd.f32 %v2077_v46, %v2045_v17  ;;  %v2173_v42 = vmul.f32 %v9203_v6, %v8960_v16  ;;  %v4440_v21 = vld [vmem:[%s5483_s13 + $0x109] sm:$0xff]  ;;  %v2606_v22 = vmul.f32 %v7132_v40, %v9184_v52  ;;  %v9208_v40 = vld [vmem:[#allocation33_spill] sm:$0xff] }
 0x129   : > { %v2221_v12 = vmul.f32 %v9204_v9, %v5596_v18  ;;  %v1805_v32 = vadd.f32 %v1789_v44, %v1756_v26  ;;  %v1885_v28 = vmul.f32 %v9205_v55, %v5538_v47  ;;  %v7144_v37 = vadd.f32 %v2701_v27, %v2669_v14  ;;  %v4472_v17 = vld [vmem:[%s5483_s13 + $0x10b] sm:$0xff]  ;;  %v7149_v6 = vld [vmem:[%s5483_s13 + $0x143] sm:$0xff] }
 0x12a   : > { %v2429_v4 = vadd.f32 %v2413_v1, %v2381_v34  ;;  %v2141_v46 = vadd.f32 %v2125_v10, %v2093_v62  ;;  %v1549_v29 = vmul.f32 %v4424_v25, %v5486_v19  ;;  %9207 = vst [vmem:[#allocation22_spill] sm:$0xff] %v7149_v6  ;;  %v1933_v52 = vmul.f32 %v9208_v40, %v5546_v51  ;;  %v9209_v10 = vld [vmem:[#allocation47_spill] sm:$0xff] }
 0x12b   : > { %9206 = vst [vmem:[#allocation17_spill] sm:$0xff] %v7144_v37  ;;  %v1853_v35 = vadd.f32 %v1837_v41, %v1805_v32  ;;  %v1597_v44 = vmul.f32 %v4440_v21, %v5489_v20  ;;  %v1645_v26 = vmul.f32 %v4456_v3, %v9081_v24  ;;  %4836 = vmatmul.mubr.msk.f32.gmra.mxu0 %vm2749_vm0, %v7144_v37  ;;  %v4488_v14 = vld [vmem:[%s5483_s13 + $0x10c] sm:$0xff]  ;;  %v7164_v41 = vld [vmem:[%s5483_s13 + $0x144] sm:$0xff] }
 0x12c   : > { %v2477_v55 = vadd.f32 %v2461_v39, %v2429_v4  ;;  %v2654_v27 = vmul.f32 %v7149_v6, %v9072_v13  ;;  %v2189_v1 = vadd.f32 %v2173_v42, %v2141_v46  ;;  %v2270_v25 = vmul.f32 %v9209_v10, %v9056_v5  ;;  %3024 = vmatprep.mubr.f32.mxu0 %v9095_v48  ;;  %v9211_v32 = vld [vmem:[#allocation42_spill] sm:$0xff] }
 0x12d   : > { %9210 = vst [vmem:[#allocation29_spill] sm:$0xff] %v7164_v41  ;;  %v1901_v34 = vadd.f32 %v1885_v28, %v1853_v35  ;;  %v1981_v3 = vmul.f32 %v9192_v56, %v9046_v33  ;;  %v1613_v40 = vadd.f32 %v1597_v44, %v1549_v29  ;;  %v1693_v39 = vmul.f32 %v4472_v17, %v9097_v8  ;;  %v9212_v17 = vld [vmem:[#allocation15_spill] sm:$0xff] }
 0x12e   : > { %v2526_v62 = vadd.f32 %v2510_v2, %v2477_v55  ;;  %v2702_v42 = vmul.f32 %v7038_v7, %v7164_v41  ;;  %v2237_v21 = vadd.f32 %v2221_v12, %v2189_v1  ;;  %v2318_v4 = vmul.f32 %v9211_v32, %v9011_v45  ;;  %v7181_v44 = vld [vmem:[%s5483_s13 + $0x150] sm:$0xff] }
 0x12f   : > { %v1949_v46 = vadd.f32 %v1933_v52, %v1901_v34  ;;  %v2030_v37 = vmul.f32 %v9195_v0, %v5560_v59  ;;  %v1661_v35 = vadd.f32 %v1645_v26, %v1613_v40  ;;  %v1741_v28 = vmul.f32 %v4488_v14, %v5509_v31  ;;  %9213 = vst [vmem:[#allocation19_spill] sm:$0xff] %v7181_v44  ;;  %v9214_v52 = vld [vmem:[#allocation16_spill] sm:$0xff] }
 0x130   : > { %v2574_v56 = vadd.f32 %v2558_v49, %v2526_v62  ;;  %v2286_v29 = vadd.f32 %v2270_v25, %v2237_v21  ;;  %v2366_v2 = vmul.f32 %v7075_v57, %v5619_v36  ;;  %v2414_v12 = vmul.f32 %v9212_v17, %v5630_v11  ;;  %v7192_v62 = vld [vmem:[%s5483_s13 + $0x151] sm:$0xff] }
 0x131   : > { %v1997_v55 = vadd.f32 %v1981_v3, %v1949_v46  ;;  %v2078_v1 = vmul.f32 %v9214_v52, %v5563_v60  ;;  %v1709_v34 = vadd.f32 %v1693_v39, %v1661_v35  ;;  %v1790_v26 = vmul.f32 %v9199_v30, %v5520_v38  ;;  %9215 = vst [vmem:[#allocation25_spill] sm:$0xff] %v7192_v62  ;;  %v4425_v30 = vld [vmem:[%s5483_s13 + $0x110] sm:$0xff] }
 0x132   : > { %v2622_v49 = vadd.f32 %v2606_v22, %v2574_v56  ;;  %v2334_v25 = vadd.f32 %v2318_v4, %v2286_v29  ;;  %v2462_v14 = vmul.f32 %v7099_v54, %v5640_v50  ;;  %v2511_v40 = vmul.f32 %v7181_v44, %v5655_v61  ;;  %v4441_v29 = vld [vmem:[%s5483_s13 + $0x111] sm:$0xff]  ;;  %v9216_v44 = vld [vmem:[#allocation37_spill] sm:$0xff] }
 0x133   : > { %v2046_v3 = vadd.f32 %v2030_v37, %v1997_v55  ;;  %v2126_v21 = vmul.f32 %v7012_v58, %v5570_v63  ;;  %v1757_v39 = vadd.f32 %v1741_v28, %v1709_v34  ;;  %v1838_v46 = vmul.f32 %v9185_v23, %v5529_v43  ;;  %v4457_v37 = vld [vmem:[%s5483_s13 + $0x112] sm:$0xff] }
 0x134   : > { %v2670_v22 = vadd.f32 %v2654_v27, %v2622_v49  ;;  %v2382_v4 = vadd.f32 %v2366_v2, %v2334_v25  ;;  %v2559_v35 = vmul.f32 %v7192_v62, %v5658_v15  ;;  %v2174_v56 = vmul.f32 %v7022_v53, %v8960_v16  ;;  %v9217_v23 = vld [vmem:[#allocation23_spill] sm:$0xff]  ;;  %v9219_v2 = vld [vmem:[#allocation9_spill] sm:$0xff] }
 0x135   : > { %v2094_v55 = vadd.f32 %v2078_v1, %v2046_v3  ;;  %v2222_v28 = vmul.f32 %v9216_v44, %v5596_v18  ;;  %v1806_v34 = vadd.f32 %v1790_v26, %v1757_v39  ;;  %v1886_v54 = vmul.f32 %v9217_v23, %v5538_v47  ;;  %v4473_v62 = vld [vmem:[%s5483_s13 + $0x113] sm:$0xff] }
 0x136   : > { %v7209_v58 = vadd.f32 %v2702_v42, %v2670_v22  ;;  %v2430_v27 = vadd.f32 %v2414_v12, %v2382_v4  ;;  %v1934_v49 = vmul.f32 %v9219_v2, %v5546_v51  ;;  %v1550_v25 = vmul.f32 %v4425_v30, %v5486_v19  ;;  %v7216_v53 = vld [vmem:[%s5483_s13 + $0x152] sm:$0xff]  ;;  %v9221_v12 = vld [vmem:[#allocation21_spill] sm:$0xff]  ;;  %v9222_v4 = vld [vmem:[#allocation34_spill] sm:$0xff] }
 0x137   : > { %9220 = vst [vmem:[#allocation10_spill] sm:$0xff] %v7216_v53  ;;  %v2142_v1 = vadd.f32 %v2126_v21, %v2094_v55  ;;  %v1854_v3 = vadd.f32 %v1838_v46, %v1806_v34  ;;  %v1598_v26 = vmul.f32 %v4441_v29, %v5489_v20  ;;  %v1646_v39 = vmul.f32 %v4457_v37, %v9081_v24  ;;  %v4489_v21 = vld [vmem:[%s5483_s13 + $0x114] sm:$0xff]  ;;  %v9224_v2 = vld [vmem:[#allocation26_spill] sm:$0xff] }
 0x138   : > { %9218 = vst [vmem:[#allocation11_spill] sm:$0xff] %v7209_v58  ;;  %4837 = vmatmul.mubr.msk.f32.gmra.mxu0 %vm2749_vm0, %v7209_v58  ;;  %v2478_v42 = vadd.f32 %v2462_v14, %v2430_v27  ;;  %v2607_v22 = vmul.f32 %v7216_v53, %v9221_v12  ;;  %v2271_v30 = vmul.f32 %v9222_v4, %v9056_v5  ;;  %v7231_v46 = vld [vmem:[%s5483_s13 + $0x153] sm:$0xff] }
 0x139   : > { %v1982_v23 = vmul.f32 %v9204_v9, %v9046_v33  ;;  %3030 = vmatprep.mubr.f32.mxu0 %v9095_v48  ;;  %9223 = vst [vmem:[#allocation38_spill] sm:$0xff] %v7231_v46  ;;  %v2190_v29 = vadd.f32 %v2174_v56, %v2142_v1  ;;  %v1902_v37 = vadd.f32 %v1886_v54, %v1854_v3  ;;  %v7241_v53 = vld [vmem:[%s5483_s13 + $0x154] sm:$0xff] }
 0x13a   : > { %v1614_v55 = vadd.f32 %v1598_v26, %v1550_v25  ;;  %v1694_v34 = vmul.f32 %v4473_v62, %v9097_v8  ;;  %v2527_v14 = vadd.f32 %v2511_v40, %v2478_v42  ;;  %v2655_v27 = vmul.f32 %v7231_v46, %v9072_v13  ;;  %9225 = vst [vmem:[#allocation12_spill] sm:$0xff] %v7241_v53  ;;  %v9226_v25 = vld [vmem:[#allocation5_spill] sm:$0xff] }
 0x13b   : > { %v2319_v58 = vmul.f32 %v9224_v2, %v9011_v45  ;;  %v2031_v9 = vmul.f32 %v9209_v10, %v5560_v59  ;;  %v2238_v4 = vadd.f32 %v2222_v28, %v2190_v29  ;;  %v1950_v12 = vadd.f32 %v1934_v49, %v1902_v37 }
 0x13c   : > { %v1662_v56 = vadd.f32 %v1646_v39, %v1614_v55  ;;  %v1742_v54 = vmul.f32 %v4489_v21, %v5509_v31  ;;  %v2575_v62 = vadd.f32 %v2559_v35, %v2527_v14  ;;  %v2703_v40 = vmul.f32 %v7038_v7, %v7241_v53  ;;  %v7259_v55 = vld [vmem:[%s5483_s13 + $0x158] sm:$0xff] }
 0x13d   : > { %v2367_v1 = vmul.f32 %v9226_v25, %v5619_v36  ;;  %v2079_v3 = vmul.f32 %v9211_v32, %v5563_v60  ;;  %v2287_v26 = vadd.f32 %v2271_v30, %v2238_v4  ;;  %v1998_v42 = vadd.f32 %v1982_v23, %v1950_v12  ;;  %9227 = vst [vmem:[#allocation31_spill] sm:$0xff] %v7259_v55  ;;  %v7262_v12 = vld [vmem:[%s5483_s13 + $0x159] sm:$0xff] }
 0x13e   : > { %v1710_v28 = vadd.f32 %v1694_v34, %v1662_v56  ;;  %v1791_v49 = vmul.f32 %v9195_v0, %v5520_v38  ;;  %v2623_v39 = vadd.f32 %v2607_v22, %v2575_v62  ;;  %v2415_v35 = vmul.f32 %v7149_v6, %v5630_v11  ;;  %9228 = vst [vmem:[#allocation33_spill] sm:$0xff] %v7262_v12  ;;  %v4426_v30 = vld [vmem:[%s5483_s13 + $0x120] sm:$0xff] }
 0x13f   : > { %v2463_v21 = vmul.f32 %v7164_v41, %v5640_v50  ;;  %v2127_v29 = vmul.f32 %v7075_v57, %v5570_v63  ;;  %v2335_v37 = vadd.f32 %v2319_v58, %v2287_v26  ;;  %v2047_v4 = vadd.f32 %v2031_v9, %v1998_v42  ;;  %v4442_v56 = vld [vmem:[%s5483_s13 + $0x121] sm:$0xff] }
 0x140   : > { %v1758_v0 = vadd.f32 %v1742_v54, %v1710_v28  ;;  %v1839_v22 = vmul.f32 %v9214_v52, %v5529_v43  ;;  %v2671_v23 = vadd.f32 %v2655_v27, %v2623_v39  ;;  %v2512_v34 = vmul.f32 %v7259_v55, %v5655_v61  ;;  %v9229_v54 = vld [vmem:[#allocation24_spill] sm:$0xff]  ;;  %v4458_v52 = vld [vmem:[%s5483_s13 + $0x122] sm:$0xff] }
 0x141   : > { %v2560_v14 = vmul.f32 %v7262_v12, %v5658_v15  ;;  %v2175_v58 = vmul.f32 %v9212_v17, %v8960_v16  ;;  %v2383_v62 = vadd.f32 %v2367_v1, %v2335_v37  ;;  %v2095_v26 = vadd.f32 %v2079_v3, %v2047_v4  ;;  %v4474_v28 = vld [vmem:[%s5483_s13 + $0x123] sm:$0xff]  ;;  %v9231_v39 = vld [vmem:[#allocation20_spill] sm:$0xff] }
 0x142   : > { %v1807_v9 = vadd.f32 %v1791_v49, %v1758_v0  ;;  %v1887_v42 = vmul.f32 %v9229_v54, %v5538_v47  ;;  %v7278_v27 = vadd.f32 %v2703_v40, %v2671_v23  ;;  %v2223_v55 = vmul.f32 %v9231_v39, %v5596_v18  ;;  %v9232_v12 = vld [vmem:[#allocation36_spill] sm:$0xff]  ;;  %v4490_v37 = vld [vmem:[%s5483_s13 + $0x124] sm:$0xff]  ;;  %v9233_v40 = vld [vmem:[#allocation19_spill] sm:$0xff] }
 0x143   : > { %v1935_v41 = vmul.f32 %v9232_v12, %v5546_v51  ;;  %v1551_v17 = vmul.f32 %v4426_v30, %v5486_v19  ;;  %v2431_v15 = vadd.f32 %v2415_v35, %v2383_v62  ;;  %v2143_v1 = vadd.f32 %v2127_v29, %v2095_v26  ;;  %v7297_v29 = vld [vmem:[%s5483_s13 + $0x15a] sm:$0xff] }
 0x144   : > { %9230 = vst [vmem:[#allocation47_spill] sm:$0xff] %v7278_v27  ;;  %v1855_v3 = vadd.f32 %v1839_v22, %v1807_v9  ;;  %v1599_v49 = vmul.f32 %v4442_v56, %v5489_v20  ;;  %4838 = vmatmul.mubr.msk.f32.gmra.mxu0 %vm2749_vm0, %v7278_v27  ;;  %v2272_v4 = vmul.f32 %v9233_v40, %v9056_v5  ;;  %v9234_v62 = vld [vmem:[#allocation21_spill] sm:$0xff] }
 0x145   : > { %v1983_v0 = vmul.f32 %v9216_v44, %v9046_v33  ;;  %v1647_v12 = vmul.f32 %v4458_v52, %v9081_v24  ;;  %v1695_v30 = vmul.f32 %v4474_v28, %v9097_v8  ;;  %3036 = vmatprep.mubr.f32.mxu0 %v9095_v48  ;;  %v2479_v35 = vadd.f32 %v2463_v21, %v2431_v15  ;;  %v9235_v9 = vld [vmem:[#allocation25_spill] sm:$0xff]  ;;  %v9236_v44 = vld [vmem:[#allocation34_spill] sm:$0xff] }
 0x146   : > { %v2191_v22 = vadd.f32 %v2175_v58, %v2143_v1  ;;  %v1903_v23 = vadd.f32 %v1887_v42, %v1855_v3  ;;  %v1615_v56 = vadd.f32 %v1599_v49, %v1551_v17  ;;  %v2608_v26 = vmul.f32 %v7297_v29, %v9234_v62  ;;  %v7307_v40 = vld [vmem:[%s5483_s13 + $0x15b] sm:$0xff]  ;;  %v9238_v42 = vld [vmem:[#allocation10_spill] sm:$0xff] }
 0x147   : > { %v2320_v54 = vmul.f32 %v9235_v9, %v9011_v45  ;;  %v2032_v52 = vmul.f32 %v9236_v44, %v5560_v59  ;;  %v1743_v28 = vmul.f32 %v4490_v37, %v5509_v31  ;;  %v2528_v27 = vadd.f32 %v2512_v34, %v2479_v35  ;;  %9237 = vst [vmem:[#allocation42_spill] sm:$0xff] %v7307_v40  ;;  %v7318_v37 = vld [vmem:[%s5483_s13 + $0x15c] sm:$0xff] }
 0x148   : > { %v2239_v15 = vadd.f32 %v2223_v55, %v2191_v22  ;;  %v1951_v21 = vadd.f32 %v1935_v41, %v1903_v23  ;;  %v1663_v58 = vadd.f32 %v1647_v12, %v1615_v56  ;;  %v2656_v17 = vmul.f32 %v7307_v40, %v9072_v13  ;;  %9239 = vst [vmem:[#allocation16_spill] sm:$0xff] %v7318_v37 }
 0x149   : > { %v2368_v1 = vmul.f32 %v9238_v42, %v5619_v36  ;;  %v2080_v3 = vmul.f32 %v9224_v2, %v5563_v60  ;;  %v1792_v49 = vmul.f32 %v9209_v10, %v5520_v38  ;;  %v2576_v34 = vadd.f32 %v2560_v14, %v2528_v27  ;;  %v4427_v10 = vld [vmem:[%s5483_s13 + $0x128] sm:$0xff] }
 0x14a   : > { %v2288_v55 = vadd.f32 %v2272_v4, %v2239_v15  ;;  %v1999_v35 = vadd.f32 %v1983_v0, %v1951_v21  ;;  %v1711_v41 = vadd.f32 %v1695_v30, %v1663_v58  ;;  %v2704_v12 = vmul.f32 %v7038_v7, %v7318_v37  ;;  %v7330_v4 = vld [vmem:[%s5483_s13 + $0x168] sm:$0xff]  ;;  %v7335_v15 = vld [vmem:[%s8573_s3 + $0x78] sm:$0xff]  ;;  %v7340_v21 = vld [vmem:[%s8573_s3 + $0x70] sm:$0xff] }
 0x14b   : > { %v2416_v22 = vmul.f32 %v7231_v46, %v5630_v11  ;;  %v2128_v23 = vmul.f32 %v9226_v25, %v5570_v63  ;;  %v1840_v56 = vmul.f32 %v9211_v32, %v5529_v43  ;;  %v2624_v14 = vadd.f32 %v2608_v26, %v2576_v34  ;;  %9240 = vst [vmem:[#allocation37_spill] sm:$0xff] %v7330_v4  ;;  %v4459_v25 = vld [vmem:[%s5483_s13 + $0x12a] sm:$0xff] }
 0x14c   : > { %v2336_v27 = vadd.f32 %v2320_v54, %v2288_v55  ;;  %v2048_v0 = vadd.f32 %v2032_v52, %v1999_v35  ;;  %v1759_v30 = vadd.f32 %v1743_v28, %v1711_v41  ;;  %9241 = vst [vmem:[#allocation23_spill] sm:$0xff] %v7335_v15  ;;  %9242 = vst [vmem:[#allocation9_spill] sm:$0xff] %v7340_v21  ;;  %v7347_v54 = vld [vmem:[%s5483_s13 + $0x169] sm:$0xff]  ;;  %3681 = vmatpush1.msra.mxu0 %v7335_v15  ;;  %v9246_v15 = vld [vmem:[#allocation29_spill] sm:$0xff] }
 0x14d   : > { %v2464_v32 = vmul.f32 %v7241_v53, %v5640_v50  ;;  %v2513_v26 = vmul.f32 %v7330_v4, %v5655_v61  ;;  %9243 = vst [vmem:[#allocation26_spill] sm:$0xff] %v7347_v54  ;;  %v2176_v52 = vmul.f32 %v7149_v6, %v8960_v16  ;;  %v1888_v28 = vmul.f32 %v7075_v57, %v5538_v47  ;;  %v4443_v41 = vld [vmem:[%s5483_s13 + $0x129] sm:$0xff] }
 0x14e   : > { %v2672_v58 = vadd.f32 %v2656_v17, %v2624_v14  ;;  %v2384_v34 = vadd.f32 %v2368_v1, %v2336_v27  ;;  %v2096_v55 = vadd.f32 %v2080_v3, %v2048_v0  ;;  %v1808_v35 = vadd.f32 %v1792_v49, %v1759_v30  ;;  %3682 = vmatprep.subr.mxu0 %v9095_v48  ;;  %v7360_v4 = vld [vmem:[%s8573_s3 + $0x68] sm:$0xff]  ;;  %v9247_v17 = vld [vmem:[#allocation15_spill] sm:$0xff] }
 0x14f   : > { %9244 = vst [vmem:[#allocation24_spill] sm:$0xff] %v7360_v4  ;;  %v9245_v6 = vld [vmem:[#allocation18_spill] sm:$0xff]  ;;  %v2224_v47 = vmul.f32 %v9246_v15, %v5596_v18  ;;  %v1936_v1 = vmul.f32 %v9247_v17, %v5546_v51  ;;  %v1552_v3 = vmul.f32 %v4427_v10, %v5486_v19  ;;  %3683 = vmatpush1.msra.mxu0 %v7340_v21  ;;  %v9249_v17 = vld [vmem:[#allocation31_spill] sm:$0xff]  ;;  %v7412_v21 = vld [vmem:[%s8573_s3 + $0x58] sm:$0xff] }
 0x150   : > { %v2561_v57 = vmul.f32 %v7347_v54, %v9245_v6  ;;  %v7370_v49 = vadd.f32 %v2704_v12, %v2672_v58  ;;  %v2432_v14 = vadd.f32 %v2416_v22, %v2384_v34  ;;  %v7373_v27 = vld [vmem:[%s5483_s13 + $0x16a] sm:$0xff]  ;;  %v2144_v0 = vadd.f32 %v2128_v23, %v2096_v55  ;;  %3684 = vmatprep.subr.mxu0 %v9095_v48 }
 0x151   : > { %v1856_v30 = vadd.f32 %v1840_v56, %v1808_v35  ;;  %v4475_v54 = vld [vmem:[%s5483_s13 + $0x12b] sm:$0xff]  ;;  %v2609_v15 = vmul.f32 %v7373_v27, %v9234_v62  ;;  %v2273_v10 = vmul.f32 %v9249_v17, %v9056_v5  ;;  %v1600_v51 = vmul.f32 %v4443_v41, %v5489_v20  ;;  %3685 = vmatpush1.msra.mxu0 %v7360_v4  ;;  %v7395_v35 = vld [vmem:[%s8573_s3 + $0x60] sm:$0xff] }
 0x152   : > { %9248 = vst [vmem:[#allocation20_spill] sm:$0xff] %v7370_v49  ;;  %v1648_v12 = vmul.f32 %v4459_v25, %v9081_v24  ;;  %4839 = vmatmul.mubr.msk.f32.gmra.mxu0 %vm2749_vm0, %v7370_v49  ;;  %v2480_v22 = vadd.f32 %v2464_v32, %v2432_v14  ;;  %v7387_v23 = vld [vmem:[%s5483_s13 + $0x16b] sm:$0xff]  ;;  %v2192_v56 = vadd.f32 %v2176_v52, %v2144_v0  ;;  %9250 = vst [vmem:[#allocation36_spill] sm:$0xff] %v7395_v35  ;;  %v9251_v32 = vld [vmem:[#allocation33_spill] sm:$0xff] }
 0x153   : > { %v1904_v58 = vadd.f32 %v1888_v28, %v1856_v30  ;;  %v1984_v34 = vmul.f32 %v9231_v39, %v9046_v33  ;;  %v4491_v55 = vld [vmem:[%s5483_s13 + $0x12c] sm:$0xff]  ;;  %3042 = vmatprep.mubr.f32.mxu0 %v9095_v48  ;;  %v2657_v25 = vmul.f32 %v7387_v23, %v9072_v13  ;;  %v2321_v41 = vmul.f32 %v9251_v32, %v9011_v45 }
 0x154   : > { %v1616_v14 = vadd.f32 %v1600_v51, %v1552_v3  ;;  %v1696_v52 = vmul.f32 %v4475_v54, %v9097_v8  ;;  %v2529_v28 = vadd.f32 %v2513_v26, %v2480_v22  ;;  %v7404_v0 = vld [vmem:[%s5483_s13 + $0x16c] sm:$0xff]  ;;  %v2240_v39 = vadd.f32 %v2224_v47, %v2192_v56  ;;  %3686 = vmatprep.subr.mxu0 %v9095_v48 }
 0x155   : > { %v1952_v30 = vadd.f32 %v1936_v1, %v1904_v58  ;;  %v9252_v49 = vld [vmem:[#allocation19_spill] sm:$0xff]  ;;  %9253 = vst [vmem:[#allocation25_spill] sm:$0xff] %v7412_v21  ;;  %v2705_v51 = vmul.f32 %v7038_v7, %v7404_v0  ;;  %v2369_v26 = vmul.f32 %v7297_v29, %v5619_v36  ;;  %v1744_v47 = vmul.f32 %v4491_v55, %v5509_v31 }
 0x156   : > { %v2033_v4 = vmul.f32 %v9252_v49, %v5560_v59  ;;  %v1664_v54 = vadd.f32 %v1648_v12, %v1616_v14  ;;  %3687 = vmatpush1.msra.mxu0 %v7395_v35  ;;  %v2577_v1 = vadd.f32 %v2561_v57, %v2529_v28  ;;  %v2289_v3 = vadd.f32 %v2273_v10, %v2240_v39  ;;  %v7426_v58 = vld [vmem:[%s8573_s3 + $0x50] sm:$0xff] }
 0x157   : > { %v2000_v22 = vadd.f32 %v1984_v34, %v1952_v30  ;;  %v2081_v56 = vmul.f32 %v9235_v9, %v5563_v60  ;;  %3688 = vmatprep.subr.mxu0 %v9095_v48  ;;  %9254 = vst [vmem:[#allocation34_spill] sm:$0xff] %v7426_v58  ;;  %v2417_v12 = vmul.f32 %v7307_v40, %v5630_v11  ;;  %v7436_v28 = vld [vmem:[%s5483_s13 + $0x170] sm:$0xff] }
 0x158   : > { %v2465_v55 = vmul.f32 %v7318_v37, %v5640_v50  ;;  %v1712_v57 = vadd.f32 %v1696_v52, %v1664_v54  ;;  %v1793_v10 = vmul.f32 %v9236_v44, %v5520_v38  ;;  %3689 = vmatpush1.msra.mxu0 %v7412_v21  ;;  %v2625_v34 = vadd.f32 %v2609_v15, %v2577_v1  ;;  %v7439_v39 = vld [vmem:[%s5483_s13 + $0x171] sm:$0xff]  ;;  %v7447_v44 = vld [vmem:[%s8573_s3 + $0x48] sm:$0xff]  ;;  %v4460_v37 = vld [vmem:[%s5483_s13 + $0x13a] sm:$0xff] }
 0x159   : > { %v2337_v14 = vadd.f32 %v2321_v41, %v2289_v3  ;;  %9255 = vst [vmem:[#allocation18_spill] sm:$0xff] %v7436_v28  ;;  %9256 = vst [vmem:[#allocation15_spill] sm:$0xff] %v7439_v39  ;;  %v2049_v30 = vadd.f32 %v2033_v4, %v2000_v22  ;;  %v2129_v35 = vmul.f32 %v9238_v42, %v5570_v63  ;;  %3690 = vmatprep.subr.mxu0 %v9095_v48  ;;  %v7454_v52 = vld [vmem:[%s5483_s13 + $0x172] sm:$0xff] }
 0x15a   : > { %9257 = vst [vmem:[#allocation31_spill] sm:$0xff] %v7447_v44  ;;  %v2514_v15 = vmul.f32 %v7436_v28, %v5655_v61  ;;  %v2562_v41 = vmul.f32 %v7439_v39, %v9245_v6  ;;  %9258 = vst [vmem:[#allocation33_spill] sm:$0xff] %v7454_v52  ;;  %v1760_v4 = vadd.f32 %v1744_v47, %v1712_v57  ;;  %v4428_v1 = vld [vmem:[%s5483_s13 + $0x138] sm:$0xff]  ;;  %3691 = vmatpush1.msra.mxu0 %v7426_v58  ;;  %v7468_v47 = vld [vmem:[%s8573_s3 + $0x40] sm:$0xff] }
 0x15b   : > { %v1841_v54 = vmul.f32 %v9224_v2, %v5529_v43  ;;  %v2673_v3 = vadd.f32 %v2657_v25, %v2625_v34  ;;  %v2385_v22 = vadd.f32 %v2369_v26, %v2337_v14  ;;  %v2097_v21 = vadd.f32 %v2081_v56, %v2049_v30  ;;  %v4444_v28 = vld [vmem:[%s5483_s13 + $0x139] sm:$0xff]  ;;  %3692 = vmatprep.subr.mxu0 %v9095_v48  ;;  %v9260_v56 = vld [vmem:[#allocation7_spill] sm:$0xff] }
 0x15c   : > { %v2177_v42 = vmul.f32 %v7231_v46, %v8960_v16  ;;  %9259 = vst [vmem:[#allocation19_spill] sm:$0xff] %v7468_v47  ;;  %v2610_v2 = vmul.f32 %v7454_v52, %v9234_v62  ;;  %v2225_v25 = vmul.f32 %v7241_v53, %v5596_v18  ;;  %v1809_v26 = vadd.f32 %v1793_v10, %v1760_v4  ;;  %v9261_v57 = vld [vmem:[#allocation5_spill] sm:$0xff]  ;;  %v7483_v52 = vld [vmem:[%s5483_s13 + $0x173] sm:$0xff]  ;;  %v9265_v4 = vld [vmem:[#allocation22_spill] sm:$0xff] }
 0x15d   : > { %v1889_v34 = vmul.f32 %v9261_v57, %v9260_v56  ;;  %3693 = vmatpush1.msra.mxu0 %v7447_v44  ;;  %v7477_v14 = vadd.f32 %v2705_v51, %v2673_v3  ;;  %v2433_v30 = vadd.f32 %v2417_v12, %v2385_v22  ;;  %v2145_v58 = vadd.f32 %v2129_v35, %v2097_v21  ;;  %v4476_v46 = vld [vmem:[%s5483_s13 + $0x13b] sm:$0xff]  ;;  %v9270_v44 = vld [vmem:[#allocation26_spill] sm:$0xff] }
 0x15e   : > { %v1553_v39 = vmul.f32 %v4428_v1, %v5486_v19  ;;  %3694 = vmatprep.subr.mxu0 %v9095_v48  ;;  %9263 = vst [vmem:[#allocation5_spill] sm:$0xff] %v7483_v52  ;;  %v1857_v53 = vadd.f32 %v1841_v54, %v1809_v26  ;;  %v9264_v10 = vld [vmem:[#allocation8_spill] sm:$0xff]  ;;  %v1601_v57 = vmul.f32 %v4444_v28, %v5489_v20  ;;  %v9266_v1 = vld [vmem:[#allocation37_spill] sm:$0xff] }
 0x15f   : > { %9262 = vst [vmem:[#allocation7_spill] sm:$0xff] %v7477_v14  ;;  %v1937_v62 = vmul.f32 %v9265_v4, %v9264_v10  ;;  %v1649_v51 = vmul.f32 %v4460_v37, %v9081_v24  ;;  %3695 = vmatpush1.msra.mxu0 %v7468_v47  ;;  %v2481_v21 = vadd.f32 %v2465_v55, %v2433_v30  ;;  %v4492_v3 = vld [vmem:[%s5483_s13 + $0x13c] sm:$0xff]  ;;  %v7504_v37 = vld [vmem:[%s5483_s13 + $0x174] sm:$0xff] }
 0x160   : > { %4840 = vmatmul.mubr.msk.f32.gmra.mxu0 %vm2749_vm0, %v7477_v14  ;;  %v2658_v35 = vmul.f32 %v7483_v52, %v9072_v13  ;;  %v2193_v12 = vadd.f32 %v2177_v42, %v2145_v58  ;;  %v2274_v54 = vmul.f32 %v9266_v1, %v9056_v5  ;;  %v7500_v28 = vld [vmem:[%s8573_s3 + $0x38] sm:$0xff]  ;;  %9268 = vst [vmem:[#allocation22_spill] sm:$0xff] %v7504_v37  ;;  %v9269_v55 = vld [vmem:[#allocation29_spill] sm:$0xff]  ;;  %v2748_v58 = vld [vmem:[%s8572_s2 + $0x88] sm:$0xff] }
 0x161   : > { %9267 = vst [vmem:[#allocation8_spill] sm:$0xff] %v7500_v28  ;;  %3048 = vmatprep.mubr.f32.mxu0 %v9095_v48  ;;  %v1905_v22 = vadd.f32 %v1889_v34, %v1857_v53  ;;  %v1985_v26 = vmul.f32 %v9269_v55, %v9046_v33  ;;  %v1617_v30 = vadd.f32 %v1601_v57, %v1553_v39 }
 0x162   : > { %v1697_v42 = vmul.f32 %v4476_v46, %v9097_v8  ;;  %v2530_v4 = vadd.f32 %v2514_v15, %v2481_v21  ;;  %v2706_v14 = vmul.f32 %v7038_v7, %v7504_v37  ;;  %v2241_v47 = vadd.f32 %v2225_v25, %v2193_v12  ;;  %3696 = vmatprep.subr.mxu0 %v9095_v48 }
 0x163   : > { %v2322_v52 = vmul.f32 %v9270_v44, %v9011_v45  ;;  %v1953_v53 = vadd.f32 %v1937_v62, %v1905_v22  ;;  %v2034_v39 = vmul.f32 %v9249_v17, %v5560_v59  ;;  %v1665_v46 = vadd.f32 %v1649_v51, %v1617_v30  ;;  %3697 = vmatpush1.msra.mxu0 %v7500_v28  ;;  %v7528_v62 = vld [vmem:[%s8573_s3 + $0x30] sm:$0xff]  ;;  %v7531_v51 = vld [vmem:[%s5483_s13 + $0x180] sm:$0xff]  ;;  %v7541_v22 = vpop.f32.mrf.mxu0 }
 0x164   : > { %v1745_v34 = vmul.f32 %v4492_v3, %v5509_v31  ;;  %v2578_v15 = vadd.f32 %v2562_v41, %v2530_v4  ;;  %v2290_v57 = vadd.f32 %v2274_v54, %v2241_v47  ;;  %v2370_v21 = vmul.f32 %v7373_v27, %v5619_v36  ;;  %4958 = vmatprep.subr.mxu1 %v2748_v58  ;;  %v2745_v3 = vld [vmem:[%s8572_s2 + $0x70] sm:$0xff] }
 0x165   : > { %v2418_v25 = vmul.f32 %v7387_v23, %v5630_v11  ;;  %9271 = vst [vmem:[#allocation37_spill] sm:$0xff] %v7528_v62  ;;  %9272 = vst [vmem:[#allocation29_spill] sm:$0xff] %v7531_v51  ;;  %v2001_v12 = vadd.f32 %v1985_v26, %v1953_v53  ;;  %v2082_v41 = vmul.f32 %v9251_v32, %v5563_v60  ;;  %3698 = vmatprep.subr.mxu0 %v9095_v48 }
 0x166   : > { %v1713_v47 = vadd.f32 %v1697_v42, %v1665_v46  ;;  %v1794_v54 = vmul.f32 %v9252_v49, %v5520_v38  ;;  %9273 = vst [vmem:[#allocation26_spill] sm:$0xff] %v7541_v22  ;;  %v2626_v55 = vadd.f32 %v2610_v2, %v2578_v15  ;;  %v2338_v30 = vadd.f32 %v2322_v52, %v2290_v57  ;;  %v7548_v49 = vld [vmem:[%s5483_s13 + $0x181] sm:$0xff] }
 0x167   : > { %v2466_v26 = vmul.f32 %v7404_v0, %v5640_v50  ;;  %v2515_v42 = vmul.f32 %v7531_v51, %v5655_v61  ;;  %4959 = vmatpush3.msra.mxu1 %v2748_v58  ;;  %9274 = vst [vmem:[#allocation50_spill] sm:$0xff] %v7548_v49  ;;  %v2050_v4 = vadd.f32 %v2034_v39, %v2001_v12  ;;  %v4429_v15 = vld [vmem:[%s5483_s13 + $0x140] sm:$0xff]  ;;  %v9280_v51 = vld [vmem:[#allocation38_spill] sm:$0xff] }
 0x168   : > { %v2130_v53 = vmul.f32 %v7297_v29, %v5570_v63  ;;  %v1761_v46 = vadd.f32 %v1745_v34, %v1713_v47  ;;  %v1842_v2 = vmul.f32 %v9235_v9, %v5529_v43  ;;  %3699 = vmatpush1.msra.mxu0 %v7528_v62  ;;  %v2674_v52 = vadd.f32 %v2658_v35, %v2626_v55  ;;  %v4445_v39 = vld [vmem:[%s5483_s13 + $0x141] sm:$0xff]  ;;  %v9276_v35 = vld [vmem:[#allocation16_spill] sm:$0xff]  ;;  %v7572_v62 = vpop.f32.mrf.mxu0 }
 0x169   : > { %v2386_v57 = vadd.f32 %v2370_v21, %v2338_v30  ;;  %v2563_v22 = vmul.f32 %v7548_v49, %v9245_v6  ;;  %v2178_v58 = vmul.f32 %v7307_v40, %v8960_v16  ;;  %v4461_v12 = vld [vmem:[%s5483_s13 + $0x142] sm:$0xff]  ;;  %4960 = vmatprep.subr.mxu1 %v2745_v3  ;;  %v2098_v34 = vadd.f32 %v2082_v41, %v2050_v4 }
 0x16a   : > { %v7565_v9 = vld [vmem:[%s8573_s3 + $0x28] sm:$0xff]  ;;  %v2226_v21 = vmul.f32 %v9276_v35, %v5596_v18  ;;  %v1810_v47 = vadd.f32 %v1794_v54, %v1761_v46  ;;  %3700 = vmatprep.subr.mxu0 %v9095_v48  ;;  %v7574_v28 = vadd.f32 %v2706_v14, %v2674_v52  ;;  %v1938_v40 = vmul.f32 %v9280_v51, %v9264_v10  ;;  %v2742_v14 = vld [vmem:[%s8572_s2 + $0x58] sm:$0xff]  ;;  %v9282_v51 = vld [vmem:[#allocation21_spill] sm:$0xff] }
 0x16b   : > { %9275 = vst [vmem:[#allocation51_spill] sm:$0xff] %v7565_v9  ;;  %v9277_v55 = vld [vmem:[#allocation10_spill] sm:$0xff]  ;;  %v2434_v49 = vadd.f32 %v2418_v25, %v2386_v57  ;;  %v1554_v41 = vmul.f32 %v4429_v15, %v5486_v19  ;;  %4961 = vmatpush3.msra.mxu1 %v2745_v3  ;;  %v2146_v46 = vadd.f32 %v2130_v53, %v2098_v34  ;;  %v9284_v15 = vld [vmem:[#allocation12_spill] sm:$0xff] }
 0x16c   : > { %v1890_v30 = vmul.f32 %v9277_v55, %v9260_v56  ;;  %9278 = vst [vmem:[#allocation10_spill] sm:$0xff] %v7572_v62  ;;  %9279 = vst [vmem:[#allocation52_spill] sm:$0xff] %v7574_v28  ;;  %v4477_v4 = vld [vmem:[%s5483_s13 + $0x143] sm:$0xff]  ;;  %v1858_v55 = vadd.f32 %v1842_v2, %v1810_v47  ;;  %v1602_v35 = vmul.f32 %v4445_v39, %v5489_v20  ;;  %3701 = vmatpush1.msra.mxu0 %v7565_v9 }
 0x16d   : > { %v7581_v54 = vld [vmem:[%s5483_s13 + $0x182] sm:$0xff]  ;;  %v1650_v62 = vmul.f32 %v4461_v12, %v9081_v24  ;;  %4841 = vmatmul.mubr.msk.f32.gmra.mxu0 %vm2749_vm0, %v7574_v28  ;;  %v2482_v25 = vadd.f32 %v2466_v26, %v2434_v49  ;;  %v1986_v52 = vmul.f32 %v9284_v15, %v9046_v33  ;;  %v2194_v12 = vadd.f32 %v2178_v58, %v2146_v46  ;;  %v7603_v49 = vpop.f32.mrf.mxu0 }
 0x16e   : > { %9281 = vst [vmem:[#allocation38_spill] sm:$0xff] %v7581_v54  ;;  %v2611_v3 = vmul.f32 %v7581_v54, %v9282_v51  ;;  %v9283_v53 = vld [vmem:[#allocation18_spill] sm:$0xff]  ;;  %3054 = vmatprep.mubr.f32.mxu0 %v9095_v48  ;;  %v1906_v34 = vadd.f32 %v1890_v30, %v1858_v55  ;;  %v1618_v47 = vadd.f32 %v1602_v35, %v1554_v41  ;;  %9286 = vst [vmem:[#allocation12_spill] sm:$0xff] %v7603_v49  ;;  %v9287_v54 = vld [vmem:[#allocation15_spill] sm:$0xff] }
 0x16f   : > { %v2275_v2 = vmul.f32 %v9283_v53, %v9056_v5  ;;  %v4493_v57 = vld [vmem:[%s5483_s13 + $0x144] sm:$0xff]  ;;  %v1698_v26 = vmul.f32 %v4477_v4, %v9097_v8  ;;  %v2531_v28 = vadd.f32 %v2515_v42, %v2482_v25  ;;  %v2323_v53 = vmul.f32 %v9287_v54, %v9011_v45  ;;  %4962 = vmatprep.subr.mxu1 %v2742_v14 }
 0x170   : > { %v7600_v39 = vld [vmem:[%s5483_s13 + $0x183] sm:$0xff]  ;;  %v2035_v15 = vmul.f32 %v9266_v1, %v5560_v59  ;;  %v2242_v30 = vadd.f32 %v2226_v21, %v2194_v12  ;;  %v1954_v41 = vadd.f32 %v1938_v40, %v1906_v34  ;;  %v1666_v42 = vadd.f32 %v1650_v62, %v1618_v47  ;;  %3702 = vmatprep.subr.mxu0 %v9095_v48 }
 0x171   : > { %9285 = vst [vmem:[#allocation21_spill] sm:$0xff] %v7600_v39  ;;  %v2659_v9 = vmul.f32 %v7600_v39, %v9072_v13  ;;  %v7614_v58 = vld [vmem:[%s8573_s3 + $0x20] sm:$0xff]  ;;  %v1746_v4 = vmul.f32 %v4493_v57, %v5509_v31  ;;  %v2579_v55 = vadd.f32 %v2563_v22, %v2531_v28  ;;  %v2083_v40 = vmul.f32 %v9270_v44, %v5563_v60  ;;  %v7633_v28 = vpop.f32.mrf.mxu0 }
 0x172   : > { %9288 = vst [vmem:[#allocation15_spill] sm:$0xff] %v7614_v58  ;;  %v7617_v35 = vld [vmem:[%s5483_s13 + $0x184] sm:$0xff]  ;;  %4963 = vmatpush3.msra.mxu1 %v2742_v14  ;;  %v2291_v62 = vadd.f32 %v2275_v2, %v2242_v30  ;;  %v2002_v21 = vadd.f32 %v1986_v52, %v1954_v41  ;;  %v1714_v57 = vadd.f32 %v1698_v26, %v1666_v42  ;;  %9291 = vst [vmem:[#allocation54_spill] sm:$0xff] %v7633_v28  ;;  %v4430_v2 = vld [vmem:[%s5483_s13 + $0x150] sm:$0xff] }
 0x173   : > { %9289 = vst [vmem:[#allocation53_spill] sm:$0xff] %v7617_v35  ;;  %v2739_v46 = vld [vmem:[%s8572_s2 + $0x40] sm:$0xff]  ;;  %v2707_v25 = vmul.f32 %v7038_v7, %v7617_v35  ;;  %v1795_v12 = vmul.f32 %v9249_v17, %v5520_v38  ;;  %3703 = vmatpush1.msra.mxu0 %v7614_v58  ;;  %v2627_v7 = vadd.f32 %v2611_v3, %v2579_v55  ;;  %v7645_v17 = vld [vmem:[%s8573_s3 + $0x18] sm:$0xff]  ;;  %v7648_v26 = vld [vmem:[%s5483_s13 + $0x188] sm:$0xff] }
 0x174   : > { %v9290_v49 = vld [vmem:[#allocation33_spill] sm:$0xff]  ;;  %v2467_v47 = vmul.f32 %v7504_v37, %v5640_v50  ;;  %v2131_v14 = vmul.f32 %v7373_v27, %v5570_v63  ;;  %4964 = vmatprep.subr.mxu1 %v2739_v46  ;;  %v2339_v52 = vadd.f32 %v2323_v53, %v2291_v62  ;;  %9294 = vst [vmem:[#allocation55_spill] sm:$0xff] %v7648_v26  ;;  %v7651_v3 = vld [vmem:[%s5483_s13 + $0x189] sm:$0xff]  ;;  %v4462_v37 = vld [vmem:[%s5483_s13 + $0x152] sm:$0xff] }
 0x175   : > { %v2371_v39 = vmul.f32 %v9290_v49, %v5619_v36  ;;  %v9292_v22 = vld [vmem:[#allocation5_spill] sm:$0xff]  ;;  %9295 = vst [vmem:[#allocation56_spill] sm:$0xff] %v7651_v3  ;;  %v2051_v30 = vadd.f32 %v2035_v15, %v2002_v21  ;;  %v1762_v41 = vadd.f32 %v1746_v4, %v1714_v57  ;;  %v1843_v42 = vmul.f32 %v9251_v32, %v5529_v43  ;;  %v2736_v55 = vld [vmem:[%s8572_s2 + $0x28] sm:$0xff]  ;;  %v4446_v4 = vld [vmem:[%s5483_s13 + $0x151] sm:$0xff] }
 0x176   : > { %v2419_v34 = vmul.f32 %v9292_v22, %v5630_v11  ;;  %9293 = vst [vmem:[#allocation5_spill] sm:$0xff] %v7645_v17  ;;  %3704 = vmatprep.subr.mxu0 %v9095_v48  ;;  %v2675_v28 = vadd.f32 %v2659_v9, %v2627_v7  ;;  %v2516_v53 = vmul.f32 %v7648_v26, %v5655_v61  ;;  %v4478_v9 = vld [vmem:[%s5483_s13 + $0x153] sm:$0xff]  ;;  %v7671_v7 = vpop.f32.mrf.mxu0 }
 0x177   : > { %v2564_v62 = vmul.f32 %v7651_v3, %v9245_v6  ;;  %v2179_v15 = vmul.f32 %v7387_v23, %v8960_v16  ;;  %4965 = vmatpush3.msra.mxu1 %v2739_v46  ;;  %v2387_v21 = vadd.f32 %v2371_v39, %v2339_v52  ;;  %v2099_v32 = vadd.f32 %v2083_v40, %v2051_v30  ;;  %v9298_v46 = vld [vmem:[#allocation42_spill] sm:$0xff] }
 0x178   : > { %v1811_v57 = vadd.f32 %v1795_v12, %v1762_v41  ;;  %v1891_v58 = vmul.f32 %v7297_v29, %v9260_v56  ;;  %3705 = vmatpush1.msra.mxu0 %v7645_v17  ;;  %9296 = vst [vmem:[#allocation57_spill] sm:$0xff] %v7671_v7  ;;  %v7673_v26 = vadd.f32 %v2707_v25, %v2675_v28  ;;  %v4494_v41 = vld [vmem:[%s5483_s13 + $0x154] sm:$0xff]  ;;  %v9299_v25 = vld [vmem:[#allocation29_spill] sm:$0xff] }
 0x179   : > { %v2227_v3 = vmul.f32 %v7404_v0, %v5596_v18  ;;  %v1939_v39 = vmul.f32 %v9298_v46, %v9264_v10  ;;  %v1555_v40 = vmul.f32 %v4430_v2, %v5486_v19  ;;  %4966 = vmatprep.subr.mxu1 %v2736_v55  ;;  %v2435_v12 = vadd.f32 %v2419_v34, %v2387_v21  ;;  %v9300_v46 = vld [vmem:[#allocation16_spill] sm:$0xff] }
 0x17a   : > { %9297 = vst [vmem:[#allocation58_spill] sm:$0xff] %v7673_v26  ;;  %v2147_v29 = vadd.f32 %v2131_v14, %v2099_v32  ;;  %v1859_v52 = vadd.f32 %v1843_v42, %v1811_v57  ;;  %v1603_v30 = vmul.f32 %v4446_v4, %v5489_v20  ;;  %3706 = vmatprep.subr.mxu0 %v9095_v48  ;;  %v7694_v14 = vld [vmem:[%s8573_s3 + $0x10] sm:$0xff] }
 0x17b   : > { %4842 = vmatmul.mubr.msk.f32.gmra.mxu0 %vm2749_vm0, %v7673_v26  ;;  %v2276_v28 = vmul.f32 %v9299_v25, %v9056_v5  ;;  %v1987_v7 = vmul.f32 %v9300_v46, %v9046_v33  ;;  %v1651_v2 = vmul.f32 %v4462_v37, %v9081_v24  ;;  %v1699_v34 = vmul.f32 %v4478_v9, %v9097_v8  ;;  %v7698_v4 = vld [vmem:[%s5483_s13 + $0x18a] sm:$0xff]  ;;  %v7703_v46 = vpop.f32.mrf.mxu0 }
 0x17c   : > { %9301 = vst [vmem:[#allocation42_spill] sm:$0xff] %v7694_v14  ;;  %3060 = vmatprep.mubr.f32.mxu0 %v9095_v48  ;;  %v2483_v42 = vadd.f32 %v2467_v47, %v2435_v12  ;;  %9302 = vst [vmem:[#allocation16_spill] sm:$0xff] %v7698_v4  ;;  %v2195_v21 = vadd.f32 %v2179_v15, %v2147_v29  ;;  %v1907_v32 = vadd.f32 %v1891_v58, %v1859_v52  ;;  %v2733_v37 = vld [vmem:[%s8572_s2 + $0x10] sm:$0xff]  ;;  %v9304_v26 = vld [vmem:[#allocation50_spill] sm:$0xff] }
 0x17d   : > { %v1619_v57 = vadd.f32 %v1603_v30, %v1555_v40  ;;  %9303 = vst [vmem:[#allocation59_spill] sm:$0xff] %v7703_v46  ;;  %v2612_v9 = vmul.f32 %v7698_v4, %v9282_v51  ;;  %v2324_v17 = vmul.f32 %v9304_v26, %v9011_v45  ;;  %v9305_v25 = vld [vmem:[#allocation18_spill] sm:$0xff]  ;;  %v1747_v15 = vmul.f32 %v4494_v41, %v5509_v31 }
 0x17e   : > { %v2036_v47 = vmul.f32 %v9305_v25, %v5560_v59  ;;  %4967 = vmatpush3.msra.mxu1 %v2736_v55  ;;  %v2532_v58 = vadd.f32 %v2516_v53, %v2483_v42  ;;  %v7713_v40 = vld [vmem:[%s5483_s13 + $0x18b] sm:$0xff]  ;;  %v2243_v12 = vadd.f32 %v2227_v3, %v2195_v21  ;;  %v1955_v29 = vadd.f32 %v1939_v39, %v1907_v32  ;;  %v7733_v21 = vpop.f32.mrf.mxu0 }
 0x17f   : > { %9306 = vst [vmem:[#allocation60_spill] sm:$0xff] %v7713_v40  ;;  %v1667_v52 = vadd.f32 %v1651_v2, %v1619_v57  ;;  %3707 = vmatpush1.msra.mxu0 %v7694_v14  ;;  %v2660_v30 = vmul.f32 %v7713_v40, %v9072_v13  ;;  %v9307_v46 = vld [vmem:[#allocation38_spill] sm:$0xff]  ;;  %v2084_v25 = vmul.f32 %v9287_v54, %v5563_v60  ;;  %9309 = vst [vmem:[#allocation62_spill] sm:$0xff] %v7733_v21 }
 0x180   : > { %v2372_v26 = vmul.f32 %v9307_v46, %v5619_v36  ;;  %v1796_v55 = vmul.f32 %v9266_v1, %v5520_v38  ;;  %4968 = vmatprep.subr.mxu1 %v2733_v37  ;;  %v7727_v3 = vld [vmem:[%s8573_s3 + $0x8] sm:$0xff]  ;;  %v2580_v53 = vadd.f32 %v2564_v62, %v2532_v58  ;;  %v2292_v41 = vadd.f32 %v2276_v28, %v2243_v12  ;;  %v7738_v1 = vld [vmem:[%s8571_s1 + $0x18] ss:$0 sm:$0xff]  ;;  %v9310_v62 = vld [vmem:[#allocation21_spill] sm:$0xff] }
 0x181   : > { %9308 = vst [vmem:[#allocation61_spill] sm:$0xff] %v7727_v3  ;;  %v7730_v39 = vld [vmem:[%s5483_s13 + $0x18c] sm:$0xff]  ;;  %v2003_v2 = vadd.f32 %v1987_v7, %v1955_v29  ;;  %v1715_v42 = vadd.f32 %v1699_v34, %v1667_v52  ;;  %3708 = vmatprep.subr.mxu0 %v9095_v48  ;;  %v2420_v57 = vmul.f32 %v9310_v62, %v5630_v11  ;;  %v4431_v52 = vld [vmem:[%s5483_s13 + $0x158] sm:$0xff] }
 0x182   : > { %v2708_v32 = vmul.f32 %v7738_v1, %v7730_v39  ;;  %v2132_v28 = vmul.f32 %v9290_v49, %v5570_v63  ;;  %v1844_v7 = vmul.f32 %v9270_v44, %v5529_v43  ;;  %4969 = vmatpush3.msra.mxu1 %v2733_v37  ;;  %v2628_v34 = vadd.f32 %v2612_v9, %v2580_v53  ;;  %v9311_v44 = vld [vmem:[#allocation13_spill] sm:$0xff] }
 0x183   : > { %v2340_v58 = vadd.f32 %v2324_v17, %v2292_v41  ;;  %v2052_v12 = vadd.f32 %v2036_v47, %v2003_v2  ;;  %v1763_v29 = vadd.f32 %v1747_v15, %v1715_v42  ;;  %3709 = vmatpush1.msra.mxu0 %v7727_v3  ;;  %v2468_v21 = vmul.f32 %v7617_v35, %v5640_v50  ;;  %v7761_v17 = vld [vmem:[%s8573_s3] sm:$0xff]  ;;  %v7764_v47 = vld [vmem:[%s5483_s13 + $0x198] sm:$0xff] }
 0x184   : > { %v2180_v14 = vmul.f32 %v9292_v22, %v8960_v16  ;;  %v1892_v49 = vmul.f32 %v7373_v27, %v9260_v56  ;;  %4971 = vmatmul.mubr.msk.f32.vlgmr.msra.gmra.mxu1 %vm2749_vm0, %v9311_v44  ;;  %9312 = vst [vmem:[#allocation13_spill] sm:$0xff] %v7761_v17  ;;  %v2676_v37 = vadd.f32 %v2660_v30, %v2628_v34  ;;  %v4447_v41 = vld [vmem:[%s5483_s13 + $0x159] sm:$0xff]  ;;  %v7769_v27 = vpop.f32.mrf.mxu0  ;;  %v9314_v44 = vld [vmem:[#allocation22_spill] sm:$0xff] }
 0x185   : > { %v2388_v9 = vadd.f32 %v2372_v26, %v2340_v58  ;;  %v2100_v15 = vadd.f32 %v2084_v25, %v2052_v12  ;;  %v1812_v53 = vadd.f32 %v1796_v55, %v1763_v29  ;;  %v4463_v2 = vld [vmem:[%s5483_s13 + $0x15a] sm:$0xff]  ;;  %3710 = vmatprep.subr.mxu0 %v9095_v48  ;;  %9313 = vst [vmem:[#allocation63_spill] sm:$0xff] %v7769_v27 }
 0x186   : > { %v2517_v42 = vmul.f32 %v7764_v47, %v5655_v61  ;;  %v2228_v3 = vmul.f32 %v9314_v44, %v5596_v18  ;;  %v1940_v26 = vmul.f32 %v7387_v23, %v9264_v10  ;;  %v1556_v30 = vmul.f32 %v4431_v52, %v5486_v19  ;;  %5018 = vmatprep.subr.mxu1 %v9095_v48  ;;  %v7782_v34 = vld [vmem:[%s5483_s13 + $0x199] sm:$0xff]  ;;  %v9316_v23 = vld [vmem:[#allocation55_spill] sm:$0xff] }
 0x187   : > { %v7779_v25 = vadd.f32 %v2708_v32, %v2676_v37  ;;  %v2436_v55 = vadd.f32 %v2420_v57, %v2388_v9  ;;  %v2148_v58 = vadd.f32 %v2132_v28, %v2100_v15  ;;  %v1860_v12 = vadd.f32 %v1844_v7, %v1812_v53  ;;  %v4479_v29 = vld [vmem:[%s5483_s13 + $0x15b] sm:$0xff]  ;;  %3711 = vmatpush1.msra.mxu0 %v7761_v17  ;;  %v9317_v37 = vld [vmem:[#allocation23_spill] sm:$0xff]  ;;  %v7801_v17 = vpop.f32.mrf.mxu0 }
 0x188   : > { %v2565_v27 = vmul.f32 %v7782_v34, %v9245_v6  ;;  %v2277_v52 = vmul.f32 %v9316_v23, %v9056_v5  ;;  %v1604_v44 = vmul.f32 %v4447_v41, %v5489_v20  ;;  %v1652_v32 = vmul.f32 %v4463_v2, %v9081_v24  ;;  %5050 = vmatpush1.msra.mxu1 %v9317_v37  ;;  %v7796_v28 = vld [vmem:[%s5483_s13 + $0x19a] sm:$0xff] }
 0x189   : > { %9315 = vst [vmem:[#allocation64_spill] sm:$0xff] %v7779_v25  ;;  %4843 = vmatmul.mubr.msk.f32.gmra.mxu0 %vm2749_vm0, %v7779_v25  ;;  %v2484_v57 = vadd.f32 %v2468_v21, %v2436_v55  ;;  %v2196_v7 = vadd.f32 %v2180_v14, %v2148_v58  ;;  %v1908_v9 = vadd.f32 %v1892_v49, %v1860_v12  ;;  %v4495_v53 = vld [vmem:[%s5483_s13 + $0x15c] sm:$0xff]  ;;  %9318 = vst [vmem:[#allocation55_spill] sm:$0xff] %v7801_v17 }
 0x18a   : > { %v1988_v15 = vmul.f32 %v7404_v0, %v9046_v33  ;;  %3066 = vmatprep.mubr.f32.mxu0 %v9095_v48  ;;  %v2613_v41 = vmul.f32 %v7796_v28, %v9282_v51  ;;  %v9319_v2 = vld [vmem:[#allocation56_spill] sm:$0xff]  ;;  %v1620_v21 = vadd.f32 %v1604_v44, %v1556_v30  ;;  %v1700_v55 = vmul.f32 %v4479_v29, %v9097_v8  ;;  %v9321_v12 = vld [vmem:[#allocation29_spill] sm:$0xff] }
 0x18b   : > { %v2325_v37 = vmul.f32 %v9319_v2, %v9011_v45  ;;  %v2533_v14 = vadd.f32 %v2517_v42, %v2484_v57  ;;  %v7810_v49 = vld [vmem:[%s5483_s13 + $0x19b] sm:$0xff]  ;;  %v2244_v58 = vadd.f32 %v2228_v3, %v2196_v7  ;;  %v1956_v0 = vadd.f32 %v1940_v26, %v1908_v9  ;;  %3712 = vmatprep.subr.mxu0 %v9095_v48  ;;  %v9323_v26 = vld [vmem:[#allocation27_spill] sm:$0xff] }
 0x18c   : > { %9320 = vst [vmem:[#allocation23_spill] sm:$0xff] %v7810_v49  ;;  %v2037_v17 = vmul.f32 %v9321_v12, %v5560_v59  ;;  %v7818_v25 = vld [vmem:[%s8573_s3 + $0xf8] sm:$0xff]  ;;  %v2661_v44 = vmul.f32 %v7810_v49, %v9072_v13  ;;  %v2373_v42 = vmul.f32 %v7698_v4, %v5619_v36  ;;  %v1668_v30 = vadd.f32 %v1652_v32, %v1620_v21  ;;  %v9325_v12 = vld [vmem:[#allocation50_spill] sm:$0xff]  ;;  %v7833_v49 = vpop.f32.mrf.mxu0 }
 0x18d   : > { %9322 = vst [vmem:[#allocation65_spill] sm:$0xff] %v7818_v25  ;;  %v1748_v3 = vmul.f32 %v4495_v53, %v5509_v31  ;;  %4973 = vmatprep.mubr.msk.f32.mxu1 %vm2749_vm0, %v9323_v26  ;;  %v2581_v29 = vadd.f32 %v2565_v27, %v2533_v14  ;;  %v7828_v57 = vld [vmem:[%s5483_s13 + $0x19c] sm:$0xff]  ;;  %v2293_v7 = vadd.f32 %v2277_v52, %v2244_v58  ;;  %9326 = vst [vmem:[#allocation50_spill] sm:$0xff] %v7833_v49  ;;  %v9327_v27 = vld [vmem:[#allocation18_spill] sm:$0xff] }
 0x18e   : > { %9324 = vst [vmem:[#allocation27_spill] sm:$0xff] %v7828_v57  ;;  %v2004_v9 = vadd.f32 %v1988_v15, %v1956_v0  ;;  %v2085_v2 = vmul.f32 %v9325_v12, %v5563_v60  ;;  %5019 = vmatprep.subr.mxu1 %v9095_v48  ;;  %v2709_v32 = vmul.f32 %v7738_v1, %v7828_v57  ;;  %v7843_v58 = vld [vmem:[%s5483_s13 + $0x1a0] sm:$0xff]  ;;  %v9329_v49 = vld [vmem:[#allocation28_spill] sm:$0xff] }
 0x18f   : > { %v2421_v53 = vmul.f32 %v7713_v40, %v5630_v11  ;;  %v1716_v21 = vadd.f32 %v1700_v55, %v1668_v30  ;;  %v1797_v14 = vmul.f32 %v9327_v27, %v5520_v38  ;;  %3713 = vmatpush2.msra.mxu0 %v7818_v25  ;;  %v2629_v52 = vadd.f32 %v2613_v41, %v2581_v29  ;;  %v9330_v29 = vld [vmem:[#allocation9_spill] sm:$0xff] }
 0x190   : > { %v2341_v15 = vadd.f32 %v2325_v37, %v2293_v7  ;;  %9328 = vst [vmem:[#allocation18_spill] sm:$0xff] %v7843_v58  ;;  %v2053_v0 = vadd.f32 %v2037_v17, %v2004_v9  ;;  %v2133_v26 = vmul.f32 %v9307_v46, %v5570_v63  ;;  %4974 = vmatmul.mubr.msk.f32.gmra.mxu1 %vm2749_vm0, %v9329_v49  ;;  %v4432_v37 = vld [vmem:[%s5483_s13 + $0x168] sm:$0xff]  ;;  %v7860_v17 = vld [vmem:[%s8573_s3 + $0xf0] sm:$0xff] }
 0x191   : > { %v2469_v55 = vmul.f32 %v7730_v39, %v5640_v50  ;;  %v2518_v30 = vmul.f32 %v7843_v58, %v5655_v61  ;;  %v1764_v27 = vadd.f32 %v1748_v3, %v1716_v21  ;;  %v1845_v41 = vmul.f32 %v9287_v54, %v5529_v43  ;;  %5051 = vmatpush1.msra.mxu1 %v9330_v29  ;;  %v7863_v9 = vld [vmem:[%s5483_s13 + $0x1a1] sm:$0xff]  ;;  %v4448_v21 = vld [vmem:[%s5483_s13 + $0x169] sm:$0xff]  ;;  %v7870_v29 = vpop.f32.mrf.mxu0 }
 0x192   : > { %9331 = vst [vmem:[#allocation28_spill] sm:$0xff] %v7860_v17  ;;  %v2677_v7 = vadd.f32 %v2661_v44, %v2629_v52  ;;  %v2389_v49 = vadd.f32 %v2373_v42, %v2341_v15  ;;  %9332 = vst [vmem:[#allocation9_spill] sm:$0xff] %v7863_v9  ;;  %v2101_v25 = vadd.f32 %v2085_v2, %v2053_v0  ;;  %v4464_v54 = vld [vmem:[%s5483_s13 + $0x16a] sm:$0xff]  ;;  %3714 = vmatprep.subr.mxu0 %v9095_v48  ;;  %v9334_v52 = vld [vmem:[#allocation33_spill] sm:$0xff] }
 0x193   : > { %v2181_v3 = vmul.f32 %v9310_v62, %v8960_v16  ;;  %9333 = vst [vmem:[#allocation66_spill] sm:$0xff] %v7870_v29  ;;  %v2566_v58 = vmul.f32 %v7863_v9, %v9245_v6  ;;  %v2229_v44 = vmul.f32 %v7617_v35, %v5596_v18  ;;  %v1813_v42 = vadd.f32 %v1797_v14, %v1764_v27  ;;  %v4480_v29 = vld [vmem:[%s5483_s13 + $0x16b] sm:$0xff]  ;;  %v7885_v9 = vld [vmem:[%s5483_s13 + $0x1a2] sm:$0xff] }
 0x194   : > { %v1893_v2 = vmul.f32 %v9334_v52, %v9260_v56  ;;  %5020 = vmatprep.subr.mxu1 %v9095_v48  ;;  %v7879_v15 = vadd.f32 %v2709_v32, %v2677_v7  ;;  %v2437_v0 = vadd.f32 %v2421_v53, %v2389_v49  ;;  %v2149_v62 = vadd.f32 %v2133_v26, %v2101_v25  ;;  %v9336_v7 = vld [vmem:[#allocation24_spill] sm:$0xff]  ;;  %v7903_v49 = vld [vmem:[%s5483_s13 + $0x1a3] sm:$0xff] }
 0x195   : > { %v1557_v46 = vmul.f32 %v4432_v37, %v5486_v19  ;;  %3715 = vmatpush2.msra.mxu0 %v7860_v17  ;;  %v1861_v35 = vadd.f32 %v1845_v41, %v1813_v42  ;;  %v1941_v14 = vmul.f32 %v9292_v22, %v9264_v10  ;;  %v1605_v27 = vmul.f32 %v4448_v21, %v5489_v20  ;;  %v4496_v37 = vld [vmem:[%s5483_s13 + $0x16c] sm:$0xff]  ;;  %v7899_v22 = vpop.f32.mrf.mxu0 }
 0x196   : > { %9335 = vst [vmem:[#allocation33_spill] sm:$0xff] %v7879_v15  ;;  %v1653_v32 = vmul.f32 %v4464_v54, %v9081_v24  ;;  %5052 = vmatpush1.msra.mxu1 %v9336_v7  ;;  %4844 = vmatmul.mubr.msk.f32.gmra.mxu0 %vm2749_vm0, %v7879_v15  ;;  %v2485_v25 = vadd.f32 %v2469_v55, %v2437_v0  ;;  %9337 = vst [vmem:[#allocation24_spill] sm:$0xff] %v7899_v22  ;;  %v9338_v54 = vld [vmem:[#allocation22_spill] sm:$0xff] }
 0x197   : > { %v2614_v53 = vmul.f32 %v7885_v9, %v9282_v51  ;;  %v2197_v26 = vadd.f32 %v2181_v3, %v2149_v62  ;;  %v2278_v41 = vmul.f32 %v7764_v47, %v9056_v5  ;;  %3072 = vmatprep.mubr.f32.mxu0 %v9095_v48  ;;  %v1909_v21 = vadd.f32 %v1893_v2, %v1861_v35  ;;  %v7916_v35 = vld [vmem:[%s8573_s3 + $0xe8] sm:$0xff] }
 0x198   : > { %v1989_v42 = vmul.f32 %v9338_v54, %v9046_v33  ;;  %v1621_v55 = vadd.f32 %v1605_v27, %v1557_v46  ;;  %v1701_v52 = vmul.f32 %v4480_v29, %v9097_v8  ;;  %v2534_v0 = vadd.f32 %v2518_v30, %v2485_v25  ;;  %3716 = vmatprep.subr.mxu0 %v9095_v48  ;;  %v7919_v2 = vld [vmem:[%s5483_s13 + $0x1a4] sm:$0xff] }
 0x199   : > { %v2662_v62 = vmul.f32 %v7903_v49, %v9072_v13  ;;  %v2245_v3 = vadd.f32 %v2229_v44, %v2197_v26  ;;  %v2326_v7 = vmul.f32 %v7782_v34, %v9011_v45  ;;  %9339 = vst [vmem:[#allocation22_spill] sm:$0xff] %v7916_v35  ;;  %v1957_v46 = vadd.f32 %v1941_v14, %v1909_v21  ;;  %v9340_v44 = vld [vmem:[#allocation35_spill] sm:$0xff]  ;;  %v7931_v14 = vpop.f32.mrf.mxu0 }
 0x19a   : > { %v2038_v30 = vmul.f32 %v9316_v23, %v5560_v59  ;;  %v1669_v29 = vadd.f32 %v1653_v32, %v1621_v55  ;;  %v1749_v27 = vmul.f32 %v4496_v37, %v5509_v31  ;;  %4976 = vmatprep.mubr.msk.f32.mxu1 %vm2749_vm0, %v9340_v44  ;;  %v2582_v25 = vadd.f32 %v2566_v58, %v2534_v0  ;;  %v9342_v37 = vld [vmem:[#allocation56_spill] sm:$0xff]  ;;  %v9343_v58 = vld [vmem:[#allocation29_spill] sm:$0xff] }
 0x19b   : > { %v2710_v26 = vmul.f32 %v7738_v1, %v7919_v2  ;;  %v2294_v54 = vadd.f32 %v2278_v41, %v2245_v3  ;;  %v2374_v22 = vmul.f32 %v7796_v28, %v5619_v36  ;;  %5021 = vmatprep.subr.mxu1 %v9095_v48  ;;  %9341 = vst [vmem:[#allocation35_spill] sm:$0xff] %v7931_v14  ;;  %v9344_v3 = vld [vmem:[#allocation23_spill] sm:$0xff] }
 0x19c   : > { %v2005_v32 = vadd.f32 %v1989_v42, %v1957_v46  ;;  %v2086_v21 = vmul.f32 %v9342_v37, %v5563_v60  ;;  %v1717_v55 = vadd.f32 %v1701_v52, %v1669_v29  ;;  %v1798_v0 = vmul.f32 %v9343_v58, %v5520_v38  ;;  %3717 = vmatpush2.msra.mxu0 %v7916_v35  ;;  %v9345_v42 = vld [vmem:[#allocation46_spill] sm:$0xff]  ;;  %v7945_v46 = vld [vmem:[%s5483_s13 + $0x1b0] sm:$0xff] }
 0x19d   : > { %v2630_v44 = vadd.f32 %v2614_v53, %v2582_v25  ;;  %v2342_v41 = vadd.f32 %v2326_v7, %v2294_v54  ;;  %v2422_v15 = vmul.f32 %v9344_v3, %v5630_v11  ;;  %v2470_v14 = vmul.f32 %v7828_v57, %v5640_v50  ;;  %4977 = vmatmul.mubr.msk.f32.gmra.mxu1 %vm2749_vm0, %v9345_v42  ;;  %v4433_v7 = vld [vmem:[%s5483_s13 + $0x170] sm:$0xff]  ;;  %v9347_v25 = vld [vmem:[#allocation36_spill] sm:$0xff]  ;;  %v7956_v54 = vld [vmem:[%s8573_s3 + $0xe0] sm:$0xff] }
 0x19e   : > { %9346 = vst [vmem:[#allocation56_spill] sm:$0xff] %v7945_v46  ;;  %v2054_v52 = vadd.f32 %v2038_v30, %v2005_v32  ;;  %v2134_v29 = vmul.f32 %v7698_v4, %v5570_v63  ;;  %v1765_v58 = vadd.f32 %v1749_v27, %v1717_v55  ;;  %v1846_v53 = vmul.f32 %v9325_v12, %v5529_v43  ;;  %v4449_v32 = vld [vmem:[%s5483_s13 + $0x171] sm:$0xff]  ;;  %v7965_v55 = vpop.f32.mrf.mxu0 }
 0x19f   : > { %5053 = vmatpush1.msra.mxu1 %v9347_v25  ;;  %v2678_v35 = vadd.f32 %v2662_v62, %v2630_v44  ;;  %v2390_v42 = vadd.f32 %v2374_v22, %v2342_v41  ;;  %v2519_v30 = vmul.f32 %v7945_v46, %v5655_v61  ;;  %v2182_v27 = vmul.f32 %v7713_v40, %v8960_v16  ;;  %v4465_v12 = vld [vmem:[%s5483_s13 + $0x172] sm:$0xff]  ;;  %v9349_v22 = vld [vmem:[#allocation38_spill] sm:$0xff]  ;;  %v9350_v40 = vld [vmem:[#allocation21_spill] sm:$0xff] }
 0x1a0   : > { %3718 = vmatprep.subr.mxu0 %v9095_v48  ;;  %9348 = vst [vmem:[#allocation29_spill] sm:$0xff] %v7965_v55  ;;  %v2102_v25 = vadd.f32 %v2086_v21, %v2054_v52  ;;  %v2230_v17 = vmul.f32 %v7730_v39, %v5596_v18  ;;  %v1814_v62 = vadd.f32 %v1798_v0, %v1765_v58  ;;  %v4481_v55 = vld [vmem:[%s5483_s13 + $0x173] sm:$0xff] }
 0x1a1   : > { %v1894_v44 = vmul.f32 %v9349_v22, %v9260_v56  ;;  %5022 = vmatprep.subr.mxu1 %v9095_v48  ;;  %v7972_v41 = vadd.f32 %v2710_v26, %v2678_v35  ;;  %v2438_v46 = vadd.f32 %v2422_v15, %v2390_v42  ;;  %v1942_v57 = vmul.f32 %v9350_v40, %v9264_v10  ;;  %v7980_v21 = vld [vmem:[%s5483_s13 + $0x1b1] sm:$0xff]  ;;  %v9351_v26 = vld [vmem:[#allocation25_spill] sm:$0xff]  ;;  %v9352_v15 = vld [vmem:[#allocation18_spill] sm:$0xff] }
 0x1a2   : > { %v1558_v4 = vmul.f32 %v4433_v7, %v5486_v19  ;;  %3719 = vmatpush2.msra.mxu0 %v7956_v54  ;;  %v2150_v0 = vadd.f32 %v2134_v29, %v2102_v25  ;;  %v1862_v52 = vadd.f32 %v1846_v53, %v1814_v62  ;;  %v1606_v58 = vmul.f32 %v4449_v32, %v5489_v20  ;;  %v9353_v42 = vld [vmem:[#allocation53_spill] sm:$0xff]  ;;  %v4497_v53 = vld [vmem:[%s5483_s13 + $0x174] sm:$0xff]  ;;  %v7994_v20 = vpop.f32.mrf.mxu0 }
 0x1a3   : > { %v1654_v35 = vmul.f32 %v4465_v12, %v9081_v24  ;;  %5054 = vmatpush1.msra.mxu1 %v9351_v26  ;;  %4845 = vmatmul.mubr.msk.f32.gmra.mxu0 %vm2749_vm0, %v7972_v41  ;;  %v2486_v40 = vadd.f32 %v2470_v14, %v2438_v46  ;;  %v2567_v19 = vmul.f32 %v7980_v21, %v9245_v6  ;;  %v7998_v24 = vld [vmem:[%s5483_s13 + $0x1b2] sm:$0xff]  ;;  %v9354_v22 = vld [vmem:[#allocation9_spill] sm:$0xff] }
 0x1a4   : > { %v2279_v7 = vmul.f32 %v9352_v15, %v9056_v5  ;;  %v1990_v29 = vmul.f32 %v9353_v42, %v9046_v33  ;;  %3078 = vmatprep.mubr.f32.mxu0 %v9095_v48  ;;  %v2198_v32 = vadd.f32 %v2182_v27, %v2150_v0  ;;  %v1910_v12 = vadd.f32 %v1894_v44, %v1862_v52  ;;  %v8011_v27 = vld [vmem:[%s8573_s3 + $0xd8] sm:$0xff]  ;;  %v9355_v0 = vld [vmem:[#allocation14_spill] sm:$0xff] }
 0x1a5   : > { %v1622_v14 = vadd.f32 %v1606_v58, %v1558_v4  ;;  %v1702_v46 = vmul.f32 %v4481_v55, %v9097_v8  ;;  %v2535_v25 = vadd.f32 %v2519_v30, %v2486_v40  ;;  %v2615_v62 = vmul.f32 %v7998_v24, %v9282_v51  ;;  %3720 = vmatprep.subr.mxu0 %v9095_v48  ;;  %v8014_v4 = vld [vmem:[%s5483_s13 + $0x1b3] sm:$0xff] }
 0x1a6   : > { %v2327_v26 = vmul.f32 %v9354_v22, %v9011_v45  ;;  %v2039_v42 = vmul.f32 %v7764_v47, %v5560_v59  ;;  %v2246_v8 = vadd.f32 %v2230_v17, %v2198_v32  ;;  %v1958_v30 = vadd.f32 %v1942_v57, %v1910_v12  ;;  %4979 = vmatprep.mubr.msk.f32.mxu1 %vm2749_vm0, %v9355_v0  ;;  %v8026_v57 = vpop.f32.mrf.mxu0  ;;  %v8029_v17 = vld [vmem:[%s5483_s13 + $0x1b4] sm:$0xff] }
 0x1a7   : > { %v1670_v55 = vadd.f32 %v1654_v35, %v1622_v14  ;;  %v1750_v44 = vmul.f32 %v4497_v53, %v5509_v31  ;;  %v2583_v52 = vadd.f32 %v2567_v19, %v2535_v25  ;;  %v2663_v47 = vmul.f32 %v8014_v4, %v9072_v13  ;;  %5023 = vmatprep.subr.mxu1 %v9095_v48  ;;  %v9356_v25 = vld [vmem:[#allocation43_spill] sm:$0xff]  ;;  %v9358_v0 = vld [vmem:[#allocation16_spill] sm:$0xff] }
 0x1a8   : > { %v2375_v58 = vmul.f32 %v7885_v9, %v5619_v36  ;;  %v2087_v40 = vmul.f32 %v7782_v34, %v5563_v60  ;;  %v2295_v31 = vadd.f32 %v2279_v7, %v2246_v8  ;;  %v2006_v35 = vadd.f32 %v1990_v29, %v1958_v30  ;;  %3721 = vmatpush2.msra.mxu0 %v8011_v27  ;;  %v8043_v29 = vld [vmem:[%s5483_s13 + $0x1b8] sm:$0xff]  ;;  %v8051_v8 = vld [vmem:[%s8573_s3 + $0xd0] sm:$0xff] }
 0x1a9   : > { %v1718_v53 = vadd.f32 %v1702_v46, %v1670_v55  ;;  %v1799_v19 = vmul.f32 %v9316_v23, %v5520_v38  ;;  %v2631_v32 = vadd.f32 %v2615_v62, %v2583_v52  ;;  %v2711_v12 = vmul.f32 %v7738_v1, %v8029_v17  ;;  %4980 = vmatmul.mubr.msk.f32.gmra.mxu1 %vm2749_vm0, %v9356_v25  ;;  %v9357_v62 = vld [vmem:[#allocation34_spill] sm:$0xff]  ;;  %v9362_v25 = vld [vmem:[#allocation41_spill] sm:$0xff] }
 0x1aa   : > { %v2423_v34 = vmul.f32 %v7903_v49, %v5630_v11  ;;  %v2135_v14 = vmul.f32 %v7796_v28, %v5570_v63  ;;  %v2343_v7 = vadd.f32 %v2327_v26, %v2295_v31  ;;  %v2055_v46 = vadd.f32 %v2039_v42, %v2006_v35  ;;  %5055 = vmatpush1.msra.mxu1 %v9357_v62  ;;  %v9359_v31 = vld [vmem:[#allocation27_spill] sm:$0xff]  ;;  %v8102_v62 = vld [vmem:[%s5483_s13 + $0x1ba] sm:$0xff] }
 0x1ab   : > { %v1766_v38 = vadd.f32 %v1750_v44, %v1718_v53  ;;  %v1847_v23 = vmul.f32 %v9342_v37, %v5529_v43  ;;  %v2679_v30 = vadd.f32 %v2663_v47, %v2631_v32  ;;  %v2471_v28 = vmul.f32 %v7919_v2, %v5640_v50  ;;  %3722 = vmatprep.subr.mxu0 %v9095_v48  ;;  %v8060_v43 = vpop.f32.mrf.mxu0  ;;  %v9360_v53 = vld [vmem:[#allocation60_spill] sm:$0xff]  ;;  %v9361_v32 = vld [vmem:[#allocation31_spill] sm:$0xff] }
 0x1ac   : > { %v2520_v26 = vmul.f32 %v8043_v29, %v5655_v61  ;;  %v2183_v42 = vmul.f32 %v9344_v3, %v8960_v16  ;;  %v2391_v37 = vadd.f32 %v2375_v58, %v2343_v7  ;;  %v2103_v55 = vadd.f32 %v2087_v40, %v2055_v46  ;;  %5024 = vmatprep.subr.mxu1 %v9095_v48  ;;  %v8076_v58 = vld [vmem:[%s8573_s3 + $0xc8] sm:$0xff]  ;;  %v8079_v40 = vld [vmem:[%s5483_s13 + $0x1b9] sm:$0xff] }
 0x1ad   : > { %v1815_v44 = vadd.f32 %v1799_v19, %v1766_v38  ;;  %v1895_v52 = vmul.f32 %v9358_v0, %v9260_v56  ;;  %v8065_v47 = vadd.f32 %v2711_v12, %v2679_v30  ;;  %v2231_v35 = vmul.f32 %v9359_v31, %v5596_v18  ;;  %3723 = vmatpush2.msra.mxu0 %v8051_v8  ;;  %v9363_v7 = vld [vmem:[#allocation56_spill] sm:$0xff]  ;;  %v8098_v38 = vpop.f32.mrf.mxu0  ;;  %v9365_v31 = vld [vmem:[#allocation19_spill] sm:$0xff] }
 0x1ae   : > { %v1943_v3 = vmul.f32 %v9360_v53, %v9264_v10  ;;  %5056 = vmatpush1.msra.mxu1 %v9361_v32  ;;  %v2439_v56 = vadd.f32 %v2423_v34, %v2391_v37  ;;  %v2151_v19 = vadd.f32 %v2135_v14, %v2103_v55  ;;  %3724 = vmatprep.subr.mxu0 %v9095_v48  ;;  %v8096_v14 = vld [vmem:[%s8573_s3 + $0xc0] sm:$0xff] }
 0x1af   : > { %v1863_v12 = vadd.f32 %v1847_v23, %v1815_v44  ;;  %4982 = vmatprep.mubr.msk.f32.mxu1 %vm2749_vm0, %v9362_v25  ;;  %4846 = vmatmul.mubr.msk.f32.gmra.mxu0 %vm2749_vm0, %v8065_v47  ;;  %v2568_v10 = vmul.f32 %v8079_v40, %v9245_v6  ;;  %v2280_v46 = vmul.f32 %v9363_v7, %v9056_v5  ;;  %v9364_v44 = vld [vmem:[#allocation45_spill] sm:$0xff] }
 0x1b0   : > { %v1991_v34 = vmul.f32 %v7730_v39, %v9046_v33  ;;  %5025 = vmatprep.subr.mxu1 %v9095_v48  ;;  %3084 = vmatprep.mubr.f32.mxu0 %v9095_v48  ;;  %v2487_v23 = vadd.f32 %v2471_v28, %v2439_v56  ;;  %v2199_v30 = vadd.f32 %v2183_v42, %v2151_v19  ;;  %v8115_v42 = vld [vmem:[%s5483_s13 + $0x1bb] sm:$0xff] }
 0x1b1   : > { %v1911_v37 = vadd.f32 %v1895_v52, %v1863_v12  ;;  %3725 = vmatpush2.msra.mxu0 %v8076_v58  ;;  %v2616_v33 = vmul.f32 %v8102_v62, %v9282_v51  ;;  %v2328_v39 = vmul.f32 %v7980_v21, %v9011_v45  ;;  %v2040_v55 = vmul.f32 %v9352_v15, %v5560_v59  ;;  %v8122_v21 = vld [vmem:[%s8573_s3 + $0xb8] sm:$0xff]  ;;  %v9367_v12 = vld [vmem:[#allocation30_spill] sm:$0xff] }
 0x1b2   : > { %4983 = vmatmul.mubr.msk.f32.gmra.mxu1 %vm2749_vm0, %v9364_v44  ;;  %3726 = vmatprep.subr.mxu0 %v9095_v48  ;;  %v2536_v28 = vadd.f32 %v2520_v26, %v2487_v23  ;;  %v2247_v0 = vadd.f32 %v2231_v35, %v2199_v30  ;;  %v2664_v59 = vmul.f32 %v8115_v42, %v9072_v13  ;;  %v8132_v35 = vpop.f32.mrf.mxu0  ;;  %v9366_v19 = vld [vmem:[#allocation8_spill] sm:$0xff]  ;;  %v8166_v30 = vld [vmem:[%s8573_s3 + $0xa8] sm:$0xff] }
 0x1b3   : > { %v1959_v52 = vadd.f32 %v1943_v3, %v1911_v37  ;;  %5057 = vmatpush1.msra.mxu1 %v9365_v31  ;;  %3727 = vmatpush2.msra.mxu0 %v8096_v14  ;;  %v2376_v15 = vmul.f32 %v7998_v24, %v5619_v36  ;;  %v2088_v26 = vmul.f32 %v9354_v22, %v5563_v60  ;;  %v8135_v3 = vld [vmem:[%s5483_s13 + $0x1bc] sm:$0xff]  ;;  %v8143_v60 = vld [vmem:[%s8573_s3 + $0xb0] sm:$0xff] }
 0x1b4   : > { %5026 = vmatprep.subr.mxu1 %v9095_v48  ;;  %3728 = vmatprep.subr.mxu0 %v9095_v48  ;;  %v2584_v53 = vadd.f32 %v2568_v10, %v2536_v28  ;;  %v2296_v32 = vadd.f32 %v2280_v46, %v2247_v0  ;;  %v2712_v24 = vmul.f32 %v7738_v1, %v8135_v3  ;;  %v4752_v46 = vld [vmem:[%s5483_s13 + $0x1c8] sm:$0xff]  ;;  %v9368_v23 = vld [vmem:[#allocation48_spill] sm:$0xff]  ;;  %v8168_v37 = vpop.f32.mrf.mxu0  ;;  %v9371_v28 = vld [vmem:[#allocation49_spill] sm:$0xff] }
 0x1b5   : > { %v2007_v56 = vadd.f32 %v1991_v34, %v1959_v52  ;;  %5058 = vmatpush1.msra.mxu1 %v9366_v19  ;;  %4985 = vmatprep.mubr.msk.f32.mxu1 %vm2749_vm0, %v9367_v12  ;;  %v2424_v22 = vmul.f32 %v8014_v4, %v5630_v11  ;;  %v2136_v25 = vmul.f32 %v7885_v9, %v5570_v63  ;;  %v9369_v9 = vld [vmem:[#allocation37_spill] sm:$0xff]  ;;  %v4784_v31 = vld [vmem:[%s5483_s13 + $0x1ca] sm:$0xff] }
 0x1b6   : > { %5027 = vmatprep.subr.mxu1 %v9095_v48  ;;  %3729 = vmatpush2.msra.mxu0 %v8122_v21  ;;  %v2632_v10 = vadd.f32 %v2616_v33, %v2584_v53  ;;  %v2344_v7 = vadd.f32 %v2328_v39, %v2296_v32  ;;  %v2472_v4 = vmul.f32 %v8029_v17, %v5640_v50  ;;  %v9370_v17 = vld [vmem:[#allocation51_spill] sm:$0xff] }
 0x1b7   : > { %v2056_v34 = vadd.f32 %v2040_v55, %v2007_v56  ;;  %4986 = vmatmul.mubr.msk.f32.gmra.mxu1 %vm2749_vm0, %v9368_v23  ;;  %3730 = vmatprep.subr.mxu0 %v9095_v48  ;;  %v2184_v63 = vmul.f32 %v7903_v49, %v8960_v16  ;;  %v4768_v55 = vld [vmem:[%s5483_s13 + $0x1c9] sm:$0xff]  ;;  %v2521_v16 = vmul.f32 %v4752_v46, %v5655_v61 }
 0x1b8   : > { %5059 = vmatpush1.msra.mxu1 %v9369_v9  ;;  %3731 = vmatpush2.msra.mxu0 %v8143_v60  ;;  %v2680_v33 = vadd.f32 %v2664_v59, %v2632_v10  ;;  %v2392_v39 = vadd.f32 %v2376_v15, %v2344_v7  ;;  %v2232_v49 = vmul.f32 %v7919_v2, %v5596_v18  ;;  %v8191_v18 = vld [vmem:[%s8573_s3 + $0xa0] sm:$0xff]  ;;  %v8193_v2 = vpop.f32.mrf.mxu0  ;;  %v4800_v32 = vld [vmem:[%s5483_s13 + $0x1cb] sm:$0xff] }
 0x1b9   : > { %v2104_v44 = vadd.f32 %v2088_v26, %v2056_v34  ;;  %5028 = vmatprep.subr.mxu1 %v9095_v48  ;;  %3732 = vmatprep.subr.mxu0 %v9095_v48  ;;  %v2569_v15 = vmul.f32 %v4768_v55, %v9245_v6  ;;  %v9372_v26 = vld [vmem:[#allocation6_spill] sm:$0xff]  ;;  %v2281_v19 = vmul.f32 %v8043_v29, %v9056_v5  ;;  %v9373_v12 = vld [vmem:[#allocation15_spill] sm:$0xff]  ;;  %v9374_v5 = vld [vmem:[#allocation5_spill] sm:$0xff] }
 0x1ba   : > { %5060 = vmatpush1.msra.mxu1 %v9370_v17  ;;  %4988 = vmatprep.mubr.msk.f32.mxu1 %vm2749_vm0, %v9371_v28  ;;  %v8179_v0 = vadd.f32 %v2712_v24, %v2680_v33  ;;  %v2440_v52 = vadd.f32 %v2424_v22, %v2392_v39  ;;  %v2617_v24 = vmul.f32 %v4784_v31, %v9282_v51  ;;  %v8207_v22 = vld [vmem:[%s8573_s3 + $0x98] sm:$0xff]  ;;  %v4816_v10 = vld [vmem:[%s5483_s13 + $0x1cc] sm:$0xff]  ;;  %v8255_v31 = vld [vmem:[%s8573_s3 + $0x80] sm:$0xff] }
 0x1bb   : > { %v2152_v59 = vadd.f32 %v2136_v25, %v2104_v44  ;;  %5029 = vmatprep.subr.mxu1 %v9095_v48  ;;  %3733 = vmatpush2.msra.mxu0 %v8166_v30  ;;  %v2329_v46 = vmul.f32 %v8079_v40, %v9011_v45  ;;  %v2665_v29 = vmul.f32 %v4800_v32, %v9072_v13  ;;  %v9375_v34 = vld [vmem:[#allocation40_spill] sm:$0xff]  ;;  %v8221_v23 = vld [vmem:[%s8573_s3 + $0x90] sm:$0xff]  ;;  %v9381_v32 = vld [vmem:[#allocation13_spill] sm:$0xff] }
 0x1bc   : > { %4989 = vmatmul.mubr.msk.f32.gmra.mxu1 %vm2749_vm0, %v9372_v26  ;;  %3734 = vmatprep.subr.mxu0 %v9095_v48  ;;  %v2488_v53 = vadd.f32 %v2472_v4, %v2440_v52  ;;  %v8223_v4 = vpop.f32.mrf.mxu0  ;;  %v2713_v9 = vmul.f32 %v7738_v1, %v4816_v10  ;;  %v9376_v33 = vld [vmem:[#allocation32_spill] sm:$0xff]  ;;  %v2425_v44 = vmul.f32 %v8115_v42, %v5630_v11  ;;  %v9378_v42 = vld [vmem:[#allocation61_spill] sm:$0xff]  ;;  %v9379_v52 = vld [vmem:[#allocation39_spill] sm:$0xff] }
 0x1bd   : > { %4847 = vmatmul.mubr.msk.f32.gmra.mxu0 %vm2749_vm0, %v8179_v0  ;;  %v2200_v56 = vadd.f32 %v2184_v63, %v2152_v59  ;;  %5061 = vmatpush1.msra.mxu1 %v9373_v12  ;;  %v2377_v63 = vmul.f32 %v8102_v62, %v5619_v36  ;;  %v8240_v36 = vld [vmem:[%s8573_s3 + $0x88] sm:$0xff]  ;;  %v4753_v62 = vld [vmem:[%s5483_s13 + $0x1d0] sm:$0xff]  ;;  %v2473_v11 = vmul.f32 %v8135_v3, %v5640_v50  ;;  %v9380_v3 = vld [vmem:[#allocation44_spill] sm:$0xff] }
 0x1be   : > { %3090 = vmatprep.mubr.f32.mxu0 %v9095_v48  ;;  %5030 = vmatprep.subr.mxu1 %v9095_v48  ;;  %v2537_v25 = vadd.f32 %v2521_v16, %v2488_v53  ;;  %v9377_v16 = vld [vmem:[#allocation42_spill] sm:$0xff]  ;;  %v4769_v59 = vld [vmem:[%s5483_s13 + $0x1d1] sm:$0xff]  ;;  %v2522_v50 = vmul.f32 %v4753_v62, %v5655_v61 }
 0x1bf   : > { %v2248_v7 = vadd.f32 %v2232_v49, %v2200_v56  ;;  %3735 = vmatpush2.msra.mxu0 %v8191_v18  ;;  %5062 = vmatpush1.msra.mxu1 %v9374_v5  ;;  %v8245_v49 = vpop.f32.mrf.mxu0  ;;  %v4785_v53 = vld [vmem:[%s5483_s13 + $0x1d2] sm:$0xff]  ;;  %v2570_v12 = vmul.f32 %v4769_v59, %v9245_v6 }
 0x1c0   : > { %3736 = vmatprep.subr.mxu0 %v9095_v48  ;;  %4991 = vmatprep.mubr.msk.f32.mxu1 %vm2749_vm0, %v9375_v34  ;;  %v2585_v45 = vadd.f32 %v2569_v15, %v2537_v25  ;;  %v4801_v61 = vld [vmem:[%s5483_s13 + $0x1d3] sm:$0xff]  ;;  %v2618_v10 = vmul.f32 %v4785_v53, %v9282_v51  ;;  %v9387_v51 = vld [vmem:[#allocation10_spill] sm:$0xff] }
 0x1c1   : > { %v2297_v40 = vadd.f32 %v2281_v19, %v2248_v7  ;;  %5031 = vmatprep.subr.mxu1 %v9095_v48  ;;  %3737 = vmatpush2.msra.mxu0 %v8207_v22  ;;  %v8269_v56 = vpop.f32.mrf.mxu0  ;;  %v9383_v7 = vld [vmem:[#allocation17_spill] sm:$0xff]  ;;  %v9384_v5 = vld [vmem:[#allocation11_spill] sm:$0xff]  ;;  %v2666_v34 = vmul.f32 %v4801_v61, %v9072_v13  ;;  %v9395_v53 = vld [vmem:[#allocation12_spill] sm:$0xff] }
 0x1c2   : > { %4992 = vmatmul.mubr.msk.f32.gmra.mxu1 %vm2749_vm0, %v9376_v33  ;;  %3738 = vmatprep.subr.mxu0 %v9095_v48  ;;  %v2633_v39 = vadd.f32 %v2617_v24, %v2585_v45  ;;  %v9382_v24 = vld [vmem:[#allocation65_spill] sm:$0xff]  ;;  %v9385_v45 = vld [vmem:[#allocation28_spill] sm:$0xff]  ;;  %v9398_v61 = vld [vmem:[#allocation63_spill] sm:$0xff] }
 0x1c3   : > { %v2345_v55 = vadd.f32 %v2329_v46, %v2297_v40  ;;  %5063 = vmatpush1.msra.mxu1 %v9377_v16  ;;  %3739 = vmatpush2.msra.mxu0 %v8221_v23  ;;  %v4817_v46 = vld [vmem:[%s5483_s13 + $0x1d4] sm:$0xff]  ;;  %v8285_v6 = vpop.f32.mrf.mxu0  ;;  %s207_s13 = sand.u32 1, %s5332_s16  }
 0x1c4   : > { %5032 = vmatprep.subr.mxu1 %v9095_v48  ;;  %3740 = vmatprep.subr.mxu0 %v9095_v48  ;;  %v2681_v17 = vadd.f32 %v2665_v29, %v2633_v39  ;;  %v9386_v40 = vld [vmem:[#allocation47_spill] sm:$0xff]  ;;  %v2714_v33 = vmul.f32 %v7738_v1, %v4817_v46  ;;  %v9388_v39 = vld [vmem:[#allocation22_spill] sm:$0xff]  ;;  %s4095_s22 = sshll.u32 %s207_s13, 8  ;;  %s8525_s18 = scalar_lea.sflag [#allocation3], %s207_s13 }
 0x1c5   : > { %v2393_v28 = vadd.f32 %v2377_v63, %v2345_v55  ;;  %5064 = vmatpush1.msra.mxu1 %v9378_v42  ;;  %4994 = vmatprep.mubr.msk.f32.mxu1 %vm2749_vm0, %v9379_v52  ;;  %v3329_v63 = vmax.f32 %v9387_v51, 0.0  ;;  %v9389_v55 = vld [vmem:[#allocation20_spill] sm:$0xff]  ;;  %v8298_v13 = vpop.f32.mrf.mxu0  ;;  %v9390_v16 = vld [vmem:[#allocation7_spill] sm:$0xff]  ;;  %s8422_s24 = scalar_lea.vmem [#allocation2], %s4095_s22 }
 0x1c6   : > { %5033 = vmatprep.subr.mxu1 %v9095_v48  ;;  %3741 = vmatpush2.msra.mxu0 %v8240_v36  ;;  %v8260_v15 = vadd.f32 %v2713_v9, %v2681_v17  ;;  %v9391_v17 = vld [vmem:[#allocation54_spill] sm:$0xff]  ;;  %v9393_v52 = vld [vmem:[#allocation52_spill] sm:$0xff]  ;;  %s4017_s29 = sshll.u32 %s8422_s24, 4  ;;  %s8519_s29 = int_to_ptr.vmem [resolvable:$true] %s4017_s29 }
 0x1c7   : > { %v2441_v26 = vadd.f32 %v2425_v44, %v2393_v28  ;;  %4995 = vmatmul.mubr.msk.f32.gmra.mxu1 %vm2749_vm0, %v9380_v3  ;;  %3742 = vmatprep.subr.mxu0 %v9095_v48  ;;  %v3393_v62 = vmul.f32 %v3329_v63, %v3329_v63  ;;  %v3331_v28 = vmax.f32 %v9391_v17, 0.0  ;;  %v8310_v59 = vpop.f32.mrf.mxu0  ;;  %v9403_v51 = vld [vmem:[#allocation24_spill] sm:$0xff]  ;;  %v3346_v17 = vmax.f32 %v8132_v35, 0.0  ;;  %s5272_s7 = scalar_lea.vmem %s8519_s29, 4096  ;;  %p5279_p1 = scmp.lt.s32.totalorder %s8519_s29, %s5277_s9 }
 0x1c8   : > { %5065 = vmatpush1.msra.mxu1 %v9381_v32  ;;  %3743 = vmatpush2.msra.mxu0 %v8255_v31  ;;  %v9396_v32 = vld [vmem:[#allocation58_spill] sm:$0xff]  ;;  %v3339_v63 = vmax.f32 %v9403_v51, 0.0  ;;  %v3348_v35 = vmax.f32 %v8193_v2, 0.0  ;;  %p5273_p12 = scmp.ne.s32.totalorder %s8519_s29, %s5272_s7  ;;  %p5280_p2 = scmp.lt.s32.totalorder %s5278_s10, %s5272_s7 }
 0x1c9   : > { %4848 = vmatmul.mubr.msk.f32.gmra.mxu0 %vm2749_vm0, %v8260_v15  ;;  %v2489_v19 = vadd.f32 %v2473_v11, %v2441_v26  ;;  %5034 = vmatprep.subr.mxu1 %v9095_v48  ;;  %v9392_v11 = vld [vmem:[#allocation26_spill] sm:$0xff]  ;;  %v9394_v26 = vld [vmem:[#allocation59_spill] sm:$0xff] }
 0x1ca   : > { %3096 = vmatprep.mubr.f32.mxu0 %v9095_v48  ;;  %5066 = vmatpush2.msra.mxu1 %v9382_v24  ;;  %v3328_v42 = vmax.f32 %v9392_v11, 0.0  ;;  %v3335_v24 = vmax.f32 %v9398_v61, 0.0  ;;  %v3352_v61 = vmax.f32 %v8285_v6, 0.0  ;;  %p5274_p13 = pnand %p5273_p12, %p5419_p4  ;;  %p5281_p3 = por %p5280_p2, %p5279_p1 }
 0x1cb   : > { %v2538_v25 = vadd.f32 %v2522_v50, %v2489_v19  ;;  %4997 = vmatprep.mubr.msk.f32.mxu1 %vm2749_vm0, %v9383_v7  ;;  %5035 = vmatprep.subr.mxu1 %v9095_v48  ;;  %v3333_v50 = vmax.f32 %v9394_v26, 0.0  ;;  %v9397_v19 = vld [vmem:[#allocation64_spill] sm:$0xff]  ;;  %v9400_v7 = vld [vmem:[#allocation33_spill] sm:$0xff] }
 0x1cc   : > { %4998 = vmatmul.mubr.msk.f32.gmra.mxu1 %vm2749_vm0, %v9384_v5  ;;  %v3392_v3 = vmul.f32 %v3328_v42, %v3328_v42  ;;  %v3399_v46 = vmul.f32 %v3335_v24, %v3335_v24  ;;  %v9401_v5 = vld [vmem:[#allocation50_spill] sm:$0xff]  ;;  %p5275_p0 = pneg %p5274_p13 }
 0x1cd   : > { %v2586_v29 = vadd.f32 %v2570_v12, %v2538_v25  ;;  %5067 = vmatpush2.msra.mxu1 %v9385_v45  ;;  %5000 = vmatprep.mubr.msk.f32.mxu1 %vm2749_vm0, %v9386_v40  ;;  %v3397_v12 = vmul.f32 %v3333_v50, %v3333_v50  ;;  %v9399_v25 = vld [vmem:[#allocation57_spill] sm:$0xff]  ;;  %v3342_v50 = vmax.f32 %v7994_v20, 0.0 }
 0x1ce   : > { %5036 = vmatprep.subr.mxu1 %v9095_v48  ;;  %p5282_p5 = pnand %p5281_p3, %p5275_p0 }
 0x1cf   : > { %v2634_v9 = vadd.f32 %v2618_v10, %v2586_v29  ;;  %5068 = vmatpush2.msra.mxu1 %v9388_v39  ;;  %v3332_v10 = vmax.f32 %v9399_v25, 0.0  ;;  %v3337_v29 = vmax.f32 %v9401_v5, 0.0  ;;  %v3403_v39 = vmul.f32 %v3339_v63, %v3339_v63 }
 0x1d0   : > { %5037 = vmatprep.subr.mxu1 %v9095_v48  ;;  %5001 = vmatmul.mubr.msk.f32.gmra.mxu1 %vm2749_vm0, %v9389_v55  ;;  %v3406_v2 = vmul.f32 %v3342_v50, %v3342_v50 }
 0x1d1   : > { %v2682_v44 = vadd.f32 %v2666_v34, %v2634_v9  ;;  %5069 = vmatpush2.msra.mxu1 %v7956_v54  ;;  %5003 = vmatprep.mubr.msk.f32.mxu1 %vm2749_vm0, %v9390_v16  ;;  %v3395_v54 = vmul.f32 %v3331_v28, %v3331_v28  ;;  %v9402_v34 = vld [vmem:[#allocation62_spill] sm:$0xff]  ;;  %v3401_v40 = vmul.f32 %v3337_v29, %v3337_v29  ;;  %v3349_v16 = vmax.f32 %v8223_v4, 0.0 }
 0x1d2   : > { %5038 = vmatprep.subr.mxu1 %v9095_v48  ;;  %v3334_v45 = vmax.f32 %v9402_v34, 0.0  ;;  %v3351_v4 = vmax.f32 %v8269_v56, 0.0 }
 0x1d3   : > { %v2730_v1 = vadd.f32 %v2714_v33, %v2682_v44  ;;  %5070 = vmatpush2.msra.mxu1 %v8011_v27  ;;  %v3330_v27 = vmax.f32 %v9395_v53, 0.0  ;;  %v3344_v33 = vmax.f32 %v8060_v43, 0.0  ;;  %v9406_v44 = vld [vmem:[#allocation66_spill] sm:$0xff]  ;;  %v3412_v53 = vmul.f32 %v3348_v35, %v3348_v35 }
 0x1d4   : > { %5039 = vmatprep.subr.mxu1 %v9095_v48  ;;  %5004 = vmatmul.mubr.msk.f32.gmra.mxu1 %vm2749_vm0, %v9393_v52  ;;  %v3413_v52 = vmul.f32 %v3349_v16, %v3349_v16 }
 0x1d5   : > { %4849 = vmatmul.mubr.msk.f32.gmra.mxu0 %vm2749_vm0, %v2730_v1  ;;  %5071 = vmatpush2.msra.mxu1 %v8051_v8  ;;  %v8323_v8 = vpop.f32.mrf.mxu0 }
 0x1d6   : > { %3744 = vmatprep.mubr.f32.mxu0 %v3393_v62  ;;  %5040 = vmatprep.subr.mxu1 %v9095_v48  ;;  %v3408_v62 = vmul.f32 %v3344_v33, %v3344_v33 }
 0x1d7   : > { %5072 = vmatpush2.msra.mxu1 %v8076_v58  ;;  %5006 = vmatprep.mubr.msk.f32.mxu1 %vm2749_vm0, %v9396_v32  ;;  %v3394_v58 = vmul.f32 %v3330_v27, %v3330_v27  ;;  %v3350_v27 = vmax.f32 %v8245_v49, 0.0  ;;  %v3416_v49 = vmul.f32 %v3352_v61, %v3352_v61 }
 0x1d8   : > { %5041 = vmatprep.subr.mxu1 %v9095_v48  ;;  %5007 = vmatmul.mubr.msk.f32.gmra.mxu1 %vm2749_vm0, %v9397_v19  ;;  %v3355_v19 = vmax.f32 %v8323_v8, 0.0 }
 0x1d9   : > { %3745 = vmatmul.mubr.f32.vlgmr.msra.gmra.mxu0 %v3392_v3  ;;  %5073 = vmatpush2.msra.mxu1 %v8096_v14  ;;  %v8335_v14 = vpop.f32.mrf.mxu0  ;;  %v3353_v3 = vmax.f32 %v8298_v13, 0.0 }
 0x1da   : > { %3749 = vmatprep.mubr.f32.mxu0 %v3395_v54  ;;  %5042 = vmatprep.subr.mxu1 %v9095_v48  ;;  %v3410_v54 = vmul.f32 %v3346_v17, %v3346_v17  ;;  %v3419_v24 = vmul.f32 %v3355_v19, %v3355_v19  ;;  %v3356_v8 = vmax.f32 %v8335_v14, 0.0 }
 0x1db   : > { %5074 = vmatpush2.msra.mxu1 %v8122_v21  ;;  %5009 = vmatprep.mubr.msk.f32.mxu1 %vm2749_vm0, %v9400_v7  ;;  %v3396_v21 = vmul.f32 %v3332_v10, %v3332_v10  ;;  %v3417_v56 = vmul.f32 %v3353_v3, %v3353_v3 }
 0x1dc   : > { %5043 = vmatprep.subr.mxu1 %v9095_v48  ;;  %5010 = vmatmul.mubr.msk.f32.gmra.mxu1 %vm2749_vm0, %v7972_v41  ;;  %v3345_v41 = vmax.f32 %v8098_v38, 0.0 }
 0x1dd   : > { %3750 = vmatmul.mubr.f32.gmra.mxu0 %v3394_v58  ;;  %5075 = vmatpush2.msra.mxu1 %v8143_v60  ;;  %v8348_v60 = vpop.f32.mrf.mxu0  ;;  %v3354_v58 = vmax.f32 %v8310_v59, 0.0 }
 0x1de   : > { %3754 = vmatprep.mubr.f32.mxu0 %v3397_v12  ;;  %5044 = vmatprep.subr.mxu1 %v9095_v48  ;;  %v3409_v38 = vmul.f32 %v3345_v41, %v3345_v41  ;;  %v3414_v12 = vmul.f32 %v3350_v27, %v3350_v27  ;;  %v3357_v13 = vmax.f32 %v8348_v60, 0.0 }
 0x1df   : > { %5076 = vmatpush2.msra.mxu1 %v8166_v30  ;;  %5012 = vmatprep.mubr.msk.f32.mxu1 %vm2749_vm0, %v8065_v47  ;;  %v3398_v30 = vmul.f32 %v3334_v45, %v3334_v45  ;;  %v9404_v47 = vld [vmem:[#allocation55_spill] sm:$0xff] }
 0x1e0   : > { %5045 = vmatprep.subr.mxu1 %v9095_v48  ;;  %5013 = vmatmul.mubr.msk.f32.gmra.mxu1 %vm2749_vm0, %v8179_v0  ;;  %v3336_v9 = vmax.f32 %v9404_v47, 0.0  ;;  %v3347_v0 = vmax.f32 %v8168_v37, 0.0  ;;  %v3338_v37 = vmax.f32 %v9406_v44, 0.0  ;;  %v3421_v10 = vmul.f32 %v3357_v13, %v3357_v13 }
 0x1e1   : > { %3755 = vmatmul.mubr.f32.gmra.mxu0 %v3396_v21  ;;  %5077 = vmatpush2.msra.mxu1 %v8191_v18  ;;  %v8361_v18 = vpop.f32.mrf.mxu0  ;;  %v3420_v21 = vmul.f32 %v3356_v8, %v3356_v8 }
 0x1e2   : > { %3759 = vmatprep.mubr.f32.mxu0 %v3399_v46  ;;  %5046 = vmatprep.subr.mxu1 %v9095_v48  ;;  %v3411_v43 = vmul.f32 %v3347_v0, %v3347_v0  ;;  %v3402_v11 = vmul.f32 %v3338_v37, %v3338_v37  ;;  %v3418_v46 = vmul.f32 %v3354_v58, %v3354_v58  ;;  %v3358_v34 = vmax.f32 %v8361_v18, 0.0 }
 0x1e3   : > { %5078 = vmatpush2.msra.mxu1 %v8207_v22  ;;  %5015 = vmatprep.mubr.msk.f32.mxu1 %vm2749_vm0, %v8260_v15  ;;  %v9405_v22 = vld [vmem:[#allocation29_spill] sm:$0xff]  ;;  %v3400_v15 = vmul.f32 %v3336_v9, %v3336_v9 }
 0x1e4   : > { %5047 = vmatprep.subr.mxu1 %v9095_v48  ;;  %5016 = vmatmul.mubr.msk.f32.gmra.mxu1 %vm2749_vm0, %v2730_v1  ;;  %v3341_v55 = vmax.f32 %v9405_v22, 0.0  ;;  %v3343_v1 = vmax.f32 %v8026_v57, 0.0  ;;  %v3415_v57 = vmul.f32 %v3351_v4, %v3351_v4  ;;  %v3422_v60 = vmul.f32 %v3358_v34, %v3358_v34 }
 0x1e5   : > { %3760 = vmatmul.mubr.f32.gmra.mxu0 %v3398_v30  ;;  %5079 = vmatpush2.msra.mxu1 %v8221_v23  ;;  %v3004_v23 = vpop.f32.mrf.mxu0 }
 0x1e6   : > { %3764 = vmatprep.mubr.f32.mxu0 %v3401_v40  ;;  %5048 = vmatprep.subr.mxu1 %v9095_v48  ;;  %v3405_v28 = vmul.f32 %v3341_v55, %v3341_v55  ;;  %v3407_v26 = vmul.f32 %v3343_v1, %v3343_v1  ;;  %v3359_v7 = vmax.f32 %v3004_v23, 0.0 }
 0x1e7   : > { %5080 = vmatpush2.msra.mxu1 %v8240_v36  ;;  %3784 = vmatprep.mubr.f32.mxu1 %v3409_v38  ;;  %v9407_v36 = vld [vmem:[#allocation35_spill] sm:$0xff] }
 0x1e8   : > { %5049 = vmatprep.subr.mxu1 %v9095_v48  ;;  %v3340_v42 = vmax.f32 %v9407_v36, 0.0  ;;  %v3008_v48 = vpop.f32.mrf.mxu0  ;;  %v3423_v6 = vmul.f32 %v3359_v7, %v3359_v7 }
 0x1e9   : > { %3765 = vmatmul.mubr.f32.gmra.mxu0 %v3400_v15  ;;  %5081 = vmatpush2.msra.mxu1 %v8255_v31  ;;  %v3360_v40 = vmax.f32 %v3008_v48, 0.0 }
 0x1ea   : > { %3769 = vmatprep.mubr.f32.mxu0 %v3403_v39  ;;  %3785 = vmatmul.mubr.f32.vlgmr.msra.gmra.mxu1 %v3408_v62  ;;  %v3404_v31 = vmul.f32 %v3340_v42, %v3340_v42  ;;  %v3010_v32 = vpop.f32.mrf.mxu0 }
 0x1eb   : > { %3789 = vmatprep.mubr.f32.mxu1 %v3411_v43  ;;  %v3361_v29 = vmax.f32 %v3010_v32, 0.0  ;;  %v3424_v30 = vmul.f32 %v3360_v40, %v3360_v40 }
 0x1ec   : > { %v3014_v20 = vpop.f32.mrf.mxu0 }
 0x1ed   : > { %3770 = vmatmul.mubr.f32.gmra.mxu0 %v3402_v11  ;;  %v3425_v41 = vmul.f32 %v3361_v29, %v3361_v29  ;;  %v3362_v47 = vmax.f32 %v3014_v20, 0.0 }
 0x1ee   : > { %3774 = vmatprep.mubr.f32.mxu0 %v3405_v28  ;;  %3790 = vmatmul.mubr.f32.gmra.mxu1 %v3410_v54  ;;  %v3016_v25 = vpop.f32.mrf.mxu0 }
 0x1ef   : > { %3794 = vmatprep.mubr.f32.mxu1 %v3413_v52  ;;  %v3363_v59 = vmax.f32 %v3016_v25, 0.0  ;;  %v3426_v33 = vmul.f32 %v3362_v47, %v3362_v47 }
 0x1f0   : > { %v3020_v5 = vpop.f32.mrf.mxu0 }
 0x1f1   : > { %3775 = vmatmul.mubr.f32.gmra.mxu0 %v3404_v31  ;;  %v3427_v63 = vmul.f32 %v3363_v59, %v3363_v59  ;;  %v3364_v18 = vmax.f32 %v3020_v5, 0.0 }
 0x1f2   : > { %3779 = vmatprep.mubr.f32.mxu0 %v3407_v26  ;;  %3795 = vmatmul.mubr.f32.gmra.mxu1 %v3412_v53  ;;  %v3022_v45 = vpop.f32.mrf.mxu0 }
 0x1f3   : > { %3799 = vmatprep.mubr.f32.mxu1 %v3415_v57  ;;  %v3365_v14 = vmax.f32 %v3022_v45, 0.0  ;;  %v3428_v55 = vmul.f32 %v3364_v18, %v3364_v18 }
 0x1f5   : > { %3780 = vmatmul.mubr.f32.gmra.mxu0 %v3406_v2  ;;  %v3429_v38 = vmul.f32 %v3365_v14, %v3365_v14 }
 0x1f6   : > { %3800 = vmatmul.mubr.f32.gmra.mxu1 %v3414_v12 }
 0x1f7   : > { %3804 = vmatprep.mubr.f32.mxu1 %v3417_v56 }
 0x1f8   : > { %v3026_v51 = vpop.f32.mrf.mxu0 }
 0x1f9   : > { %v3366_v15 = vmax.f32 %v3026_v51, 0.0 }
 0x1fa   : > { %3805 = vmatmul.mubr.f32.gmra.mxu1 %v3416_v49  ;;  %v3028_v9 = vpop.f32.mrf.mxu0 }
 0x1fb   : > { %3809 = vmatprep.mubr.f32.mxu1 %v3419_v24  ;;  %v3367_v0 = vmax.f32 %v3028_v9, 0.0  ;;  %v3430_v16 = vmul.f32 %v3366_v15, %v3366_v15 }
 0x1fd   : > { %v3431_v22 = vmul.f32 %v3367_v0, %v3367_v0 }
 0x1fe   : > { %3810 = vmatmul.mubr.f32.gmra.mxu1 %v3418_v46 }
 0x1ff   : > { %3814 = vmatprep.mubr.f32.mxu1 %v3421_v10 }
 0x202   : > { %3815 = vmatmul.mubr.f32.gmra.mxu1 %v3420_v21 }
 0x203   : > { %3819 = vmatprep.mubr.f32.mxu1 %v3423_v6 }
 0x204   : > { %v3032_v39 = vpop.f32.mrf.mxu0 }
 0x205   : > { %v3368_v62 = vmax.f32 %v3032_v39, 0.0 }
 0x206   : > { %3820 = vmatmul.mubr.f32.gmra.mxu1 %v3422_v60  ;;  %v3034_v44 = vpop.f32.mrf.mxu0 }
 0x207   : > { %3824 = vmatprep.mubr.f32.mxu1 %v3425_v41  ;;  %v3369_v37 = vmax.f32 %v3034_v44, 0.0  ;;  %v3432_v17 = vmul.f32 %v3368_v62, %v3368_v62 }
 0x209   : > { %v3433_v43 = vmul.f32 %v3369_v37, %v3369_v37 }
 0x20a   : > { %3825 = vmatmul.mubr.f32.gmra.mxu1 %v3424_v30 }
 0x20b   : > { %3829 = vmatprep.mubr.f32.mxu1 %v3427_v63 }
 0x20e   : > { %3830 = vmatmul.mubr.f32.gmra.mxu1 %v3426_v33 }
 0x20f   : > { %3834 = vmatprep.mubr.f32.mxu1 %v3429_v38 }
 0x212   : > { %3835 = vmatmul.mubr.f32.gmra.mxu1 %v3428_v55  ;;  %v3038_v23 = vpop.f32.mrf.mxu0 }
 0x213   : > { %3839 = vmatprep.mubr.f32.mxu1 %v3431_v22  ;;  %v3370_v28 = vmax.f32 %v3038_v23, 0.0 }
 0x214   : > { %v3040_v1 = vpop.f32.mrf.mxu0 }
 0x215   : > { %v3371_v11 = vmax.f32 %v3040_v1, 0.0  ;;  %v3434_v42 = vmul.f32 %v3370_v28, %v3370_v28 }
 0x216   : > { %3840 = vmatmul.mubr.f32.gmra.mxu1 %v3430_v16 }
 0x217   : > { %3844 = vmatprep.mubr.f32.mxu1 %v3433_v43  ;;  %v3435_v36 = vmul.f32 %v3371_v11, %v3371_v11 }
 0x21a   : > { %3845 = vmatmul.mubr.f32.gmra.mxu1 %v3432_v17 }
 0x21b   : > { %3849 = vmatprep.mubr.f32.mxu1 %v3435_v36 }
 0x21e   : > { %3850 = vmatmul.mubr.f32.gmra.mxu1 %v3434_v42 }
 0x220   : > { %v3044_v52 = vpop.f32.mrf.mxu0 }
 0x221   : > { %v3372_v4 = vmax.f32 %v3044_v52, 0.0 }
 0x222   : > { %v3046_v54 = vpop.f32.mrf.mxu0 }
 0x223   : > { %v3373_v35 = vmax.f32 %v3046_v54, 0.0  ;;  %v3436_v26 = vmul.f32 %v3372_v4, %v3372_v4 }
 0x225   : > { %v3437_v48 = vmul.f32 %v3373_v35, %v3373_v35 }
 0x227   : > { %3854 = vmatprep.mubr.f32.mxu1 %v3437_v48 }
 0x228   : > { %3855 = vmatmul.mubr.f32.gmra.mxu1 %v3436_v26 }
 0x22d   : > { %v3050_v31 = vpop.f32.mrf.mxu0 }
 0x22e   : > { %v3374_v50 = vmax.f32 %v3050_v31, 0.0 }
 0x22f   : > { %v3052_v57 = vpop.f32.mrf.mxu0 }
 0x230   : > { %v3375_v3 = vmax.f32 %v3052_v57, 0.0  ;;  %v3438_v27 = vmul.f32 %v3374_v50, %v3374_v50 }
 0x232   : > { %v3439_v53 = vmul.f32 %v3375_v3, %v3375_v3 }
 0x234   : > { %3859 = vmatprep.mubr.f32.mxu1 %v3439_v53 }
 0x235   : > { %3860 = vmatmul.mubr.f32.gmra.mxu1 %v3438_v27 }
 0x23b   : > { %v3056_v32 = vpop.f32.mrf.mxu0 }
 0x23c   : > { %v3376_v2 = vmax.f32 %v3056_v32, 0.0 }
 0x23d   : > { %v3058_v56 = vpop.f32.mrf.mxu0 }
 0x23e   : > { %v3377_v19 = vmax.f32 %v3058_v56, 0.0  ;;  %v3440_v61 = vmul.f32 %v3376_v2, %v3376_v2 }
 0x240   : > { %v3441_v12 = vmul.f32 %v3377_v19, %v3377_v19 }
 0x242   : > { %3864 = vmatprep.mubr.f32.mxu1 %v3441_v12 }
 0x243   : > { %3865 = vmatmul.mubr.f32.gmra.mxu1 %v3440_v61 }
 0x244   : > { %v4972_v10 = vpop.f32.mrf.mxu1 }
 0x245   : > { %v4883_v43 = vmul.f32 -1.442695, %v4972_v10 }
 0x246   : > { %v3169_v7 = vpop.f32.mrf.mxu1 }
 0x247   : > { %v4882_v18 = vmul.f32 -1.442695, %v3169_v7 }
 0x249   : > { %v3062_v20 = vpop.f32.mrf.mxu0  ;;  %5141 = vpow2.f32 %v4882_v18 }
 0x24a   : > { %v3378_v24 = vmax.f32 %v3062_v20, 0.0  ;;  %5143 = vpow2.f32 %v4883_v43 }
 0x24b   : > { %v3064_v13 = vpop.f32.mrf.mxu0 }
 0x24c   : > { %v3379_v49 = vmax.f32 %v3064_v13, 0.0  ;;  %v3442_v25 = vmul.f32 %v3378_v24, %v3378_v24 }
 0x24e   : > { %v3443_v58 = vmul.f32 %v3379_v49, %v3379_v49 }
 0x250   : > { %3869 = vmatprep.mubr.f32.mxu1 %v3443_v58  ;;  %v4975_v6 = vpop.f32.mrf.mxu1 }
 0x251   : > { %3870 = vmatmul.mubr.f32.gmra.mxu1 %v3442_v25  ;;  %v4885_v42 = vmul.f32 -1.442695, %v4975_v6 }
 0x252   : > { %v3179_v45 = vpop.f32.mrf.mxu1 }
 0x253   : > { %v4884_v62 = vmul.f32 -1.442695, %v3179_v45 }
 0x255   : > { %5145 = vpow2.f32 %v4884_v62 }
 0x256   : > { %v3068_v46 = vpop.f32.mrf.mxu0  ;;  %v5142_v54 = vpop.eup %5141  ;;  %5147 = vpow2.f32 %v4885_v42 }
 0x257   : > { %v3380_v8 = vmax.f32 %v3068_v46, 0.0  ;;  %v3552_v50 = vadd.f32 1.0, %v5142_v54  ;;  %v5144_v27 = vpop.eup %5143 }
 0x258   : > { %v3070_v5 = vpop.f32.mrf.mxu0  ;;  %v3553_v24 = vadd.f32 1.0, %v5144_v27 }
 0x259   : > { %v3381_v29 = vmax.f32 %v3070_v5, 0.0  ;;  %v3444_v34 = vmul.f32 %v3380_v8, %v3380_v8 }
 0x25b   : > { %v3445_v21 = vmul.f32 %v3381_v29, %v3381_v29 }
 0x25d   : > { %3874 = vmatprep.mubr.f32.mxu1 %v3445_v21  ;;  %v4978_v41 = vpop.f32.mrf.mxu1 }
 0x25e   : > { %3875 = vmatmul.mubr.f32.gmra.mxu1 %v3444_v34  ;;  %v4887_v57 = vmul.f32 -1.442695, %v4978_v41 }
 0x25f   : > { %v3189_v51 = vpop.f32.mrf.mxu1 }
 0x260   : > { %v4886_v48 = vmul.f32 -1.442695, %v3189_v51 }
 0x262   : > { %5149 = vpow2.f32 %v4886_v48  ;;  %v5146_v56 = vpop.eup %5145 }
 0x263   : > { %v3074_v59 = vpop.f32.mrf.mxu0  ;;  %v3554_v25 = vadd.f32 1.0, %v5146_v56  ;;  %v5148_v6 = vpop.eup %5147 }
 0x264   : > { %v3382_v60 = vmax.f32 %v3074_v59, 0.0  ;;  %v3555_v34 = vadd.f32 1.0, %v5148_v6 }
 0x265   : > { %v3076_v40 = vpop.f32.mrf.mxu0 }
 0x266   : > { %v3383_v63 = vmax.f32 %v3076_v40, 0.0  ;;  %v3446_v30 = vmul.f32 %v3382_v60, %v3382_v60 }
 0x268   : > { %v3447_v14 = vmul.f32 %v3383_v63, %v3383_v63 }
 0x269   : > { %v8385_v47 = vpop.f32.mrf.mxu1 }
 0x26a   : > { %3879 = vmatprep.mubr.f32.mxu1 %v3447_v14  ;;  %v4889_v46 = vmul.f32 -1.442695, %v8385_v47 }
 0x26b   : > { %3880 = vmatmul.mubr.f32.gmra.mxu1 %v3446_v30  ;;  %v3199_v9 = vpop.f32.mrf.mxu1 }
 0x26c   : > { %v4888_v61 = vmul.f32 -1.442695, %v3199_v9 }
 0x26f   : > { %v3080_v38 = vpop.f32.mrf.mxu0  ;;  %v5150_v21 = vpop.eup %5149 }
 0x270   : > { %v3384_v0 = vmax.f32 %v3080_v38, 0.0  ;;  %v3556_v30 = vadd.f32 1.0, %v5150_v21 }
 0x271   : > { %v3082_v33 = vpop.f32.mrf.mxu0 }
 0x272   : > { %v4984_v39 = vpop.f32.mrf.mxu1  ;;  %v3385_v22 = vmax.f32 %v3082_v33, 0.0  ;;  %v3448_v44 = vmul.f32 %v3384_v0, %v3384_v0 }
 0x273   : > { %v4891_v53 = vmul.f32 -1.442695, %v4984_v39 }
 0x274   : > { %v3209_v55 = vpop.f32.mrf.mxu1  ;;  %v3449_v15 = vmul.f32 %v3385_v22, %v3385_v22 }
 0x275   : > { %v4890_v31 = vmul.f32 -1.442695, %v3209_v55 }
 0x276   : > { %3884 = vmatprep.mubr.f32.mxu1 %v3449_v15 }
 0x277   : > { %v4987_v37 = vpop.f32.mrf.mxu1  ;;  %3885 = vmatmul.mubr.f32.gmra.mxu1 %v3448_v44  ;;  %5151 = vpow2.f32 %v4890_v31 }
 0x278   : > { %5153 = vrcp.f32 %v3552_v50  ;;  %v4893_v8 = vmul.f32 -1.442695, %v4987_v37 }
 0x279   : > { %v3219_v16 = vpop.f32.mrf.mxu1  ;;  %5155 = vpow2.f32 %v4887_v57 }
 0x27a   : > { %5157 = vpow2.f32 %v4891_v53  ;;  %v4892_v49 = vmul.f32 -1.442695, %v3219_v16 }
 0x27b   : > { %5159 = vpow2.f32 %v4888_v61 }
 0x27c   : > { %v8387_v17 = vpop.f32.mrf.mxu1  ;;  %5161 = vrcp.f32 %v3553_v24 }
 0x27d   : > { %v3086_v23 = vpop.f32.mrf.mxu0  ;;  %5163 = vpow2.f32 %v4892_v49  ;;  %v4895_v38 = vmul.f32 -1.442695, %v8387_v17 }
 0x27e   : > { %v3229_v28 = vpop.f32.mrf.mxu1  ;;  %v3386_v1 = vmax.f32 %v3086_v23, 0.0  ;;  %5165 = vrcp.f32 %v3554_v25 }
 0x27f   : > { %v3088_v11 = vpop.f32.mrf.mxu0  ;;  %5167 = vpow2.f32 %v4889_v46  ;;  %v4894_v59 = vmul.f32 -1.442695, %v3229_v28 }
 0x280   : > { %v3387_v36 = vmax.f32 %v3088_v11, 0.0  ;;  %v3450_v35 = vmul.f32 %v3386_v1, %v3386_v1  ;;  %5169 = vpow2.f32 %v4893_v8 }
 0x281   : > { %5171 = vrcp.f32 %v3555_v34 }
 0x282   : > { %v3451_v52 = vmul.f32 %v3387_v36, %v3387_v36  ;;  %v8389_v4 = vpop.f32.mrf.mxu1  ;;  %5173 = vpow2.f32 %v4894_v59 }
 0x283   : > { %5175 = vrcp.f32 %v3556_v30  ;;  %v4897_v50 = vmul.f32 -1.442695, %v8389_v4 }
 0x284   : > { %3889 = vmatprep.mubr.f32.mxu1 %v3451_v52  ;;  %v8391_v26 = vpop.f32.mrf.mxu1  ;;  %v5152_v60 = vpop.eup %5151  ;;  %5177 = vpow2.f32 %v4895_v38 }
 0x285   : > { %3890 = vmatmul.mubr.f32.gmra.mxu1 %v3450_v35  ;;  %v5154_v51 = vpop.eup %5153  ;;  %v3560_v18 = vadd.f32 1.0, %v5152_v60  ;;  %v4896_v1 = vmul.f32 -1.442695, %v8391_v26 }
 0x286   : > { %v5156_v47 = vpop.eup %5155 }
 0x287   : > { %v8393_v3 = vpop.f32.mrf.mxu1  ;;  %v5158_v33 = vpop.eup %5157  ;;  %v3557_v37 = vadd.f32 1.0, %v5156_v47  ;;  %5179 = vrcp.f32 %v3560_v18 }
 0x288   : > { %v5160_v16 = vpop.eup %5159  ;;  %v3561_v62 = vadd.f32 1.0, %v5158_v33  ;;  %v4899_v21 = vmul.f32 -1.442695, %v8393_v3 }
 0x289   : > { %v3092_v32 = vpop.f32.mrf.mxu0  ;;  %v8395_v2 = vpop.f32.mrf.mxu1  ;;  %5181 = vrcp.f32 %v3557_v37  ;;  %v3558_v35 = vadd.f32 1.0, %v5160_v16 }
 0x28a   : > { %v3388_v19 = vmax.f32 %v3092_v32, 0.0  ;;  %v5162_v28 = vpop.eup %5161  ;;  %5183 = vrcp.f32 %v3561_v62 }
 0x28b   : > { %v3094_v12 = vpop.f32.mrf.mxu0  ;;  %v5164_v36 = vpop.eup %5163  ;;  %5185 = vpow2.f32 %v4896_v1 }
 0x28c   : > { %v3389_v20 = vmax.f32 %v3094_v12, 0.0  ;;  %v8397_v13 = vpop.f32.mrf.mxu1  ;;  %v3452_v7 = vmul.f32 %v3388_v19, %v3388_v19  ;;  %v5166_v54 = vpop.eup %5165  ;;  %v3562_v27 = vadd.f32 1.0, %v5164_v36  ;;  %5187 = vrcp.f32 %v3558_v35 }
 0x28d   : > { %v5168_v31 = vpop.eup %5167  ;;  %5189 = vpow2.f32 %v4897_v50 }
 0x28e   : > { %v3453_v58 = vmul.f32 %v3389_v20, %v3389_v20  ;;  %v8399_v10 = vpop.f32.mrf.mxu1  ;;  %v5170_v53 = vpop.eup %5169  ;;  %v3559_v12 = vadd.f32 1.0, %v5168_v31  ;;  %5191 = vrcp.f32 %v3562_v27 }
 0x28f   : > { %v3563_v20 = vadd.f32 1.0, %v5170_v53  ;;  %v5172_v49 = vpop.eup %5171 }
 0x290   : > { %3894 = vmatprep.mubr.f32.mxu1 %v3453_v58  ;;  %v8402_v5 = vpop.f32.mrf.mxu1  ;;  %v4898_v58 = vmul.f32 -1.442695, %v8395_v2  ;;  %5193 = vrcp.f32 %v3559_v12 }
 0x291   : > { %3895 = vmatmul.mubr.f32.gmra.mxu1 %v3452_v7  ;;  %v5174_v7 = vpop.eup %5173  ;;  %5195 = vrcp.f32 %v3563_v20 }
 0x292   : > { %v8404_v29 = vpop.f32.mrf.mxu1  ;;  %v5176_v6 = vpop.eup %5175  ;;  %v3564_v60 = vadd.f32 1.0, %v5174_v7  ;;  %5197 = vpow2.f32 %v4898_v58 }
 0x293   : > { %v5178_v59 = vpop.eup %5177  ;;  %5199 = vpow2.f32 %v4899_v21 }
 0x294   : > { %v8407_v45 = vpop.f32.mrf.mxu1  ;;  %v3565_v38 = vadd.f32 1.0, %v5178_v59  ;;  %5201 = vrcp.f32 %v3564_v60 }
 0x295   : > { %v3098_v41 = vpop.f32.mrf.mxu0 }
 0x296   : > { %v8409_v40 = vpop.f32.mrf.mxu1  ;;  %v3390_v63 = vmax.f32 %v3098_v41, 0.0  ;;  %5203 = vrcp.f32 %v3565_v38 }
 0x297   : > { %v3100_v14 = vpop.f32.mrf.mxu0 }
 0x298   : > { %v3391_v9 = vmax.f32 %v3100_v14, 0.0  ;;  %v8414_v0 = vpop.f32.mrf.mxu1  ;;  %v3454_v44 = vmul.f32 %v3390_v63, %v3390_v63 }
 0x299   : > { %v3746_v39 = vpop.f32.mrf.mxu0 }
 0x29a   : > { %v3455_v22 = vmul.f32 %v3391_v9, %v3391_v9  ;;  %v3905_v55 = vmul.f32 %v5154_v51, %v3746_v39  ;;  %v8416_v15 = vpop.f32.mrf.mxu1  ;;  %v5180_v51 = vpop.eup %5179  ;;  %v4900_v39 = vmul.f32 -1.442695, %v8399_v10 }
 0x29b   : > { %v3748_v43 = vpop.f32.mrf.mxu0  ;;  %v5182_v9 = vpop.eup %5181 }
 0x29c   : > { %3899 = vmatprep.mubr.f32.mxu1 %v3455_v22  ;;  %v3937_v17 = vsel %vm2749_vm0, %v3905_v55, 0.0  ;;  %v8419_v23 = vpop.f32.mrf.mxu1  ;;  %v5184_v18 = vpop.eup %5183  ;;  %5205 = vpow2.f32 %v4900_v39 }
 0x29d   : > { %3900 = vmatmul.mubr.f32.gmra.mxu1 %v3454_v44  ;;  %3969 = vst [vmem:[%s8422_s24] sm:$0xff] %v3937_v17  ;;  %v3751_v11 = vpop.f32.mrf.mxu0  ;;  %v5186_v44 = vpop.eup %5185 }
 0x29e   : > { %v3906_v42 = vmul.f32 %v5162_v28, %v3751_v11  ;;  %v8425_v52 = vpop.f32.mrf.mxu1  ;;  %v5188_v17 = vpop.eup %5187  ;;  %v4901_v28 = vmul.f32 -1.442695, %v8397_v13  ;;  %v3566_v36 = vadd.f32 1.0, %v5186_v44  ;;  %v4902_v13 = vmul.f32 -1.442695, %v8404_v29 }
 0x29f   : > { %v3753_v48 = vpop.f32.mrf.mxu0  ;;  %v5190_v10 = vpop.eup %5189 }
 0x2a0   : > { %v3938_v26 = vsel %vm2749_vm0, %v3906_v42, 0.0  ;;  %v8429_v57 = vpop.f32.mrf.mxu1  ;;  %v5192_v35 = vpop.eup %5191  ;;  %5207 = vpow2.f32 %v4901_v28  ;;  %v3567_v12 = vadd.f32 1.0, %v5190_v10 }
 0x2a1   : > { %3970 = vst [vmem:[%s8422_s24 + $0x8] sm:$0xff] %v3938_v26  ;;  %v3756_v32 = vpop.f32.mrf.mxu0  ;;  %v5194_v53 = vpop.eup %5193  ;;  %5209 = vrcp.f32 %v3566_v36 }
 0x2a2   : > { %v3907_v56 = vmul.f32 %v5166_v54, %v3756_v32  ;;  %v8432_v19 = vpop.f32.mrf.mxu1  ;;  %5211 = vpow2.f32 %v4902_v13 }
 0x2a3   : > { %v3758_v61 = vpop.f32.mrf.mxu0  ;;  %5213 = vrcp.f32 %v3567_v12 }
 0x2a4   : > { %v3939_v4 = vsel %vm2749_vm0, %v3907_v56, 0.0  ;;  %v8435_v24 = vpop.f32.mrf.mxu1  ;;  %v5196_v56 = vpop.eup %5195 }
 0x2a5   : > { %3971 = vst [vmem:[%s8422_s24 + $0x10] sm:$0xff] %v3939_v4  ;;  %v3761_v25 = vpop.f32.mrf.mxu0  ;;  %v5198_v4 = vpop.eup %5197 }
 0x2a6   : > { %v3908_v46 = vmul.f32 %v5172_v49, %v3761_v25  ;;  %v8441_v41 = vpop.f32.mrf.mxu1 }
 0x2a7   : > { %v3763_v8 = vpop.f32.mrf.mxu0 }
 0x2a8   : > { %v3940_v34 = vsel %vm2749_vm0, %v3908_v46, 0.0  ;;  %v5200_v8 = vpop.eup %5199 }
 0x2a9   : > { %3972 = vst [vmem:[%s8422_s24 + $0x18] sm:$0xff] %v3940_v34  ;;  %v3766_v2 = vpop.f32.mrf.mxu0  ;;  %v5202_v34 = vpop.eup %5201 }
 0x2aa   : > { %v3909_v63 = vmul.f32 %v5176_v6, %v3766_v2  ;;  %v3786_v14 = vpop.f32.mrf.mxu1  ;;  %v3568_v6 = vadd.f32 1.0, %v5198_v4 }
 0x2ab   : > { %v3768_v30 = vpop.f32.mrf.mxu0  ;;  %v3913_v47 = vmul.f32 %v5180_v51, %v3786_v14  ;;  %v5204_v51 = vpop.eup %5203 }
 0x2ac   : > { %v3941_v3 = vsel %vm2749_vm0, %v3909_v63, 0.0  ;;  %v3788_v33 = vpop.f32.mrf.mxu1  ;;  %v3569_v63 = vadd.f32 1.0, %v5200_v8  ;;  %5215 = vrcp.f32 %v3568_v6  ;;  %v5206_v30 = vpop.eup %5205 }
 0x2ad   : > { %3973 = vst [vmem:[%s8422_s24 + $0x20] sm:$0xff] %v3941_v3  ;;  %v3771_v22 = vpop.f32.mrf.mxu0  ;;  %v3945_v55 = vsel %vm2749_vm0, %v3913_v47, 0.0  ;;  %v4903_v47 = vmul.f32 -1.442695, %v8402_v5  ;;  %v5208_v33 = vpop.eup %5207 }
 0x2ae   : > { %v3910_v37 = vmul.f32 %v5182_v9, %v3771_v22  ;;  %3977 = vst [vmem:[%s8422_s24 + $0x40] sm:$0xff] %v3945_v55  ;;  %v3791_v43 = vpop.f32.mrf.mxu1  ;;  %5217 = vrcp.f32 %v3569_v63  ;;  %v5210_v22 = vpop.eup %5209 }
 0x2af   : > { %v3773_v16 = vpop.f32.mrf.mxu0  ;;  %v3914_v62 = vmul.f32 %v5184_v18, %v3791_v43  ;;  %v3570_v18 = vadd.f32 1.0, %v5206_v30  ;;  %5219 = vpow2.f32 %v4903_v47  ;;  %v5212_v43 = vpop.eup %5211 }
 0x2b0   : > { %v3942_v1 = vsel %vm2749_vm0, %v3910_v37, 0.0  ;;  %v3793_v11 = vpop.f32.mrf.mxu1  ;;  %v3571_v16 = vadd.f32 1.0, %v5208_v33  ;;  %v4907_v33 = vmul.f32 -1.442695, %v8414_v0 }
 0x2b1   : > { %3974 = vst [vmem:[%s8422_s24 + $0x28] sm:$0xff] %v3942_v1  ;;  %v3776_v42 = vpop.f32.mrf.mxu0  ;;  %v3946_v54 = vsel %vm2749_vm0, %v3914_v62, 0.0  ;;  %5221 = vrcp.f32 %v3570_v18  ;;  %v5214_v62 = vpop.eup %5213  ;;  %v3572_v11 = vadd.f32 1.0, %v5212_v43  ;;  %v4908_v43 = vmul.f32 -1.442695, %v8425_v52 }
 0x2b2   : > { %v3911_v48 = vmul.f32 %v5188_v17, %v3776_v42  ;;  %3978 = vst [vmem:[%s8422_s24 + $0x48] sm:$0xff] %v3946_v54  ;;  %v3796_v31 = vpop.f32.mrf.mxu1  ;;  %5223 = vrcp.f32 %v3571_v16  ;;  %v4904_v42 = vmul.f32 -1.442695, %v8409_v40 }
 0x2b3   : > { %v3778_v50 = vpop.f32.mrf.mxu0  ;;  %v3915_v26 = vmul.f32 %v5192_v35, %v3796_v31  ;;  %5225 = vrcp.f32 %v3572_v11  ;;  %v4909_v11 = vmul.f32 -1.442695, %v8419_v23 }
 0x2b4   : > { %v3943_v27 = vsel %vm2749_vm0, %v3911_v48, 0.0  ;;  %v3798_v32 = vpop.f32.mrf.mxu1  ;;  %5227 = vpow2.f32 %v4904_v42 }
 0x2b5   : > { %3975 = vst [vmem:[%s8422_s24 + $0x30] sm:$0xff] %v3943_v27  ;;  %v3781_v61 = vpop.f32.mrf.mxu0  ;;  %v3947_v20 = vsel %vm2749_vm0, %v3915_v26, 0.0 }
 0x2b6   : > { %v3912_v49 = vmul.f32 %v5194_v53, %v3781_v61  ;;  %3979 = vst [vmem:[%s8422_s24 + $0x50] sm:$0xff] %v3947_v20  ;;  %v3801_v58 = vpop.f32.mrf.mxu1 }
 0x2b7   : > { %v3783_v25 = vpop.f32.mrf.mxu0  ;;  %v3916_v7 = vmul.f32 %v5196_v56, %v3801_v58  ;;  %v4905_v58 = vmul.f32 -1.442695, %v8407_v45  ;;  %v4906_v45 = vmul.f32 -1.442695, %v8416_v15 }
 0x2b8   : > { %v3944_v29 = vsel %vm2749_vm0, %v3912_v49, 0.0  ;;  %v3803_v46 = vpop.f32.mrf.mxu1 }
 0x2b9   : > { %3976 = vst [vmem:[%s8422_s24 + $0x38] sm:$0xff] %v3944_v29  ;;  %v3948_v21 = vsel %vm2749_vm0, %v3916_v7, 0.0  ;;  %v5216_v36 = vpop.eup %5215 }
 0x2ba   : > { %3980 = vst [vmem:[%s8422_s24 + $0x58] sm:$0xff] %v3948_v21  ;;  %v3806_v59 = vpop.f32.mrf.mxu1 }
 0x2bb   : > { %v3917_v60 = vmul.f32 %v5202_v34, %v3806_v59  ;;  %v5218_v50 = vpop.eup %5217 }
 0x2bc   : > { %v3808_v2 = vpop.f32.mrf.mxu1  ;;  %v5220_v53 = vpop.eup %5219 }
 0x2bd   : > { %v3949_v14 = vsel %vm2749_vm0, %v3917_v60, 0.0  ;;  %v3573_v40 = vadd.f32 1.0, %v5220_v53 }
 0x2be   : > { %3981 = vst [vmem:[%s8422_s24 + $0x60] sm:$0xff] %v3949_v14  ;;  %v3811_v9 = vpop.f32.mrf.mxu1  ;;  %v5222_v56 = vpop.eup %5221 }
 0x2bf   : > { %v3918_v38 = vmul.f32 %v5204_v51, %v3811_v9  ;;  %v5224_v49 = vpop.eup %5223  ;;  %5229 = vrcp.f32 %v3573_v40 }
 0x2c0   : > { %v3813_v3 = vpop.f32.mrf.mxu1  ;;  %v5226_v8 = vpop.eup %5225  ;;  %5231 = vpow2.f32 %v4905_v58  ;;  %v4912_v58 = vmul.f32 -1.442695, %v8441_v41 }
 0x2c1   : > { %v3950_v39 = vsel %vm2749_vm0, %v3918_v38, 0.0  ;;  %v5228_v21 = vpop.eup %5227 }
 0x2c2   : > { %3982 = vst [vmem:[%s8422_s24 + $0x68] sm:$0xff] %v3950_v39  ;;  %v3816_v55 = vpop.f32.mrf.mxu1  ;;  %v3574_v2 = vadd.f32 1.0, %v5228_v21  ;;  %v4913_v21 = vmul.f32 -1.442695, %v8435_v24 }
 0x2c3   : > { %v3919_v44 = vmul.f32 %v5210_v22, %v3816_v55 }
 0x2c4   : > { %v3818_v37 = vpop.f32.mrf.mxu1  ;;  %5233 = vrcp.f32 %v3574_v2 }
 0x2c5   : > { %v3951_v5 = vsel %vm2749_vm0, %v3919_v44, 0.0  ;;  %5235 = vpow2.f32 %v4906_v45 }
 0x2c6   : > { %3983 = vst [vmem:[%s8422_s24 + $0x70] sm:$0xff] %v3951_v5  ;;  %v3821_v17 = vpop.f32.mrf.mxu1 }
 0x2c7   : > { %v3920_v28 = vmul.f32 %v5214_v62, %v3821_v17 }
 0x2c8   : > { %v3823_v1 = vpop.f32.mrf.mxu1 }
 0x2c9   : > { %v3952_v10 = vsel %vm2749_vm0, %v3920_v28, 0.0 }
 0x2ca   : > { %3984 = vst [vmem:[%s8422_s24 + $0x78] sm:$0xff] %v3952_v10  ;;  %v3826_v54 = vpop.f32.mrf.mxu1 }
 0x2cb   : > { %v3921_v35 = vmul.f32 %v5216_v36, %v3826_v54 }
 0x2cc   : > { %v3828_v48 = vpop.f32.mrf.mxu1  ;;  %v5230_v51 = vpop.eup %5229 }
 0x2cd   : > { %v3953_v31 = vsel %vm2749_vm0, %v3921_v35, 0.0  ;;  %v5232_v9 = vpop.eup %5231  ;;  %v4910_v48 = vmul.f32 -1.442695, %v8432_v19 }
 0x2ce   : > { %3985 = vst [vmem:[%s8422_s24 + $0x80] sm:$0xff] %v3953_v31  ;;  %v3831_v26 = vpop.f32.mrf.mxu1  ;;  %v3575_v38 = vadd.f32 1.0, %v5232_v9 }
 0x2cf   : > { %v3922_v13 = vmul.f32 %v5218_v50, %v3831_v26 }
 0x2d0   : > { %v3833_v27 = vpop.f32.mrf.mxu1  ;;  %5237 = vrcp.f32 %v3575_v38 }
 0x2d1   : > { %v3954_v32 = vsel %vm2749_vm0, %v3922_v13, 0.0  ;;  %v5234_v3 = vpop.eup %5233  ;;  %5239 = vpow2.f32 %v4907_v33 }
 0x2d2   : > { %3986 = vst [vmem:[%s8422_s24 + $0x88] sm:$0xff] %v3954_v32  ;;  %v3836_v12 = vpop.f32.mrf.mxu1  ;;  %v5236_v55 = vpop.eup %5235 }
 0x2d3   : > { %v3923_v61 = vmul.f32 %v5222_v56, %v3836_v12  ;;  %v3576_v44 = vadd.f32 1.0, %v5236_v55  ;;  %v4911_v56 = vmul.f32 -1.442695, %v8429_v57 }
 0x2d4   : > { %v3838_v20 = vpop.f32.mrf.mxu1 }
 0x2d5   : > { %v3955_v4 = vsel %vm2749_vm0, %v3923_v61, 0.0  ;;  %5241 = vrcp.f32 %v3576_v44 }
 0x2d6   : > { %3987 = vst [vmem:[%s8422_s24 + $0x90] sm:$0xff] %v3955_v4  ;;  %v3841_v25 = vpop.f32.mrf.mxu1  ;;  %5243 = vpow2.f32 %v4908_v43 }
 0x2d7   : > { %v3924_v7 = vmul.f32 %v5224_v49, %v3841_v25 }
 0x2d8   : > { %v3843_v29 = vpop.f32.mrf.mxu1 }
 0x2d9   : > { %v3956_v46 = vsel %vm2749_vm0, %v3924_v7, 0.0 }
 0x2da   : > { %3988 = vst [vmem:[%s8422_s24 + $0x98] sm:$0xff] %v3956_v46  ;;  %v3846_v6 = vpop.f32.mrf.mxu1 }
 0x2db   : > { %v3925_v34 = vmul.f32 %v5226_v8, %v3846_v6 }
 0x2dc   : > { %v3848_v59 = vpop.f32.mrf.mxu1 }
 0x2dd   : > { %v3957_v60 = vsel %vm2749_vm0, %v3925_v34, 0.0  ;;  %v5238_v37 = vpop.eup %5237 }
 0x2de   : > { %3989 = vst [vmem:[%s8422_s24 + $0xa0] sm:$0xff] %v3957_v60  ;;  %v3851_v63 = vpop.f32.mrf.mxu1  ;;  %v5240_v17 = vpop.eup %5239 }
 0x2df   : > { %v3926_v14 = vmul.f32 %v5230_v51, %v3851_v63  ;;  %v3577_v28 = vadd.f32 1.0, %v5240_v17 }
 0x2e0   : > { %v3853_v30 = vpop.f32.mrf.mxu1 }
 0x2e1   : > { %v3958_v47 = vsel %vm2749_vm0, %v3926_v14, 0.0  ;;  %5245 = vrcp.f32 %v3577_v28 }
 0x2e2   : > { %3990 = vst [vmem:[%s8422_s24 + $0xa8] sm:$0xff] %v3958_v47  ;;  %v5242_v1 = vpop.eup %5241  ;;  %5247 = vpow2.f32 %v4909_v11 }
 0x2e3   : > { %v5244_v54 = vpop.eup %5243 }
 0x2e4   : > { %v3578_v35 = vadd.f32 1.0, %v5244_v54 }
 0x2e6   : > { %5249 = vrcp.f32 %v3578_v35 }
 0x2e7   : > { %5251 = vpow2.f32 %v4910_v48 }
 0x2e8   : > { %v3856_v18 = vpop.f32.mrf.mxu1 }
 0x2e9   : > { %v3927_v39 = vmul.f32 %v5234_v3, %v3856_v18 }
 0x2ea   : > { %v3858_v22 = vpop.f32.mrf.mxu1 }
 0x2eb   : > { %v3959_v15 = vsel %vm2749_vm0, %v3927_v39, 0.0 }
 0x2ec   : > { %3991 = vst [vmem:[%s8422_s24 + $0xb0] sm:$0xff] %v3959_v15 }
 0x2ee   : > { %v5246_v31 = vpop.eup %5245 }
 0x2ef   : > { %v5248_v13 = vpop.eup %5247 }
 0x2f0   : > { %v3579_v27 = vadd.f32 1.0, %v5248_v13 }
 0x2f2   : > { %5253 = vrcp.f32 %v3579_v27 }
 0x2f3   : > { %v5250_v32 = vpop.eup %5249  ;;  %5255 = vpow2.f32 %v4911_v56 }
 0x2f4   : > { %v5252_v20 = vpop.eup %5251 }
 0x2f5   : > { %v3861_v16 = vpop.f32.mrf.mxu1  ;;  %v3580_v4 = vadd.f32 1.0, %v5252_v20 }
 0x2f6   : > { %v3928_v5 = vmul.f32 %v5238_v37, %v3861_v16 }
 0x2f7   : > { %v3863_v62 = vpop.f32.mrf.mxu1  ;;  %5257 = vrcp.f32 %v3580_v4 }
 0x2f8   : > { %v3960_v0 = vsel %vm2749_vm0, %v3928_v5, 0.0  ;;  %5259 = vpow2.f32 %v4912_v58 }
 0x2f9   : > { %3992 = vst [vmem:[%s8422_s24 + $0xb8] sm:$0xff] %v3960_v0 }
 0x2ff   : > { %v5254_v49 = vpop.eup %5253 }
 0x300   : > { %v5256_v46 = vpop.eup %5255 }
 0x301   : > { %v3581_v8 = vadd.f32 1.0, %v5256_v46 }
 0x303   : > { %v3866_v10 = vpop.f32.mrf.mxu1  ;;  %5261 = vrcp.f32 %v3581_v8 }
 0x304   : > { %v3929_v36 = vmul.f32 %v5242_v1, %v3866_v10  ;;  %v5258_v6 = vpop.eup %5257  ;;  %5263 = vpow2.f32 %v4913_v21 }
 0x305   : > { %v3868_v42 = vpop.f32.mrf.mxu1  ;;  %v5260_v2 = vpop.eup %5259 }
 0x306   : > { %v3961_v52 = vsel %vm2749_vm0, %v3929_v36, 0.0  ;;  %v3582_v45 = vadd.f32 1.0, %v5260_v2 }
 0x307   : > { %3993 = vst [vmem:[%s8422_s24 + $0xc0] sm:$0xff] %v3961_v52 }
 0x308   : > { %5265 = vrcp.f32 %v3582_v45 }
 0x310   : > { %v5262_v51 = vpop.eup %5261 }
 0x311   : > { %v3871_v50 = vpop.f32.mrf.mxu1  ;;  %v5264_v47 = vpop.eup %5263 }
 0x312   : > { %v3930_v26 = vmul.f32 %v5246_v31, %v3871_v50  ;;  %v3583_v9 = vadd.f32 1.0, %v5264_v47 }
 0x313   : > { %v3873_v53 = vpop.f32.mrf.mxu1 }
 0x314   : > { %v3962_v23 = vsel %vm2749_vm0, %v3930_v26, 0.0  ;;  %5267 = vrcp.f32 %v3583_v9 }
 0x315   : > { %3994 = vst [vmem:[%s8422_s24 + $0xc8] sm:$0xff] %v3962_v23  ;;  %v5266_v38 = vpop.eup %5265 }
 0x31e   : > { %v3876_v40 = vpop.f32.mrf.mxu1 }
 0x31f   : > { %v3931_v12 = vmul.f32 %v5250_v32, %v3876_v40 }
 0x320   : > { %v3878_v61 = vpop.f32.mrf.mxu1 }
 0x321   : > { %v3963_v19 = vsel %vm2749_vm0, %v3931_v12, 0.0  ;;  %v5268_v22 = vpop.eup %5267 }
 0x322   : > { %3995 = vst [vmem:[%s8422_s24 + $0xd0] sm:$0xff] %v3963_v19 }
 0x32b   : > { %v3881_v25 = vpop.f32.mrf.mxu1 }
 0x32c   : > { %v3932_v7 = vmul.f32 %v5254_v49, %v3881_v25 }
 0x32d   : > { %v3883_v29 = vpop.f32.mrf.mxu1 }
 0x32e   : > { %v3964_v57 = vsel %vm2749_vm0, %v3932_v7, 0.0 }
 0x32f   : > { %3996 = vst [vmem:[%s8422_s24 + $0xd8] sm:$0xff] %v3964_v57 }
 0x337   : > { %v3886_v34 = vpop.f32.mrf.mxu1 }
 0x338   : > { %v3933_v59 = vmul.f32 %v5258_v6, %v3886_v34 }
 0x339   : > { %v3888_v60 = vpop.f32.mrf.mxu1 }
 0x33a   : > { %v3965_v41 = vsel %vm2749_vm0, %v3933_v59, 0.0 }
 0x33b   : > { %3997 = vst [vmem:[%s8422_s24 + $0xe0] sm:$0xff] %v3965_v41 }
 0x345   : > { %v3891_v63 = vpop.f32.mrf.mxu1 }
 0x346   : > { %v3934_v14 = vmul.f32 %v5262_v51, %v3891_v63 }
 0x347   : > { %v3893_v30 = vpop.f32.mrf.mxu1 }
 0x348   : > { %v3966_v24 = vsel %vm2749_vm0, %v3934_v14, 0.0 }
 0x349   : > { %3998 = vst [vmem:[%s8422_s24 + $0xe8] sm:$0xff] %v3966_v24 }
 0x351   : > { %v3896_v3 = vpop.f32.mrf.mxu1 }
 0x352   : > { %v3935_v33 = vmul.f32 %v5266_v38, %v3896_v3 }
 0x353   : > { %v3898_v18 = vpop.f32.mrf.mxu1 }
 0x354   : > { %v3967_v39 = vsel %vm2749_vm0, %v3935_v33, 0.0 }
 0x355   : > { %3999 = vst [vmem:[%s8422_s24 + $0xf0] sm:$0xff] %v3967_v39 }
 0x35d   : > { %v3901_v15 = vpop.f32.mrf.mxu1 }
 0x35e   : > { %v3936_v55 = vmul.f32 %v5268_v22, %v3901_v15 }
 0x35f   : > { %v3903_v44 = vpop.f32.mrf.mxu1 }
 0x360   : > { %v3968_v37 = vsel %vm2749_vm0, %v3936_v55, 0.0 }
 0x361   : > { %4000 = vst [vmem:[%s8422_s24 + $0xf8] sm:$0xff] %v3968_v37 }
 0x362   : > { %5285 = shalt.err (!%p5282_p5)
}
 0x363   : > { %s5286_s11 = scalar_lea.hbm %s8517_s6, 4096  ;;  %s5290_s21 = scalar_lea.hbm %s8574_s4, 8192 }
 0x364   : > { %p5287_p6 = scmp.ne.s32.totalorder %s8517_s6, %s5286_s11  ;;  %p5291_p10 = scmp.lt.s32.totalorder %s8517_s6, %s8574_s4 }
 0x365   : > { %p5292_p11 = scmp.lt.s32.totalorder %s5290_s21, %s5286_s11 }
 0x366   : > { %p5288_p7 = pnand %p5287_p6, %p5419_p4 }
 0x367   : > { %p5293_p12 = por %p5292_p11, %p5291_p10 }
 0x368   : > { %p5289_p9 = pneg %p5288_p7 }
 0x36a   : > { %p5294_p13 = pnand %p5293_p12, %p5289_p9 }
 0x36c   : > { %5297 = shalt.err (!%p5294_p13)
}
 0x36d   : > { %s5352_s24 = smov 128   ;;  %s5353_s26 = smov 8  }
 0x36e   : > { %5083 = dma.vmem_to_hbm [thread:$0]  (%p5419_p4), %s8519_s29, 4096, %s8517_s6, %s8525_s18, %s5352_s24, %s5352_s24, %s5353_s26  }
 0x36f PF: > { %p5089_p0 = scmp.ge.s32.totalorder %s5348_s20, 2  ;;  %s4032_s30 = sand.u32 1, %s5328_s15  }
 0x370   : > { %s4033_s5 = scalar_lea.sflag [#allocation3], %s4032_s30 }
 0x371   : > { %p5086_p1 = pnand %p5089_p0, %p5426_p8 }
 0x373   : > { %p5087_p2 = pneg %p5086_p1 }
 0x375   : > { %5323 = dma.done.wait (%p5087_p2), %s4033_s5, 4096  }
 0x376   : > { %5325 = vsyncadd (%p5087_p2), %s4033_s5, 4294963200  ;;  %s17_s20 = sadd.s32 1, %s5348_s20   ;;  %s9408_s15 = smov %s5332_s16 }
 0x377   : > { %p14_p3 = scmp.ge.s32.totalorder %s17_s20, 4   ;;  %s9409_s16 = smov %s5336_s17 }
 0x378   : > { %s9410_s17 = smov %s5432_s28  ;;  %s9411_s18 = smov %s5344_s19 }
 0x379   : > { %s9412_s19 = smov %s9414_s23  ;;  %16 = sbr.rel (!%p14_p3) target bundleno = 4 (0x4), region = 80 }
 0x37e   :  { %4038 = vsyncpa [#allocation3], 1 }
 0x37f   :  { %4040 = vsyncpa [#allocation3 + $0x1], 1 }

</bundles_post_ra>
